<compile_context>
chip_gen: v7x
topology: tpu7x:2x2x1
jax: 0.10.0
libtpu: 0.0.40
codegen_flags: <defaults>
</compile_context>

<pallas_src>
import functools

import jax
import jax.numpy as jnp
from jax import lax
from jax.experimental import pallas as pl
from jax.experimental.pallas import tpu as pltpu

C_FEAT = 2048        # backbone output channels
EPS = 1e-5           # nn.BatchNorm1d default eps


def fold_bn(gamma, beta, mean, var, eps=EPS):
    """Eval-mode BatchNorm1d -> per-channel scale/shift."""
    scale = gamma / jnp.sqrt(var + eps)
    shift = beta - mean * scale
    return scale.reshape(1, -1), shift.reshape(1, -1)


def _pick_parallel_splits(N, S):
    """v7x has 2 TensorCores; with a tiny batch, split the spatial reduction
    across a second 'parallel' grid axis so both cores get work."""
    if N >= 2:
        return 1
    if S % 2 == 0 and (S // 2) % 128 == 0:   # keep split tiles lane-aligned
        return 2
    return 1


def _pick_spatial_tile(S_p, cap=1024):
    """Largest spatial tile that keeps the (tile, 2048) f32 intermediate within
    VMEM budget.  Per-grid-step overhead (~600 cycles) dominates this
    memory-bound kernel, so ideally tile == S (reduction axis collapses)."""
    if S_p <= cap:
        return S_p
    for t in range(cap - cap % 128, 127, -128):   # lane-aligned divisors
        if S_p % t == 0:
            return t
    return S_p   # only reached when P == 1: full extent is always a legal block


# ----------------------------------------------------------------------------
# Fused kernel: 1x1-conv (bf16 MXU matmul, lhs-transposed) + bias + ReLU +
#               spatial-sum (GAP) + folded (gap_bn o bn_classifier.BN o 1/S)
#               affine epilogue.
#
# Grid: (N, P, K)  axis 0 = batch ("parallel"), axis 1 = spatial split
#                  ("parallel", for v7x megacore when N is small), axis 2 =
#                  spatial chunks ("arbitrary", reduction; output block index
#                  constant along it -> accumulator pattern).
#   x_ref   : (1, Cin, Ts)     f32  input slab, spatial on the LANE axis
#   w_ref   : (Cin, 2048)      bf16 resident 1x1-conv weight (constant index map)
#   par_ref : (3, 2048)        f32  rows = [bias, scale(*1/S), shift/P]
#   o_ref   : (1, 1, 1, 2048)  f32  per-(batch, split) partial bn_features
#   acc_ref : (1, 2048)        f32  VMEM scratch spatial-sum accumulator
# ----------------------------------------------------------------------------
def fused_conv_gap_bn_kernel(x_ref, w_ref, par_ref, o_ref, acc_ref):
    k = pl.program_id(2)

    @pl.when(k == 0)
    def _init():
        acc_ref[...] = jnp.zeros_like(acc_ref)

    x = x_ref[0].astype(jnp.bfloat16)                       # (Cin, Ts) lane-dense
    # y[s, d] = sum_c x[c, s] * w[c, d]  (TN matmul: contract sublane dim of both)
    y = lax.dot_general(
        x, w_ref[...],
        dimension_numbers=(((0,), (0,)), ((), ())),
        preferred_element_type=jnp.float32)                 # (Ts, 2048) f32
    # TODO(synk): once the real Cin>=512 backbone tail lands, fold the bias into
    # the matmul (ones row in x / bias row in w) to keep this add off the VPU.
    y = jnp.maximum(y + par_ref[0:1, :], 0.0)               # bias + ReLU
    acc_ref[...] += jnp.sum(y, axis=0, keepdims=True)       # spatial partial sum

    @pl.when(k == pl.num_programs(2) - 1)
    def _finalize():
        # scale row folds 1/S and BOTH eval BNs; shift row is pre-divided by P
        # so the tiny jnp sum over splits reconstructs the exact affine.
        o_ref[0, 0] = acc_ref[...] * par_ref[1:2, :] + par_ref[2:3, :]


def backbone_gap_bn_fused(x_ncs, w_bf16, pars, *, spatial_tile, parallel_splits):
    N, Cin, S = x_ncs.shape
    P = parallel_splits
    assert S % P == 0
    S_p = S // P
    assert S_p % spatial_tile == 0
    num_k = S_p // spatial_tile
    grid = (N, P, num_k)

    out = pl.pallas_call(
        fused_conv_gap_bn_kernel,
        out_shape=jax.ShapeDtypeStruct((N, P, 1, C_FEAT), jnp.float32),
        grid_spec=pltpu.PrefetchScalarGridSpec(
            num_scalar_prefetch=0,
            grid=grid,
            in_specs=[
                # x: spatial on the lane axis, streamed per (batch, split, chunk)
                pl.BlockSpec((1, Cin, spatial_tile),
                             lambda n, p, k: (n, 0, p * num_k + k)),
                # resident weight and fused affine params (constant index maps)
                pl.BlockSpec((Cin, C_FEAT), lambda n, p, k: (0, 0)),
                pl.BlockSpec((3, C_FEAT), lambda n, p, k: (0, 0)),
            ],
            out_specs=pl.BlockSpec((1, 1, 1, C_FEAT),
                                   lambda n, p, k: (n, p, 0, 0)),
            scratch_shapes=[pltpu.VMEM((1, C_FEAT), jnp.float32)],
        ),
        compiler_params=pltpu.CompilerParams(
            dimension_semantics=("parallel", "parallel", "arbitrary"),
            vmem_limit_bytes=32 * 1024 * 1024),
    )(x_ncs, w_bf16, pars)

    # Tiny combine of per-split partial results (P == 1 whenever batch >= 2).
    return out.reshape(N, P, C_FEAT).sum(axis=1)


def model_forward_eval(x_nchw, params, *, spatial_tile=None, parallel_splits=None):
    """Eval forward: return bn_features, shape (N, 2048)."""
    N, Cin, H, W = x_nchw.shape
    S = H * W

    # NCHW -> (N, Cin, H*W): contiguous reshape only (no transpose, no extra
    # HBM pass); the bf16 cast happens inside the kernel.
    x_ncs = x_nchw.reshape(N, Cin, S)

    w = params["w_bb"].astype(jnp.bfloat16)                      # (Cin, 2048)
    bias = params["b_bb"].reshape(1, C_FEAT).astype(jnp.float32)

    s1, b1 = fold_bn(params["g1"], params["be1"], params["m1"], params["v1"])
    s2, b2 = fold_bn(params["g2"], params["be2"], params["m2"], params["v2"])
    scale = (s1 * s2) * (1.0 / S)      # both eval BNs + GAP mean folded
    shift = b1 * s2 + b2

    P = parallel_splits if parallel_splits is not None else _pick_parallel_splits(N, S)
    tile = spatial_tile if spatial_tile is not None else _pick_spatial_tile(S // P)

    # One resident (3, 2048) operand: [bias, scale, shift/P].
    pars = jnp.concatenate(
        [bias, scale.astype(jnp.float32), (shift / P).astype(jnp.float32)],
        axis=0)

    # NOTE: cls_score (bn_classifier.classifier) is intentionally not computed:
    # the eval forward discards it.
    return backbone_gap_bn_fused(x_ncs, w, pars,
                                 spatial_tile=tile, parallel_splits=P)


if __name__ == "__main__":
    key = jax.random.PRNGKey(0)
    ks = jax.random.split(key, 12)

    # small shapes: batch=2, channels=4, spatial=16x16, pid_num=8
    N, Cin, H, W = 2, 4, 16, 16
    pid_num = 8
    S = H * W

    x = jax.random.normal(ks[0], (N, Cin, H, W), dtype=jnp.float32)

    params = {
        # backbone stand-in (1x1 conv to 2048 channels)
        "w_bb": jax.random.normal(ks[1], (Cin, C_FEAT), jnp.float32) * 0.05,
        "b_bb": jax.random.normal(ks[2], (1, C_FEAT), jnp.float32) * 0.05,
        # gap_bn = GAP_BN(2048).BN  (BatchNorm1d eval statistics / affine)
        "g1": 1.0 + 0.1 * jax.random.normal(ks[3], (C_FEAT,), jnp.float32),
        "be1": 0.1 * jax.random.normal(ks[4], (C_FEAT,), jnp.float32),
        "m1": 0.1 * jax.random.normal(ks[5], (C_FEAT,), jnp.float32),
        "v1": 1.0 + 0.1 * jax.random.uniform(ks[6], (C_FEAT,), jnp.float32),
        # bn_classifier = BN_Classifier(2048, pid_num).BN
        "g2": 1.0 + 0.1 * jax.random.normal(ks[7], (C_FEAT,), jnp.float32),
        "be2": 0.1 * jax.random.normal(ks[8], (C_FEAT,), jnp.float32),
        "m2": 0.1 * jax.random.normal(ks[9], (C_FEAT,), jnp.float32),
        "v2": 1.0 + 0.1 * jax.random.uniform(ks[10], (C_FEAT,), jnp.float32),
        # bn_classifier.classifier : Linear(2048, pid_num, bias=False)
        # (kept for completeness; unused on the eval path, which discards cls_score)
        "w_cls_t": jax.random.normal(ks[11], (C_FEAT, pid_num), jnp.float32) * 0.02,
    }

    # pure-JAX reference (same bf16 rounding of x and w as the kernel, f32 math)
    def reference(x_nchw, p):
        n, c, h, w_ = x_nchw.shape
        s = h * w_
        xr = x_nchw.reshape(n, c, s).astype(jnp.bfloat16).astype(jnp.float32)
        wr = p["w_bb"].astype(jnp.bfloat16).astype(jnp.float32)
        fm = jnp.maximum(
            jnp.einsum("ncs,cd->nsd", xr, wr, precision=lax.Precision.HIGHEST)
            + p["b_bb"].reshape(1, 1, -1), 0.0)
        gap = jnp.mean(fm, axis=1)
        s1, b1 = fold_bn(p["g1"], p["be1"], p["m1"], p["v1"])
        s2, b2 = fold_bn(p["g2"], p["be2"], p["m2"], p["v2"])
        return (gap * s1 + b1) * s2 + b2

    ref = reference(x, params)

    # 1) default config: tile == S -> reduction grid axis collapses to 1 step
    fwd = jax.jit(model_forward_eval)
    out = jax.block_until_ready(fwd(x, params))
    assert out.shape == (N, C_FEAT)
    assert jnp.allclose(out, ref, atol=1e-3, rtol=1e-3)

    # 2) multi-chunk spatial reduction (exercises the k-axis accumulator path)
    fwd_k = jax.jit(functools.partial(model_forward_eval, spatial_tile=128))
    out_k = jax.block_until_ready(fwd_k(x, params))
    assert jnp.allclose(out_k, ref, atol=1e-3, rtol=1e-3)

    # 3) batch == 1: spatial split across the second "parallel" axis (v7x megacore)
    out_p = jax.block_until_ready(jax.jit(model_forward_eval)(x[:1], params))
    assert out_p.shape == (1, C_FEAT)
    assert jnp.allclose(out_p, ref[:1], atol=1e-3, rtol=1e-3)

    print("KERNEL_OK")
</pallas_src>

<mosaic_0001>
module attributes {stable_mosaic.version = 11 : i64} {
  func.func @fused_conv_gap_bn_kernel(%arg0: i32, %arg1: i32, %arg2: i32, %arg3: memref<1x4x256xf32, #tpu.memory_space<vmem>>, %arg4: memref<4x2048xbf16, #tpu.memory_space<vmem>>, %arg5: memref<3x2048xf32, #tpu.memory_space<vmem>>, %arg6: memref<1x1x1x2048xf32, #tpu.memory_space<vmem>>, %arg7: memref<1x2048xf32, #tpu.memory_space<vmem>>) attributes {dimension_semantics = [#tpu.dimension_semantics<parallel>, #tpu.dimension_semantics<parallel>, #tpu.dimension_semantics<arbitrary>], iteration_bounds = array<i64: 2, 1, 1>, scalar_prefetch = 0 : i64, scratch_operands = 1 : i64, tpu.core_type = #tpu.core_type<tc>, window_params = [{transform_indices = @transform_0, window_bounds = array<i64: 1, 4, 256>}, {pipeline_mode = #tpu.pipeline_mode<synchronous>, transform_indices = @transform_1, window_bounds = array<i64: 4, 2048>}, {pipeline_mode = #tpu.pipeline_mode<synchronous>, transform_indices = @transform_2, window_bounds = array<i64: 3, 2048>}, {transform_indices = @transform_3, window_bounds = array<i64: 1, 1, 1, 2048>}]} {
    %c0_i32 = arith.constant 0 : i32
    %0 = arith.cmpi eq, %arg2, %c0_i32 : i32
    %1 = arith.extui %0 : i1 to i32
    %c0_i32_0 = arith.constant 0 : i32
    %2 = arith.cmpi ne, %1, %c0_i32_0 : i32
    scf.if %2 {
      %cst_15 = arith.constant 0.000000e+00 : f32
      %21 = vector.broadcast %cst_15 : f32 to vector<1x2048xf32>
      %c0_16 = arith.constant 0 : index
      %c0_17 = arith.constant 0 : index
      %22 = vector.load %arg7[%c0_16, %c0_17] : memref<1x2048xf32, #tpu.memory_space<vmem>>, vector<1x2048xf32>
      tpu.vector_store %arg7[%c0_16, %c0_17], %21 {strides = array<i32>} : memref<1x2048xf32, #tpu.memory_space<vmem>>, vector<1x2048xf32>,
    } else {
    }
    %c0 = arith.constant 0 : index
    %c0_1 = arith.constant 0 : index
    %c0_2 = arith.constant 0 : index
    %3 = vector.load %arg3[%c0, %c0_1, %c0_2] : memref<1x4x256xf32, #tpu.memory_space<vmem>>, vector<1x4x256xf32>
    %4 = vector.shape_cast %3 : vector<1x4x256xf32> to vector<4x256xf32>
    %5 = arith.truncf %4 : vector<4x256xf32> to vector<4x256xbf16>
    %c0_3 = arith.constant 0 : index
    %c0_4 = arith.constant 0 : index
    %6 = vector.load %arg4[%c0_3, %c0_4] : memref<4x2048xbf16, #tpu.memory_space<vmem>>, vector<4x2048xbf16>
    %cst = arith.constant dense<0.000000e+00> : vector<256x2048xf32>
    %7 = tpu.matmul %5, %6, %cst {dimension_numbers = #tpu.dot_dimension_numbers<[0], [0], [1], [1], [0, 1, 1, 1], [], []>} : vector<4x256xbf16>, vector<4x2048xbf16>, vector<256x2048xf32> -> vector<256x2048xf32>
    %c0_5 = arith.constant 0 : index
    %c0_6 = arith.constant 0 : index
    %8 = vector.load %arg5[%c0_5, %c0_6] : memref<3x2048xf32, #tpu.memory_space<vmem>>, vector<1x2048xf32>
    %9 = vector.broadcast %8 : vector<1x2048xf32> to vector<256x2048xf32>
    %10 = arith.addf %7, %9 : vector<256x2048xf32>
    %cst_7 = arith.constant 0.000000e+00 : f32
    %11 = vector.broadcast %cst_7 : f32 to vector<256x2048xf32>
    %12 = arith.maximumf %10, %11 : vector<256x2048xf32>
    %c0_8 = arith.constant 0 : index
    %c0_9 = arith.constant 0 : index
    %13 = vector.load %arg7[%c0_8, %c0_9] : memref<1x2048xf32, #tpu.memory_space<vmem>>, vector<1x2048xf32>
    %cst_10 = arith.constant dense<0.000000e+00> : vector<2048xf32>
    %14 = vector.multi_reduction <add>, %12, %cst_10 [0] : vector<256x2048xf32> to vector<2048xf32>
    %15 = vector.shape_cast %14 : vector<2048xf32> to vector<1x2048xf32>
    %16 = arith.addf %13, %15 : vector<1x2048xf32>
    %c0_11 = arith.constant 0 : index
    %c0_12 = arith.constant 0 : index
    %17 = vector.load %arg7[%c0_11, %c0_12] : memref<1x2048xf32, #tpu.memory_space<vmem>>, vector<1x2048xf32>
    tpu.vector_store %arg7[%c0_11, %c0_12], %16 {strides = array<i32>} : memref<1x2048xf32, #tpu.memory_space<vmem>>, vector<1x2048xf32>,
    %c0_i32_13 = arith.constant 0 : i32
    %18 = arith.cmpi eq, %arg2, %c0_i32_13 : i32
    %19 = arith.extui %18 : i1 to i32
    %c0_i32_14 = arith.constant 0 : i32
    %20 = arith.cmpi ne, %19, %c0_i32_14 : i32
    scf.if %20 {
      %c0_15 = arith.constant 0 : index
      %c0_16 = arith.constant 0 : index
      %21 = vector.load %arg7[%c0_15, %c0_16] : memref<1x2048xf32, #tpu.memory_space<vmem>>, vector<1x2048xf32>
      %c1 = arith.constant 1 : index
      %c0_17 = arith.constant 0 : index
      %22 = vector.load %arg5[%c1, %c0_17] : memref<3x2048xf32, #tpu.memory_space<vmem>>, vector<1x2048xf32>
      %23 = arith.mulf %21, %22 : vector<1x2048xf32>
      %c2 = arith.constant 2 : index
      %c0_18 = arith.constant 0 : index
      %24 = vector.load %arg5[%c2, %c0_18] : memref<3x2048xf32, #tpu.memory_space<vmem>>, vector<1x2048xf32>
      %25 = arith.addf %23, %24 : vector<1x2048xf32>
      %c0_19 = arith.constant 0 : index
      %c0_20 = arith.constant 0 : index
      %c0_21 = arith.constant 0 : index
      %c0_22 = arith.constant 0 : index
      %26 = vector.load %arg6[%c0_19, %c0_20, %c0_21, %c0_22] : memref<1x1x1x2048xf32, #tpu.memory_space<vmem>>, vector<1x1x1x2048xf32>
      %27 = vector.shape_cast %26 : vector<1x1x1x2048xf32> to vector<1x2048xf32>
      %28 = vector.shape_cast %25 : vector<1x2048xf32> to vector<1x1x1x2048xf32>
      tpu.vector_store %arg6[%c0_19, %c0_20, %c0_21, %c0_22], %28 {strides = array<i32>} : memref<1x1x1x2048xf32, #tpu.memory_space<vmem>>, vector<1x1x1x2048xf32>,
    } else {
    }
    return
  }
  func.func @transform_0(%arg0: i32, %arg1: i32, %arg2: i32) -> (i32, i32, i32) {
    %c1_i32 = arith.constant 1 : i32
    %0 = arith.muli %arg1, %c1_i32 : i32
    %1 = arith.addi %0, %arg2 : i32
    %c0_i32 = arith.constant 0 : i32
    %c0_i32_0 = arith.constant 0 : i32
    return %arg0, %c0_i32, %1 : i32, i32, i32
  }
  func.func @transform_1(%arg0: i32, %arg1: i32, %arg2: i32) -> (i32, i32) {
    %c0_i32 = arith.constant 0 : i32
    %c0_i32_0 = arith.constant 0 : i32
    %c0_i32_1 = arith.constant 0 : i32
    return %c0_i32, %c0_i32_0 : i32, i32
  }
  func.func @transform_2(%arg0: i32, %arg1: i32, %arg2: i32) -> (i32, i32) {
    %c0_i32 = arith.constant 0 : i32
    %c0_i32_0 = arith.constant 0 : i32
    %c0_i32_1 = arith.constant 0 : i32
    return %c0_i32, %c0_i32_0 : i32, i32
  }
  func.func @transform_3(%arg0: i32, %arg1: i32, %arg2: i32) -> (i32, i32, i32, i32) {
    %c0_i32 = arith.constant 0 : i32
    %c0_i32_0 = arith.constant 0 : i32
    %c0_i32_1 = arith.constant 0 : i32
    return %arg0, %arg1, %c0_i32, %c0_i32_0 : i32, i32, i32, i32
  }
}

</mosaic_0001>

<bundles_post_ra>
// kernel: model_forward_eval.1
= control target key start
LH: loop header
LB: loop body
LE: loop exit
PB: predicated region body
PF: predicated region fallthrough
CT: control target
= control target key end

     0   :  { %s3633_s12 = smov 0   ;;  %s3635_s13 = smov 0   ;;  %s4798_s0 = inlined_call_operand.vmem [shape: f32[2,4,256], index: 0, kind: input, shape index: {}]   ;;  %s4799_s1 = inlined_call_operand.vmem [shape: bf16[4,2048], index: 1, kind: input, shape index: {}]   ;;  %s4800_s2 = inlined_call_operand.vmem [shape: f32[3,2048], index: 2, kind: input, shape index: {}]   ;;  %s4801_s3 = inlined_call_operand.vmem [shape: f32[2,1,1,2048], index: 3, kind: output, shape index: {}]  }
   0x1   :  { %s3637_s14 = smov 0  }
   0x2 LB: > { %s32_s15 = sadd.s32 1, %s3604_s13  ;;  %p3404_p0 = scmp.ge.s32.totalorder %s3608_s14, 1  ;;  %s3608_s14 = sphi %s3637_s14, %s13_s14   ;;  %s3604_s13 = sphi %s3635_s13, %s4809_s13   ;;  %s3600_s12 = sphi %s3633_s12, %s4808_s12  }
   0x3   : > { %p34_p1 = scmp.ge.s32.totalorder %s32_s15, 2  ;;  %p169_p2 = scmp.lt.s32.totalorder %s3608_s14, 3 }
   0x5   : > { %s4811_s15 = smov (%p34_p1, %s32_s15), 0  ;;  %p170_p3 = pnand %p3404_p0, %p169_p2 }
   0x6   : > { %p203_p4 = scmp.lt.s32.totalorder (!%p170_p3), %s3600_s12, 1  ;;  %v234_v0 = vld [vmem:[%s4799_s1] sm:$0xff] (!%p170_p3)  ;;  %v243_v1 = vlaneseq (!%p170_p3)  ;;  %v3610_v2 = vmov (!%p170_p3), 1983009808   ;;  %v3611_v4 = vmov (!%p170_p3), 0   ;;  %v235_v5 = vld [vmem:[%s4799_s1 + $0x8] sm:$0xff] (!%p170_p3) }
   0x7   : > { %173 = sbr.rel (%p170_p3) target bundleno = 876 (0x36c), region = 32  ;;  %v361_v3 = vunpack.c.l.s4 (!%p170_p3), %v3610_v2  ;;  %557 = vmatprep.mubr.bf16.mxu0 (!%p170_p3), %v3611_v4  ;;  %750 = vmatprep.mubr.bf16.mxu1 (!%p170_p3), %v3611_v4  ;;  %v359_v8 = vcombine.high (!%p170_p3), %v234_v0, %v234_v0  ;;  %v376_v9 = vcombine.high (!%p170_p3), %v235_v5, %v235_v5  ;;  %vm476_vm0 = vcmask (!%p170_p3), 1041408   ;;  %v236_v25 = vld [vmem:[%s4799_s1 + $0x10] sm:$0xff] (!%p170_p3)  ;;  %v237_v51 = vld [vmem:[%s4799_s1 + $0x18] sm:$0xff] (!%p170_p3) }
   0x8   : > { %v3661_v6 = vshrl.u32 (!%p170_p3), %v243_v1, 7  ;;  %v393_v26 = vcombine.high (!%p170_p3), %v236_v25, %v236_v25  ;;  %vm427_vm1 = vcmask (!%p170_p3), 31744   ;;  %v410_v53 = vcombine.high (!%p170_p3), %v237_v51, %v237_v51  ;;  %v238_v59 = vld [vmem:[%s4800_s2] ss:$4 sm:$0xff] (!%p170_p3) }
   0x9   : > { %v362_v7 = vunpack.c.0.s8 (!%p170_p3), %v361_v3 }
   0xa   : > { %v245_v57 = vsub.s32 (!%p170_p3), 0, %v3661_v6  ;;  %v253_v58 = vsub.s32 (!%p170_p3), 2, %v3661_v6  ;;  %v249_v60 = vsub.s32 (!%p170_p3), 1, %v3661_v6  ;;  %v257_v61 = vsub.s32 (!%p170_p3), 3, %v3661_v6 }
   0xb   : > { %v3668_v10 = vsub.s32 (!%p170_p3), %v362_v7, %v3661_v6 }
   0xc   : > { %v3917_v62 = vrot.slane (!%p170_p3), %v238_v59, %v245_v57  ;;  %v3921_v63 = vrot.slane (!%p170_p3), %v238_v59, %v253_v58  ;;  %v3929_v1 = vrot.slane (!%p170_p3), %v238_v59, %v257_v61 }
   0xd   : > { %v366_v13 = vrot.slane (!%p170_p3), %v234_v0, %v3668_v10  ;;  %v373_v14 = vrot.slane (!%p170_p3), %v359_v8, %v3668_v10  ;;  %v383_v15 = vrot.slane (!%p170_p3), %v235_v5, %v3668_v10  ;;  %v390_v16 = vrot.slane (!%p170_p3), %v376_v9, %v3668_v10 }
   0xe   : > { %s4813_s12 = smov (!%p203_p4, %s3600_s12), 1  ;;  %v3684_v27 = vrot.slane %v236_v25, %v3668_v10  ;;  %v3687_v28 = vrot.slane %v393_v26, %v3668_v10  ;;  %v3839_v52 = vrot.slane %v237_v51, %v3668_v10  ;;  %v3844_v55 = vrot.slane %v410_v53, %v3668_v10 }
   0xf   : > { %s3551_s20 = sshll.u32 %s4813_s12, 3  ;;  %v374_v17 = vcombine.high %v366_v13, %v366_v13  ;;  %v375_v18 = vcombine.high %v373_v14, %v373_v14  ;;  %v478_v19 = vsel %vm476_vm0, %v366_v13, 0  ;;  %v484_v20 = vsel %vm476_vm0, %v373_v14, 0  ;;  %s3407_s9 = sshll.u32 %s4813_s12, 4 }
  0x10   : > { %s210_s23 = scalar_lea.vmem %s4798_s0, %s3551_s20  ;;  %v391_v21 = vcombine.high %v383_v15, %v383_v15  ;;  %v392_v22 = vcombine.high %v390_v16, %v390_v16  ;;  %v490_v29 = vsel %vm476_vm0, %v383_v15, 0  ;;  %v496_v30 = vsel %vm476_vm0, %v390_v16, 0  ;;  %s4503_s17 = scalar_lea.vmem %s4801_s3, %s3407_s9 }
  0x11   : > { %v228_v11 = vld [vmem:[%s210_s23] sm:$0xff]  ;;  %3409 = vmatprep.subr.msk.bf16.mxu0 %vm476_vm0, %v374_v17  ;;  %3426 = vmatprep.subr.msk.bf16.mxu1 %vm476_vm0, %v375_v18  ;;  %v408_v32 = vcombine.high %v3684_v27, %v3684_v27  ;;  %v409_v33 = vcombine.high %v3687_v28, %v3687_v28  ;;  %v502_v49 = vsel %vm476_vm0, %v3684_v27, 0  ;;  %v508_v50 = vsel %vm476_vm0, %v3687_v28, 0 }
  0x12   : > { %v232_v12 = vpack.c.bf16 %v228_v11, %v228_v11  ;;  %526 = vmatpush1.bf16.msra.mxu0 %v478_v19  ;;  %719 = vmatpush1.bf16.msra.mxu1 %v484_v20  ;;  %v230_v23 = vcombine.high %v228_v11, %v228_v11  ;;  %v425_v54 = vcombine.high %v3839_v52, %v3839_v52 }
  0x13   : > { %3443 = vmatprep.subr.msk.bf16.mxu0 %vm476_vm0, %v391_v21  ;;  %3460 = vmatprep.subr.msk.bf16.mxu1 %vm476_vm0, %v392_v22  ;;  %v426_v56 = vcombine.high %v3844_v55, %v3844_v55  ;;  %v3925_v0 = vrot.slane %v238_v59, %v249_v60 }
  0x14   : > { %323 = vxpose.xlu0.c.b16.start.end [1/1] (short) %v232_v12, 128  ;;  %v233_v24 = vpack.c.bf16 %v230_v23, %v230_v23 }
  0x31   : > { %339 = vxpose.xlu0.c.b16.start.end [1/1] (short) %v233_v24, 128 }
  0x7a   : > { %v3691_v31 = vpop.trf.xlu0 }
  0x7b   : > { %3410 = vmatmul.mubr.msk.bf16.vlgmr.msra.gmra.mrb[0].mxu0 %vm427_vm1, %v3691_v31  ;;  %3427 = vmatmul.mubr.msk.bf16.vlgmr.msra.gmra.mrb[0].mxu1 %vm427_vm1, %v3691_v31 }
  0x7c   : > { %912 = vmatpush1.bf16.msra.mxu0 %v490_v29  ;;  %1105 = vmatpush1.bf16.msra.mxu1 %v496_v30 }
  0x7d   : > { %567 = vmatprep.mubr.bf16.mxu0 %v3611_v4  ;;  %760 = vmatprep.mubr.bf16.mxu1 %v3611_v4 }
  0x7e   : > { %3477 = vmatprep.subr.msk.bf16.mxu0 %vm476_vm0, %v408_v32  ;;  %3494 = vmatprep.subr.msk.bf16.mxu1 %vm476_vm0, %v409_v33  ;;  %v3705_v34 = vpop.trf.xlu0 }
  0x82   : > { %v3713_v35 = vpop.trf.xlu0 }
  0x83   : > { %3411 = vmatmul.mubr.msk.bf16.gmra.mrb[4].mxu0 %vm427_vm1, %v3705_v34  ;;  %3428 = vmatmul.mubr.msk.bf16.gmra.mrb[4].mxu1 %vm427_vm1, %v3705_v34 }
  0x84   : > { %577 = vmatprep.mubr.bf16.mxu0 %v3611_v4  ;;  %770 = vmatprep.mubr.bf16.mxu1 %v3611_v4 }
  0x86   : > { %v3721_v36 = vpop.trf.xlu0 }
  0x8a   : > { %v3729_v37 = vpop.trf.xlu0 }
  0x8b   : > { %3412 = vmatmul.mubr.msk.bf16.gmra.mrb[8].mxu0 %vm427_vm1, %v3713_v35  ;;  %3429 = vmatmul.mubr.msk.bf16.gmra.mrb[8].mxu1 %vm427_vm1, %v3713_v35 }
  0x8c   : > { %587 = vmatprep.mubr.bf16.mxu0 %v3611_v4  ;;  %780 = vmatprep.mubr.bf16.mxu1 %v3611_v4 }
  0x8e   : > { %v3737_v38 = vpop.trf.xlu0 }
  0x92   : > { %v3745_v39 = vpop.trf.xlu0 }
  0x93   : > { %3413 = vmatmul.mubr.msk.bf16.gmra.mrb[12].mxu0 %vm427_vm1, %v3721_v36  ;;  %3430 = vmatmul.mubr.msk.bf16.gmra.mrb[12].mxu1 %vm427_vm1, %v3721_v36 }
  0x94   : > { %597 = vmatprep.mubr.bf16.mxu0 %v3611_v4  ;;  %790 = vmatprep.mubr.bf16.mxu1 %v3611_v4 }
  0x96   : > { %v3753_v40 = vpop.trf.xlu0 }
  0x9a   : > { %v3761_v41 = vpop.trf.xlu0 }
  0x9b   : > { %3414 = vmatmul.mubr.msk.bf16.gmra.mrb[16].mxu0 %vm427_vm1, %v3729_v37  ;;  %3431 = vmatmul.mubr.msk.bf16.gmra.mrb[16].mxu1 %vm427_vm1, %v3729_v37 }
  0x9c   : > { %607 = vmatprep.mubr.bf16.mxu0 %v3611_v4  ;;  %800 = vmatprep.mubr.bf16.mxu1 %v3611_v4 }
  0x9e   : > { %v3769_v42 = vpop.trf.xlu0 }
  0xa2   : > { %v3777_v43 = vpop.trf.xlu0 }
  0xa3   : > { %3415 = vmatmul.mubr.msk.bf16.gmra.mrb[20].mxu0 %vm427_vm1, %v3737_v38  ;;  %3432 = vmatmul.mubr.msk.bf16.gmra.mrb[20].mxu1 %vm427_vm1, %v3737_v38 }
  0xa4   : > { %617 = vmatprep.mubr.bf16.mxu0 %v3611_v4  ;;  %810 = vmatprep.mubr.bf16.mxu1 %v3611_v4 }
  0xa6   : > { %v3785_v44 = vpop.trf.xlu0 }
  0xaa   : > { %v3793_v45 = vpop.trf.xlu0 }
  0xab   : > { %3416 = vmatmul.mubr.msk.bf16.gmra.mrb[24].mxu0 %vm427_vm1, %v3745_v39  ;;  %3433 = vmatmul.mubr.msk.bf16.gmra.mrb[24].mxu1 %vm427_vm1, %v3745_v39 }
  0xac   : > { %627 = vmatprep.mubr.bf16.mxu0 %v3611_v4  ;;  %820 = vmatprep.mubr.bf16.mxu1 %v3611_v4 }
  0xae   : > { %v3801_v46 = vpop.trf.xlu0 }
  0xb2   : > { %v3809_v47 = vpop.trf.xlu0 }
  0xb3   : > { %3417 = vmatmul.mubr.msk.bf16.gmra.mrb[28].mxu0 %vm427_vm1, %v3753_v40  ;;  %3434 = vmatmul.mubr.msk.bf16.gmra.mrb[28].mxu1 %vm427_vm1, %v3753_v40 }
  0xb4   : > { %637 = vmatprep.mubr.bf16.mxu0 %v3611_v4  ;;  %830 = vmatprep.mubr.bf16.mxu1 %v3611_v4 }
  0xb6   : > { %v3817_v48 = vpop.trf.xlu0 }
  0xbb   : > { %3418 = vmatmul.mubr.msk.bf16.gmra.mrb[32].mxu0 %vm427_vm1, %v3761_v41  ;;  %3435 = vmatmul.mubr.msk.bf16.gmra.mrb[32].mxu1 %vm427_vm1, %v3761_v41 }
  0xbc   : > { %647 = vmatprep.mubr.bf16.mxu0 %v3611_v4  ;;  %840 = vmatprep.mubr.bf16.mxu1 %v3611_v4 }
  0xc3   : > { %3419 = vmatmul.mubr.msk.bf16.gmra.mrb[36].mxu0 %vm427_vm1, %v3769_v42  ;;  %3436 = vmatmul.mubr.msk.bf16.gmra.mrb[36].mxu1 %vm427_vm1, %v3769_v42 }
  0xc4   : > { %657 = vmatprep.mubr.bf16.mxu0 %v3611_v4  ;;  %850 = vmatprep.mubr.bf16.mxu1 %v3611_v4 }
  0xcb   : > { %3420 = vmatmul.mubr.msk.bf16.gmra.mrb[40].mxu0 %vm427_vm1, %v3777_v43  ;;  %3437 = vmatmul.mubr.msk.bf16.gmra.mrb[40].mxu1 %vm427_vm1, %v3777_v43 }
  0xcc   : > { %667 = vmatprep.mubr.bf16.mxu0 %v3611_v4  ;;  %860 = vmatprep.mubr.bf16.mxu1 %v3611_v4 }
  0xd3   : > { %3421 = vmatmul.mubr.msk.bf16.gmra.mrb[44].mxu0 %vm427_vm1, %v3785_v44  ;;  %3438 = vmatmul.mubr.msk.bf16.gmra.mrb[44].mxu1 %vm427_vm1, %v3785_v44 }
  0xd4   : > { %677 = vmatprep.mubr.bf16.mxu0 %v3611_v4  ;;  %870 = vmatprep.mubr.bf16.mxu1 %v3611_v4 }
  0xdb   : > { %3422 = vmatmul.mubr.msk.bf16.gmra.mrb[48].mxu0 %vm427_vm1, %v3793_v45  ;;  %3439 = vmatmul.mubr.msk.bf16.gmra.mrb[48].mxu1 %vm427_vm1, %v3793_v45 }
  0xdc   : > { %687 = vmatprep.mubr.bf16.mxu0 %v3611_v4  ;;  %880 = vmatprep.mubr.bf16.mxu1 %v3611_v4 }
  0xe3   : > { %3423 = vmatmul.mubr.msk.bf16.gmra.mrb[52].mxu0 %vm427_vm1, %v3801_v46  ;;  %3440 = vmatmul.mubr.msk.bf16.gmra.mrb[52].mxu1 %vm427_vm1, %v3801_v46 }
  0xe4   : > { %697 = vmatprep.mubr.bf16.mxu0 %v3611_v4  ;;  %890 = vmatprep.mubr.bf16.mxu1 %v3611_v4 }
  0xeb   : > { %3424 = vmatmul.mubr.msk.bf16.gmra.mrb[56].mxu0 %vm427_vm1, %v3809_v47  ;;  %3441 = vmatmul.mubr.msk.bf16.gmra.mrb[56].mxu1 %vm427_vm1, %v3809_v47 }
  0xec   : > { %707 = vmatprep.mubr.bf16.mxu0 %v3611_v4  ;;  %900 = vmatprep.mubr.bf16.mxu1 %v3611_v4 }
  0xf3   : > { %3425 = vmatmul.mubr.msk.bf16.gmra.mrb[60].mxu0 %vm427_vm1, %v3817_v48  ;;  %3442 = vmatmul.mubr.msk.bf16.gmra.mrb[60].mxu1 %vm427_vm1, %v3817_v48 }
  0xf4   : > { %943 = vmatprep.mubr.bf16.mxu0 %v3611_v4  ;;  %1136 = vmatprep.mubr.bf16.mxu1 %v3611_v4 }
  0xfb   : > { %3444 = vmatmul.mubr.msk.bf16.vlgmr.msra.gmra.mrb[64].mxu0 %vm427_vm1, %v3691_v31  ;;  %3461 = vmatmul.mubr.msk.bf16.vlgmr.msra.gmra.mrb[64].mxu1 %vm427_vm1, %v3691_v31 }
  0xfc   : > { %1298 = vmatpush1.bf16.msra.mxu0 %v502_v49  ;;  %1491 = vmatpush1.bf16.msra.mxu1 %v508_v50 }
  0xfd   : > { %953 = vmatprep.mubr.bf16.mxu0 %v3611_v4  ;;  %1146 = vmatprep.mubr.bf16.mxu1 %v3611_v4 }
  0xfe   : > { %3511 = vmatprep.subr.msk.bf16.mxu0 %vm476_vm0, %v425_v54  ;;  %3528 = vmatprep.subr.msk.bf16.mxu1 %vm476_vm0, %v426_v56 }
 0x103   : > { %3445 = vmatmul.mubr.msk.bf16.gmra.mrb[68].mxu0 %vm427_vm1, %v3705_v34  ;;  %3462 = vmatmul.mubr.msk.bf16.gmra.mrb[68].mxu1 %vm427_vm1, %v3705_v34 }
 0x104   : > { %963 = vmatprep.mubr.bf16.mxu0 %v3611_v4  ;;  %1156 = vmatprep.mubr.bf16.mxu1 %v3611_v4 }
 0x10b   : > { %3446 = vmatmul.mubr.msk.bf16.gmra.mrb[72].mxu0 %vm427_vm1, %v3713_v35  ;;  %3463 = vmatmul.mubr.msk.bf16.gmra.mrb[72].mxu1 %vm427_vm1, %v3713_v35 }
 0x10c   : > { %973 = vmatprep.mubr.bf16.mxu0 %v3611_v4  ;;  %1166 = vmatprep.mubr.bf16.mxu1 %v3611_v4 }
 0x113   : > { %3447 = vmatmul.mubr.msk.bf16.gmra.mrb[76].mxu0 %vm427_vm1, %v3721_v36  ;;  %3464 = vmatmul.mubr.msk.bf16.gmra.mrb[76].mxu1 %vm427_vm1, %v3721_v36 }
 0x114   : > { %983 = vmatprep.mubr.bf16.mxu0 %v3611_v4  ;;  %1176 = vmatprep.mubr.bf16.mxu1 %v3611_v4 }
 0x11b   : > { %3448 = vmatmul.mubr.msk.bf16.gmra.mrb[80].mxu0 %vm427_vm1, %v3729_v37  ;;  %3465 = vmatmul.mubr.msk.bf16.gmra.mrb[80].mxu1 %vm427_vm1, %v3729_v37 }
 0x11c   : > { %993 = vmatprep.mubr.bf16.mxu0 %v3611_v4  ;;  %1186 = vmatprep.mubr.bf16.mxu1 %v3611_v4 }
 0x123   : > { %3449 = vmatmul.mubr.msk.bf16.gmra.mrb[84].mxu0 %vm427_vm1, %v3737_v38  ;;  %3466 = vmatmul.mubr.msk.bf16.gmra.mrb[84].mxu1 %vm427_vm1, %v3737_v38 }
 0x124   : > { %1003 = vmatprep.mubr.bf16.mxu0 %v3611_v4  ;;  %1196 = vmatprep.mubr.bf16.mxu1 %v3611_v4 }
 0x12b   : > { %3450 = vmatmul.mubr.msk.bf16.gmra.mrb[88].mxu0 %vm427_vm1, %v3745_v39  ;;  %3467 = vmatmul.mubr.msk.bf16.gmra.mrb[88].mxu1 %vm427_vm1, %v3745_v39 }
 0x12c   : > { %1013 = vmatprep.mubr.bf16.mxu0 %v3611_v4  ;;  %1206 = vmatprep.mubr.bf16.mxu1 %v3611_v4 }
 0x133   : > { %3451 = vmatmul.mubr.msk.bf16.gmra.mrb[92].mxu0 %vm427_vm1, %v3753_v40  ;;  %3468 = vmatmul.mubr.msk.bf16.gmra.mrb[92].mxu1 %vm427_vm1, %v3753_v40 }
 0x134   : > { %1023 = vmatprep.mubr.bf16.mxu0 %v3611_v4  ;;  %1216 = vmatprep.mubr.bf16.mxu1 %v3611_v4 }
 0x13b   : > { %3452 = vmatmul.mubr.msk.bf16.gmra.mrb[96].mxu0 %vm427_vm1, %v3761_v41  ;;  %3469 = vmatmul.mubr.msk.bf16.gmra.mrb[96].mxu1 %vm427_vm1, %v3761_v41 }
 0x13c   : > { %1033 = vmatprep.mubr.bf16.mxu0 %v3611_v4  ;;  %1226 = vmatprep.mubr.bf16.mxu1 %v3611_v4 }
 0x143   : > { %3453 = vmatmul.mubr.msk.bf16.gmra.mrb[100].mxu0 %vm427_vm1, %v3769_v42  ;;  %3470 = vmatmul.mubr.msk.bf16.gmra.mrb[100].mxu1 %vm427_vm1, %v3769_v42 }
 0x144   : > { %1043 = vmatprep.mubr.bf16.mxu0 %v3611_v4  ;;  %1236 = vmatprep.mubr.bf16.mxu1 %v3611_v4 }
 0x14b   : > { %3454 = vmatmul.mubr.msk.bf16.gmra.mrb[104].mxu0 %vm427_vm1, %v3777_v43  ;;  %3471 = vmatmul.mubr.msk.bf16.gmra.mrb[104].mxu1 %vm427_vm1, %v3777_v43 }
 0x14c   : > { %1053 = vmatprep.mubr.bf16.mxu0 %v3611_v4  ;;  %1246 = vmatprep.mubr.bf16.mxu1 %v3611_v4 }
 0x14e   : > { %v559_v2 = vpop.f32.mrb[0].mxu0  ;;  %v752_v3 = vpop.f32.mrb[0].mxu1 }
 0x14f   : > { %v560_v5 = vadd.f32 %v559_v2, %v3917_v62  ;;  %v753_v7 = vadd.f32 %v752_v3, %v3921_v63  ;;  %v561_v8 = vpop.f32.mrb[1].mxu0  ;;  %v754_v9 = vpop.f32.mrb[1].mxu1 }
 0x150   : > { %v562_v10 = vadd.f32 %v561_v8, %v3925_v0  ;;  %v755_v11 = vadd.f32 %v754_v9, %v3929_v1  ;;  %v563_v12 = vpop.f32.mrb[2].mxu0  ;;  %v756_v13 = vpop.f32.mrb[2].mxu1 }
 0x151   : > { %v564_v14 = vadd.f32 %v563_v12, %v3917_v62  ;;  %v757_v15 = vadd.f32 %v756_v13, %v3921_v63  ;;  %v565_v16 = vpop.f32.mrb[3].mxu0  ;;  %v758_v17 = vpop.f32.mrb[3].mxu1  ;;  %v2069_v20 = vmax.f32 %v560_v5, 0.0  ;;  %v2071_v21 = vmax.f32 %v753_v7, 0.0 }
 0x152   : > { %v566_v18 = vadd.f32 %v565_v16, %v3925_v0  ;;  %v759_v19 = vadd.f32 %v758_v17, %v3929_v1  ;;  %v2070_v24 = vmax.f32 %v562_v10, 0.0  ;;  %v2072_v25 = vmax.f32 %v755_v11, 0.0 }
 0x153   : > { %v2085_v22 = vmax.f32 %v564_v14, 0.0  ;;  %v2087_v23 = vmax.f32 %v757_v15, 0.0  ;;  %3455 = vmatmul.mubr.msk.bf16.gmra.mrb[108].mxu0 %vm427_vm1, %v3785_v44  ;;  %3472 = vmatmul.mubr.msk.bf16.gmra.mrb[108].mxu1 %vm427_vm1, %v3785_v44 }
 0x154   : > { %v2086_v26 = vmax.f32 %v566_v18, 0.0  ;;  %v2088_v27 = vmax.f32 %v759_v19, 0.0  ;;  %1063 = vmatprep.mubr.bf16.mxu0 %v3611_v4  ;;  %1256 = vmatprep.mubr.bf16.mxu1 %v3611_v4 }
 0x155   : > { %v2583_v28 = vadd.f32 %v2085_v22, %v2069_v20  ;;  %v2657_v29 = vadd.f32 %v2087_v23, %v2071_v21 }
 0x156   : > { %v2620_v30 = vadd.f32 %v2086_v26, %v2070_v24  ;;  %v2694_v32 = vadd.f32 %v2088_v27, %v2072_v25  ;;  %v569_v33 = vpop.f32.mrb[4].mxu0  ;;  %v762_v49 = vpop.f32.mrb[4].mxu1 }
 0x157   : > { %v570_v50 = vadd.f32 %v569_v33, %v3917_v62  ;;  %v763_v51 = vadd.f32 %v762_v49, %v3921_v63  ;;  %v571_v53 = vpop.f32.mrb[5].mxu0  ;;  %v764_v54 = vpop.f32.mrb[5].mxu1 }
 0x158   : > { %v572_v56 = vadd.f32 %v571_v53, %v3925_v0  ;;  %v765_v59 = vadd.f32 %v764_v54, %v3929_v1  ;;  %v573_v2 = vpop.f32.mrb[6].mxu0  ;;  %v766_v3 = vpop.f32.mrb[6].mxu1 }
 0x159   : > { %v2101_v5 = vmax.f32 %v570_v50, 0.0  ;;  %v2103_v7 = vmax.f32 %v763_v51, 0.0  ;;  %v574_v8 = vadd.f32 %v573_v2, %v3917_v62  ;;  %v767_v9 = vadd.f32 %v766_v3, %v3921_v63  ;;  %v575_v10 = vpop.f32.mrb[7].mxu0  ;;  %v768_v11 = vpop.f32.mrb[7].mxu1 }
 0x15a   : > { %v2102_v12 = vmax.f32 %v572_v56, 0.0  ;;  %v2104_v13 = vmax.f32 %v765_v59, 0.0  ;;  %v576_v14 = vadd.f32 %v575_v10, %v3925_v0  ;;  %v769_v15 = vadd.f32 %v768_v11, %v3929_v1 }
 0x15b   : > { %v2584_v16 = vadd.f32 %v2583_v28, %v2101_v5  ;;  %v2658_v17 = vadd.f32 %v2657_v29, %v2103_v7  ;;  %v2117_v18 = vmax.f32 %v574_v8, 0.0  ;;  %v2119_v19 = vmax.f32 %v767_v9, 0.0  ;;  %3456 = vmatmul.mubr.msk.bf16.gmra.mrb[112].mxu0 %vm427_vm1, %v3793_v45  ;;  %3473 = vmatmul.mubr.msk.bf16.gmra.mrb[112].mxu1 %vm427_vm1, %v3793_v45 }
 0x15c   : > { %v2621_v20 = vadd.f32 %v2620_v30, %v2102_v12  ;;  %v2695_v21 = vadd.f32 %v2694_v32, %v2104_v13  ;;  %v2118_v22 = vmax.f32 %v576_v14, 0.0  ;;  %v2120_v23 = vmax.f32 %v769_v15, 0.0  ;;  %1073 = vmatprep.mubr.bf16.mxu0 %v3611_v4  ;;  %1266 = vmatprep.mubr.bf16.mxu1 %v3611_v4 }
 0x15d   : > { %v2585_v24 = vadd.f32 %v2584_v16, %v2117_v18  ;;  %v2659_v25 = vadd.f32 %v2658_v17, %v2119_v19 }
 0x15e   : > { %v2622_v26 = vadd.f32 %v2621_v20, %v2118_v22  ;;  %v2696_v27 = vadd.f32 %v2695_v21, %v2120_v23  ;;  %v579_v28 = vpop.f32.mrb[8].mxu0  ;;  %v772_v29 = vpop.f32.mrb[8].mxu1 }
 0x15f   : > { %v580_v33 = vadd.f32 %v579_v28, %v3917_v62  ;;  %v773_v49 = vadd.f32 %v772_v29, %v3921_v63  ;;  %v581_v50 = vpop.f32.mrb[9].mxu0  ;;  %v774_v51 = vpop.f32.mrb[9].mxu1 }
 0x160   : > { %v582_v30 = vadd.f32 %v581_v50, %v3925_v0  ;;  %v775_v32 = vadd.f32 %v774_v51, %v3929_v1  ;;  %v583_v53 = vpop.f32.mrb[10].mxu0  ;;  %v776_v54 = vpop.f32.mrb[10].mxu1 }
 0x161   : > { %v2133_v56 = vmax.f32 %v580_v33, 0.0  ;;  %v2135_v59 = vmax.f32 %v773_v49, 0.0  ;;  %v584_v2 = vadd.f32 %v583_v53, %v3917_v62  ;;  %v777_v3 = vadd.f32 %v776_v54, %v3921_v63  ;;  %v585_v5 = vpop.f32.mrb[11].mxu0  ;;  %v778_v7 = vpop.f32.mrb[11].mxu1 }
 0x162   : > { %v2134_v8 = vmax.f32 %v582_v30, 0.0  ;;  %v2136_v9 = vmax.f32 %v775_v32, 0.0  ;;  %v586_v10 = vadd.f32 %v585_v5, %v3925_v0  ;;  %v779_v11 = vadd.f32 %v778_v7, %v3929_v1 }
 0x163   : > { %v2586_v12 = vadd.f32 %v2585_v24, %v2133_v56  ;;  %v2660_v13 = vadd.f32 %v2659_v25, %v2135_v59  ;;  %v2149_v14 = vmax.f32 %v584_v2, 0.0  ;;  %v2151_v15 = vmax.f32 %v777_v3, 0.0  ;;  %3457 = vmatmul.mubr.msk.bf16.gmra.mrb[116].mxu0 %vm427_vm1, %v3801_v46  ;;  %3474 = vmatmul.mubr.msk.bf16.gmra.mrb[116].mxu1 %vm427_vm1, %v3801_v46 }
 0x164   : > { %v2623_v16 = vadd.f32 %v2622_v26, %v2134_v8  ;;  %v2697_v17 = vadd.f32 %v2696_v27, %v2136_v9  ;;  %v2150_v18 = vmax.f32 %v586_v10, 0.0  ;;  %v2152_v19 = vmax.f32 %v779_v11, 0.0  ;;  %1083 = vmatprep.mubr.bf16.mxu0 %v3611_v4  ;;  %1276 = vmatprep.mubr.bf16.mxu1 %v3611_v4 }
 0x165   : > { %v2587_v20 = vadd.f32 %v2586_v12, %v2149_v14  ;;  %v2661_v21 = vadd.f32 %v2660_v13, %v2151_v15 }
 0x166   : > { %v2624_v22 = vadd.f32 %v2623_v16, %v2150_v18  ;;  %v2698_v23 = vadd.f32 %v2697_v17, %v2152_v19  ;;  %v589_v24 = vpop.f32.mrb[12].mxu0  ;;  %v782_v25 = vpop.f32.mrb[12].mxu1 }
 0x167   : > { %v590_v28 = vadd.f32 %v589_v24, %v3917_v62  ;;  %v783_v29 = vadd.f32 %v782_v25, %v3921_v63  ;;  %v591_v33 = vpop.f32.mrb[13].mxu0  ;;  %v784_v49 = vpop.f32.mrb[13].mxu1 }
 0x168   : > { %v592_v26 = vadd.f32 %v591_v33, %v3925_v0  ;;  %v785_v27 = vadd.f32 %v784_v49, %v3929_v1  ;;  %v593_v50 = vpop.f32.mrb[14].mxu0  ;;  %v786_v51 = vpop.f32.mrb[14].mxu1 }
 0x169   : > { %v2165_v30 = vmax.f32 %v590_v28, 0.0  ;;  %v2167_v32 = vmax.f32 %v783_v29, 0.0  ;;  %v594_v53 = vadd.f32 %v593_v50, %v3917_v62  ;;  %v787_v54 = vadd.f32 %v786_v51, %v3921_v63  ;;  %v595_v56 = vpop.f32.mrb[15].mxu0  ;;  %v788_v59 = vpop.f32.mrb[15].mxu1 }
 0x16a   : > { %v2166_v2 = vmax.f32 %v592_v26, 0.0  ;;  %v2168_v3 = vmax.f32 %v785_v27, 0.0  ;;  %v596_v5 = vadd.f32 %v595_v56, %v3925_v0  ;;  %v789_v7 = vadd.f32 %v788_v59, %v3929_v1 }
 0x16b   : > { %v2588_v8 = vadd.f32 %v2587_v20, %v2165_v30  ;;  %v2662_v9 = vadd.f32 %v2661_v21, %v2167_v32  ;;  %v2181_v10 = vmax.f32 %v594_v53, 0.0  ;;  %v2183_v11 = vmax.f32 %v787_v54, 0.0  ;;  %3458 = vmatmul.mubr.msk.bf16.gmra.mrb[120].mxu0 %vm427_vm1, %v3809_v47  ;;  %3475 = vmatmul.mubr.msk.bf16.gmra.mrb[120].mxu1 %vm427_vm1, %v3809_v47 }
 0x16c   : > { %v2625_v12 = vadd.f32 %v2624_v22, %v2166_v2  ;;  %v2699_v13 = vadd.f32 %v2698_v23, %v2168_v3  ;;  %v2182_v14 = vmax.f32 %v596_v5, 0.0  ;;  %v2184_v15 = vmax.f32 %v789_v7, 0.0  ;;  %1093 = vmatprep.mubr.bf16.mxu0 %v3611_v4  ;;  %1286 = vmatprep.mubr.bf16.mxu1 %v3611_v4 }
 0x16d   : > { %v2589_v16 = vadd.f32 %v2588_v8, %v2181_v10  ;;  %v2663_v17 = vadd.f32 %v2662_v9, %v2183_v11 }
 0x16e   : > { %v2626_v18 = vadd.f32 %v2625_v12, %v2182_v14  ;;  %v2700_v19 = vadd.f32 %v2699_v13, %v2184_v15  ;;  %v599_v20 = vpop.f32.mrb[16].mxu0  ;;  %v792_v21 = vpop.f32.mrb[16].mxu1 }
 0x16f   : > { %v600_v24 = vadd.f32 %v599_v20, %v3917_v62  ;;  %v793_v25 = vadd.f32 %v792_v21, %v3921_v63  ;;  %v601_v28 = vpop.f32.mrb[17].mxu0  ;;  %v794_v29 = vpop.f32.mrb[17].mxu1 }
 0x170   : > { %v602_v22 = vadd.f32 %v601_v28, %v3925_v0  ;;  %v795_v23 = vadd.f32 %v794_v29, %v3929_v1  ;;  %v603_v33 = vpop.f32.mrb[18].mxu0  ;;  %v796_v49 = vpop.f32.mrb[18].mxu1 }
 0x171   : > { %v2197_v26 = vmax.f32 %v600_v24, 0.0  ;;  %v2199_v27 = vmax.f32 %v793_v25, 0.0  ;;  %v604_v50 = vadd.f32 %v603_v33, %v3917_v62  ;;  %v797_v51 = vadd.f32 %v796_v49, %v3921_v63  ;;  %v605_v30 = vpop.f32.mrb[19].mxu0  ;;  %v798_v32 = vpop.f32.mrb[19].mxu1 }
 0x172   : > { %v2198_v53 = vmax.f32 %v602_v22, 0.0  ;;  %v2200_v54 = vmax.f32 %v795_v23, 0.0  ;;  %v606_v56 = vadd.f32 %v605_v30, %v3925_v0  ;;  %v799_v59 = vadd.f32 %v798_v32, %v3929_v1 }
 0x173   : > { %v2590_v2 = vadd.f32 %v2589_v16, %v2197_v26  ;;  %v2664_v3 = vadd.f32 %v2663_v17, %v2199_v27  ;;  %v2213_v5 = vmax.f32 %v604_v50, 0.0  ;;  %v2215_v7 = vmax.f32 %v797_v51, 0.0  ;;  %3459 = vmatmul.mubr.msk.bf16.gmra.mrb[124].mxu0 %vm427_vm1, %v3817_v48  ;;  %3476 = vmatmul.mubr.msk.bf16.gmra.mrb[124].mxu1 %vm427_vm1, %v3817_v48 }
 0x174   : > { %v2627_v8 = vadd.f32 %v2626_v18, %v2198_v53  ;;  %v2701_v9 = vadd.f32 %v2700_v19, %v2200_v54  ;;  %v2214_v10 = vmax.f32 %v606_v56, 0.0  ;;  %v2216_v11 = vmax.f32 %v799_v59, 0.0  ;;  %1329 = vmatprep.mubr.bf16.mxu0 %v3611_v4  ;;  %1522 = vmatprep.mubr.bf16.mxu1 %v3611_v4 }
 0x175   : > { %v2591_v12 = vadd.f32 %v2590_v2, %v2213_v5  ;;  %v2665_v13 = vadd.f32 %v2664_v3, %v2215_v7  ;;  %v514_v22 = vsel %vm476_vm0, %v3839_v52, 0  ;;  %v520_v23 = vsel %vm476_vm0, %v3844_v55, 0 }
 0x176   : > { %v2628_v14 = vadd.f32 %v2627_v8, %v2214_v10  ;;  %v2702_v15 = vadd.f32 %v2701_v9, %v2216_v11  ;;  %v609_v16 = vpop.f32.mrb[20].mxu0  ;;  %v802_v17 = vpop.f32.mrb[20].mxu1 }
 0x177   : > { %v610_v20 = vadd.f32 %v609_v16, %v3917_v62  ;;  %v803_v21 = vadd.f32 %v802_v17, %v3921_v63  ;;  %v611_v24 = vpop.f32.mrb[21].mxu0  ;;  %v804_v25 = vpop.f32.mrb[21].mxu1 }
 0x178   : > { %v612_v18 = vadd.f32 %v611_v24, %v3925_v0  ;;  %v805_v19 = vadd.f32 %v804_v25, %v3929_v1  ;;  %v613_v28 = vpop.f32.mrb[22].mxu0  ;;  %v806_v29 = vpop.f32.mrb[22].mxu1 }
 0x179   : > { %v2229_v33 = vmax.f32 %v610_v20, 0.0  ;;  %v2231_v49 = vmax.f32 %v803_v21, 0.0  ;;  %v614_v26 = vadd.f32 %v613_v28, %v3917_v62  ;;  %v807_v27 = vadd.f32 %v806_v29, %v3921_v63  ;;  %v615_v50 = vpop.f32.mrb[23].mxu0  ;;  %v808_v51 = vpop.f32.mrb[23].mxu1 }
 0x17a   : > { %v2230_v30 = vmax.f32 %v612_v18, 0.0  ;;  %v2232_v32 = vmax.f32 %v805_v19, 0.0  ;;  %v616_v53 = vadd.f32 %v615_v50, %v3925_v0  ;;  %v809_v54 = vadd.f32 %v808_v51, %v3929_v1 }
 0x17b   : > { %v2592_v56 = vadd.f32 %v2591_v12, %v2229_v33  ;;  %v2666_v59 = vadd.f32 %v2665_v13, %v2231_v49  ;;  %v2245_v52 = vmax.f32 %v614_v26, 0.0  ;;  %v2247_v2 = vmax.f32 %v807_v27, 0.0  ;;  %3478 = vmatmul.mubr.msk.bf16.vlgmr.msra.gmra.mrb[128].mxu0 %vm427_vm1, %v3691_v31  ;;  %3495 = vmatmul.mubr.msk.bf16.vlgmr.msra.gmra.mrb[128].mxu1 %vm427_vm1, %v3691_v31 }
 0x17c   : > { %v2629_v55 = vadd.f32 %v2628_v14, %v2230_v30  ;;  %v2703_v3 = vadd.f32 %v2702_v15, %v2232_v32  ;;  %v2246_v5 = vmax.f32 %v616_v53, 0.0  ;;  %v2248_v7 = vmax.f32 %v809_v54, 0.0  ;;  %1684 = vmatpush1.bf16.msra.mxu0 %v514_v22  ;;  %1877 = vmatpush1.bf16.msra.mxu1 %v520_v23 }
 0x17d   : > { %v2593_v8 = vadd.f32 %v2592_v56, %v2245_v52  ;;  %v2667_v9 = vadd.f32 %v2666_v59, %v2247_v2  ;;  %1339 = vmatprep.mubr.bf16.mxu0 %v3611_v4  ;;  %1532 = vmatprep.mubr.bf16.mxu1 %v3611_v4 }
 0x17e   : > { %v2630_v10 = vadd.f32 %v2629_v55, %v2246_v5  ;;  %v2704_v11 = vadd.f32 %v2703_v3, %v2248_v7  ;;  %v619_v12 = vpop.f32.mrb[24].mxu0  ;;  %v812_v13 = vpop.f32.mrb[24].mxu1 }
 0x17f   : > { %v620_v16 = vadd.f32 %v619_v12, %v3917_v62  ;;  %v813_v17 = vadd.f32 %v812_v13, %v3921_v63  ;;  %v621_v14 = vpop.f32.mrb[25].mxu0  ;;  %v814_v15 = vpop.f32.mrb[25].mxu1 }
 0x180   : > { %v622_v20 = vadd.f32 %v621_v14, %v3925_v0  ;;  %v815_v21 = vadd.f32 %v814_v15, %v3929_v1  ;;  %v623_v24 = vpop.f32.mrb[26].mxu0  ;;  %v816_v25 = vpop.f32.mrb[26].mxu1 }
 0x181   : > { %v2261_v18 = vmax.f32 %v620_v16, 0.0  ;;  %v2263_v19 = vmax.f32 %v813_v17, 0.0  ;;  %v624_v28 = vadd.f32 %v623_v24, %v3917_v62  ;;  %v817_v29 = vadd.f32 %v816_v25, %v3921_v63  ;;  %v625_v22 = vpop.f32.mrb[27].mxu0  ;;  %v818_v23 = vpop.f32.mrb[27].mxu1 }
 0x182   : > { %v2262_v33 = vmax.f32 %v622_v20, 0.0  ;;  %v2264_v49 = vmax.f32 %v815_v21, 0.0  ;;  %v626_v26 = vadd.f32 %v625_v22, %v3925_v0  ;;  %v819_v27 = vadd.f32 %v818_v23, %v3929_v1 }
 0x183   : > { %v2594_v50 = vadd.f32 %v2593_v8, %v2261_v18  ;;  %v2668_v51 = vadd.f32 %v2667_v9, %v2263_v19  ;;  %v2277_v30 = vmax.f32 %v624_v28, 0.0  ;;  %v2279_v32 = vmax.f32 %v817_v29, 0.0  ;;  %3479 = vmatmul.mubr.msk.bf16.gmra.mrb[132].mxu0 %vm427_vm1, %v3705_v34  ;;  %3496 = vmatmul.mubr.msk.bf16.gmra.mrb[132].mxu1 %vm427_vm1, %v3705_v34 }
 0x184   : > { %v2631_v53 = vadd.f32 %v2630_v10, %v2262_v33  ;;  %v2705_v54 = vadd.f32 %v2704_v11, %v2264_v49  ;;  %v2278_v56 = vmax.f32 %v626_v26, 0.0  ;;  %v2280_v59 = vmax.f32 %v819_v27, 0.0  ;;  %1349 = vmatprep.mubr.bf16.mxu0 %v3611_v4  ;;  %1542 = vmatprep.mubr.bf16.mxu1 %v3611_v4 }
 0x185   : > { %v2595_v52 = vadd.f32 %v2594_v50, %v2277_v30  ;;  %v2669_v2 = vadd.f32 %v2668_v51, %v2279_v32 }
 0x186   : > { %v2632_v55 = vadd.f32 %v2631_v53, %v2278_v56  ;;  %v2706_v3 = vadd.f32 %v2705_v54, %v2280_v59  ;;  %v629_v5 = vpop.f32.mrb[28].mxu0  ;;  %v822_v7 = vpop.f32.mrb[28].mxu1 }
 0x187   : > { %v630_v8 = vadd.f32 %v629_v5, %v3917_v62  ;;  %v823_v9 = vadd.f32 %v822_v7, %v3921_v63  ;;  %v631_v12 = vpop.f32.mrb[29].mxu0  ;;  %v824_v13 = vpop.f32.mrb[29].mxu1 }
 0x188   : > { %v632_v10 = vadd.f32 %v631_v12, %v3925_v0  ;;  %v825_v11 = vadd.f32 %v824_v13, %v3929_v1  ;;  %v633_v16 = vpop.f32.mrb[30].mxu0  ;;  %v826_v17 = vpop.f32.mrb[30].mxu1 }
 0x189   : > { %v2293_v14 = vmax.f32 %v630_v8, 0.0  ;;  %v2295_v15 = vmax.f32 %v823_v9, 0.0  ;;  %v634_v20 = vadd.f32 %v633_v16, %v3917_v62  ;;  %v827_v21 = vadd.f32 %v826_v17, %v3921_v63  ;;  %v635_v24 = vpop.f32.mrb[31].mxu0  ;;  %v828_v25 = vpop.f32.mrb[31].mxu1 }
 0x18a   : > { %v2294_v18 = vmax.f32 %v632_v10, 0.0  ;;  %v2296_v19 = vmax.f32 %v825_v11, 0.0  ;;  %v636_v28 = vadd.f32 %v635_v24, %v3925_v0  ;;  %v829_v29 = vadd.f32 %v828_v25, %v3929_v1 }
 0x18b   : > { %v2596_v22 = vadd.f32 %v2595_v52, %v2293_v14  ;;  %v2670_v23 = vadd.f32 %v2669_v2, %v2295_v15  ;;  %v2309_v33 = vmax.f32 %v634_v20, 0.0  ;;  %v2311_v49 = vmax.f32 %v827_v21, 0.0  ;;  %3480 = vmatmul.mubr.msk.bf16.gmra.mrb[136].mxu0 %vm427_vm1, %v3713_v35  ;;  %3497 = vmatmul.mubr.msk.bf16.gmra.mrb[136].mxu1 %vm427_vm1, %v3713_v35 }
 0x18c   : > { %v2633_v26 = vadd.f32 %v2632_v55, %v2294_v18  ;;  %v2707_v27 = vadd.f32 %v2706_v3, %v2296_v19  ;;  %v2310_v50 = vmax.f32 %v636_v28, 0.0  ;;  %v2312_v51 = vmax.f32 %v829_v29, 0.0  ;;  %1359 = vmatprep.mubr.bf16.mxu0 %v3611_v4  ;;  %1552 = vmatprep.mubr.bf16.mxu1 %v3611_v4 }
 0x18d   : > { %v2597_v30 = vadd.f32 %v2596_v22, %v2309_v33  ;;  %v2671_v32 = vadd.f32 %v2670_v23, %v2311_v49 }
 0x18e   : > { %v2634_v53 = vadd.f32 %v2633_v26, %v2310_v50  ;;  %v2708_v54 = vadd.f32 %v2707_v27, %v2312_v51  ;;  %v639_v56 = vpop.f32.mrb[32].mxu0  ;;  %v832_v59 = vpop.f32.mrb[32].mxu1 }
 0x18f   : > { %v640_v52 = vadd.f32 %v639_v56, %v3917_v62  ;;  %v833_v2 = vadd.f32 %v832_v59, %v3921_v63  ;;  %v641_v5 = vpop.f32.mrb[33].mxu0  ;;  %v834_v7 = vpop.f32.mrb[33].mxu1 }
 0x190   : > { %v642_v55 = vadd.f32 %v641_v5, %v3925_v0  ;;  %v835_v3 = vadd.f32 %v834_v7, %v3929_v1  ;;  %v643_v8 = vpop.f32.mrb[34].mxu0  ;;  %v836_v9 = vpop.f32.mrb[34].mxu1 }
 0x191   : > { %v2325_v12 = vmax.f32 %v640_v52, 0.0  ;;  %v2327_v13 = vmax.f32 %v833_v2, 0.0  ;;  %v644_v10 = vadd.f32 %v643_v8, %v3917_v62  ;;  %v837_v11 = vadd.f32 %v836_v9, %v3921_v63  ;;  %v645_v16 = vpop.f32.mrb[35].mxu0  ;;  %v838_v17 = vpop.f32.mrb[35].mxu1 }
 0x192   : > { %v2326_v14 = vmax.f32 %v642_v55, 0.0  ;;  %v2328_v15 = vmax.f32 %v835_v3, 0.0  ;;  %v646_v20 = vadd.f32 %v645_v16, %v3925_v0  ;;  %v839_v21 = vadd.f32 %v838_v17, %v3929_v1 }
 0x193   : > { %v2598_v24 = vadd.f32 %v2597_v30, %v2325_v12  ;;  %v2672_v25 = vadd.f32 %v2671_v32, %v2327_v13  ;;  %v2341_v18 = vmax.f32 %v644_v10, 0.0  ;;  %v2343_v19 = vmax.f32 %v837_v11, 0.0  ;;  %3481 = vmatmul.mubr.msk.bf16.gmra.mrb[140].mxu0 %vm427_vm1, %v3721_v36  ;;  %3498 = vmatmul.mubr.msk.bf16.gmra.mrb[140].mxu1 %vm427_vm1, %v3721_v36 }
 0x194   : > { %v2635_v28 = vadd.f32 %v2634_v53, %v2326_v14  ;;  %v2709_v29 = vadd.f32 %v2708_v54, %v2328_v15  ;;  %v2342_v22 = vmax.f32 %v646_v20, 0.0  ;;  %v2344_v23 = vmax.f32 %v839_v21, 0.0  ;;  %1369 = vmatprep.mubr.bf16.mxu0 %v3611_v4  ;;  %1562 = vmatprep.mubr.bf16.mxu1 %v3611_v4 }
 0x195   : > { %v2599_v33 = vadd.f32 %v2598_v24, %v2341_v18  ;;  %v2673_v49 = vadd.f32 %v2672_v25, %v2343_v19 }
 0x196   : > { %v2636_v26 = vadd.f32 %v2635_v28, %v2342_v22  ;;  %v2710_v27 = vadd.f32 %v2709_v29, %v2344_v23  ;;  %v649_v50 = vpop.f32.mrb[36].mxu0  ;;  %v842_v51 = vpop.f32.mrb[36].mxu1 }
 0x197   : > { %v650_v30 = vadd.f32 %v649_v50, %v3917_v62  ;;  %v843_v32 = vadd.f32 %v842_v51, %v3921_v63  ;;  %v651_v56 = vpop.f32.mrb[37].mxu0  ;;  %v844_v59 = vpop.f32.mrb[37].mxu1 }
 0x198   : > { %v652_v53 = vadd.f32 %v651_v56, %v3925_v0  ;;  %v845_v54 = vadd.f32 %v844_v59, %v3929_v1  ;;  %v653_v52 = vpop.f32.mrb[38].mxu0  ;;  %v846_v2 = vpop.f32.mrb[38].mxu1 }
 0x199   : > { %v2357_v5 = vmax.f32 %v650_v30, 0.0  ;;  %v2359_v7 = vmax.f32 %v843_v32, 0.0  ;;  %v654_v55 = vadd.f32 %v653_v52, %v3917_v62  ;;  %v847_v3 = vadd.f32 %v846_v2, %v3921_v63  ;;  %v655_v8 = vpop.f32.mrb[39].mxu0  ;;  %v848_v9 = vpop.f32.mrb[39].mxu1 }
 0x19a   : > { %v2358_v12 = vmax.f32 %v652_v53, 0.0  ;;  %v2360_v13 = vmax.f32 %v845_v54, 0.0  ;;  %v656_v10 = vadd.f32 %v655_v8, %v3925_v0  ;;  %v849_v11 = vadd.f32 %v848_v9, %v3929_v1 }
 0x19b   : > { %v2600_v16 = vadd.f32 %v2599_v33, %v2357_v5  ;;  %v2674_v17 = vadd.f32 %v2673_v49, %v2359_v7  ;;  %v2373_v14 = vmax.f32 %v654_v55, 0.0  ;;  %v2375_v15 = vmax.f32 %v847_v3, 0.0  ;;  %3482 = vmatmul.mubr.msk.bf16.gmra.mrb[144].mxu0 %vm427_vm1, %v3729_v37  ;;  %3499 = vmatmul.mubr.msk.bf16.gmra.mrb[144].mxu1 %vm427_vm1, %v3729_v37 }
 0x19c   : > { %v2637_v20 = vadd.f32 %v2636_v26, %v2358_v12  ;;  %v2711_v21 = vadd.f32 %v2710_v27, %v2360_v13  ;;  %v2374_v24 = vmax.f32 %v656_v10, 0.0  ;;  %v2376_v25 = vmax.f32 %v849_v11, 0.0  ;;  %1379 = vmatprep.mubr.bf16.mxu0 %v3611_v4  ;;  %1572 = vmatprep.mubr.bf16.mxu1 %v3611_v4 }
 0x19d   : > { %v2601_v18 = vadd.f32 %v2600_v16, %v2373_v14  ;;  %v2675_v19 = vadd.f32 %v2674_v17, %v2375_v15 }
 0x19e   : > { %v2638_v28 = vadd.f32 %v2637_v20, %v2374_v24  ;;  %v2712_v29 = vadd.f32 %v2711_v21, %v2376_v25  ;;  %v659_v22 = vpop.f32.mrb[40].mxu0  ;;  %v852_v23 = vpop.f32.mrb[40].mxu1 }
 0x19f   : > { %v660_v33 = vadd.f32 %v659_v22, %v3917_v62  ;;  %v853_v49 = vadd.f32 %v852_v23, %v3921_v63  ;;  %v661_v50 = vpop.f32.mrb[41].mxu0  ;;  %v854_v51 = vpop.f32.mrb[41].mxu1 }
 0x1a0   : > { %v662_v26 = vadd.f32 %v661_v50, %v3925_v0  ;;  %v855_v27 = vadd.f32 %v854_v51, %v3929_v1  ;;  %v663_v30 = vpop.f32.mrb[42].mxu0  ;;  %v856_v32 = vpop.f32.mrb[42].mxu1 }
 0x1a1   : > { %v2389_v56 = vmax.f32 %v660_v33, 0.0  ;;  %v2391_v59 = vmax.f32 %v853_v49, 0.0  ;;  %v664_v53 = vadd.f32 %v663_v30, %v3917_v62  ;;  %v857_v54 = vadd.f32 %v856_v32, %v3921_v63  ;;  %v665_v52 = vpop.f32.mrb[43].mxu0  ;;  %v858_v2 = vpop.f32.mrb[43].mxu1 }
 0x1a2   : > { %v2390_v5 = vmax.f32 %v662_v26, 0.0  ;;  %v2392_v7 = vmax.f32 %v855_v27, 0.0  ;;  %v666_v55 = vadd.f32 %v665_v52, %v3925_v0  ;;  %v859_v3 = vadd.f32 %v858_v2, %v3929_v1 }
 0x1a3   : > { %v2602_v8 = vadd.f32 %v2601_v18, %v2389_v56  ;;  %v2676_v9 = vadd.f32 %v2675_v19, %v2391_v59  ;;  %v2405_v12 = vmax.f32 %v664_v53, 0.0  ;;  %v2407_v13 = vmax.f32 %v857_v54, 0.0  ;;  %3483 = vmatmul.mubr.msk.bf16.gmra.mrb[148].mxu0 %vm427_vm1, %v3737_v38  ;;  %3500 = vmatmul.mubr.msk.bf16.gmra.mrb[148].mxu1 %vm427_vm1, %v3737_v38 }
 0x1a4   : > { %v2639_v10 = vadd.f32 %v2638_v28, %v2390_v5  ;;  %v2713_v11 = vadd.f32 %v2712_v29, %v2392_v7  ;;  %v2406_v16 = vmax.f32 %v666_v55, 0.0  ;;  %v2408_v17 = vmax.f32 %v859_v3, 0.0  ;;  %1389 = vmatprep.mubr.bf16.mxu0 %v3611_v4  ;;  %1582 = vmatprep.mubr.bf16.mxu1 %v3611_v4 }
 0x1a5   : > { %v2603_v14 = vadd.f32 %v2602_v8, %v2405_v12  ;;  %v2677_v15 = vadd.f32 %v2676_v9, %v2407_v13 }
 0x1a6   : > { %v2640_v20 = vadd.f32 %v2639_v10, %v2406_v16  ;;  %v2714_v21 = vadd.f32 %v2713_v11, %v2408_v17  ;;  %v669_v24 = vpop.f32.mrb[44].mxu0  ;;  %v862_v25 = vpop.f32.mrb[44].mxu1 }
 0x1a7   : > { %v670_v18 = vadd.f32 %v669_v24, %v3917_v62  ;;  %v863_v19 = vadd.f32 %v862_v25, %v3921_v63  ;;  %v671_v22 = vpop.f32.mrb[45].mxu0  ;;  %v864_v23 = vpop.f32.mrb[45].mxu1 }
 0x1a8   : > { %v672_v28 = vadd.f32 %v671_v22, %v3925_v0  ;;  %v865_v29 = vadd.f32 %v864_v23, %v3929_v1  ;;  %v673_v33 = vpop.f32.mrb[46].mxu0  ;;  %v866_v49 = vpop.f32.mrb[46].mxu1 }
 0x1a9   : > { %v2421_v50 = vmax.f32 %v670_v18, 0.0  ;;  %v2423_v51 = vmax.f32 %v863_v19, 0.0  ;;  %v674_v26 = vadd.f32 %v673_v33, %v3917_v62  ;;  %v867_v27 = vadd.f32 %v866_v49, %v3921_v63  ;;  %v675_v30 = vpop.f32.mrb[47].mxu0  ;;  %v868_v32 = vpop.f32.mrb[47].mxu1 }
 0x1aa   : > { %v2422_v56 = vmax.f32 %v672_v28, 0.0  ;;  %v2424_v59 = vmax.f32 %v865_v29, 0.0  ;;  %v676_v53 = vadd.f32 %v675_v30, %v3925_v0  ;;  %v869_v54 = vadd.f32 %v868_v32, %v3929_v1 }
 0x1ab   : > { %v2604_v52 = vadd.f32 %v2603_v14, %v2421_v50  ;;  %v2678_v2 = vadd.f32 %v2677_v15, %v2423_v51  ;;  %v2437_v5 = vmax.f32 %v674_v26, 0.0  ;;  %v2439_v7 = vmax.f32 %v867_v27, 0.0  ;;  %3484 = vmatmul.mubr.msk.bf16.gmra.mrb[152].mxu0 %vm427_vm1, %v3745_v39  ;;  %3501 = vmatmul.mubr.msk.bf16.gmra.mrb[152].mxu1 %vm427_vm1, %v3745_v39 }
 0x1ac   : > { %v2641_v55 = vadd.f32 %v2640_v20, %v2422_v56  ;;  %v2715_v3 = vadd.f32 %v2714_v21, %v2424_v59  ;;  %v2438_v8 = vmax.f32 %v676_v53, 0.0  ;;  %v2440_v9 = vmax.f32 %v869_v54, 0.0  ;;  %1399 = vmatprep.mubr.bf16.mxu0 %v3611_v4  ;;  %1592 = vmatprep.mubr.bf16.mxu1 %v3611_v4 }
 0x1ad   : > { %v2605_v12 = vadd.f32 %v2604_v52, %v2437_v5  ;;  %v2679_v13 = vadd.f32 %v2678_v2, %v2439_v7 }
 0x1ae   : > { %v2642_v10 = vadd.f32 %v2641_v55, %v2438_v8  ;;  %v2716_v11 = vadd.f32 %v2715_v3, %v2440_v9  ;;  %v679_v16 = vpop.f32.mrb[48].mxu0  ;;  %v872_v17 = vpop.f32.mrb[48].mxu1 }
 0x1af   : > { %v680_v14 = vadd.f32 %v679_v16, %v3917_v62  ;;  %v873_v15 = vadd.f32 %v872_v17, %v3921_v63  ;;  %v681_v24 = vpop.f32.mrb[49].mxu0  ;;  %v874_v25 = vpop.f32.mrb[49].mxu1 }
 0x1b0   : > { %v682_v20 = vadd.f32 %v681_v24, %v3925_v0  ;;  %v875_v21 = vadd.f32 %v874_v25, %v3929_v1  ;;  %v683_v18 = vpop.f32.mrb[50].mxu0  ;;  %v876_v19 = vpop.f32.mrb[50].mxu1 }
 0x1b1   : > { %v2453_v22 = vmax.f32 %v680_v14, 0.0  ;;  %v2455_v23 = vmax.f32 %v873_v15, 0.0  ;;  %v684_v28 = vadd.f32 %v683_v18, %v3917_v62  ;;  %v877_v29 = vadd.f32 %v876_v19, %v3921_v63  ;;  %v685_v33 = vpop.f32.mrb[51].mxu0  ;;  %v878_v49 = vpop.f32.mrb[51].mxu1 }
 0x1b2   : > { %v2454_v50 = vmax.f32 %v682_v20, 0.0  ;;  %v2456_v51 = vmax.f32 %v875_v21, 0.0  ;;  %v686_v26 = vadd.f32 %v685_v33, %v3925_v0  ;;  %v879_v27 = vadd.f32 %v878_v49, %v3929_v1 }
 0x1b3   : > { %v2606_v30 = vadd.f32 %v2605_v12, %v2453_v22  ;;  %v2680_v32 = vadd.f32 %v2679_v13, %v2455_v23  ;;  %v2469_v56 = vmax.f32 %v684_v28, 0.0  ;;  %v2471_v59 = vmax.f32 %v877_v29, 0.0  ;;  %3485 = vmatmul.mubr.msk.bf16.gmra.mrb[156].mxu0 %vm427_vm1, %v3753_v40  ;;  %3502 = vmatmul.mubr.msk.bf16.gmra.mrb[156].mxu1 %vm427_vm1, %v3753_v40 }
 0x1b4   : > { %v2643_v53 = vadd.f32 %v2642_v10, %v2454_v50  ;;  %v2717_v54 = vadd.f32 %v2716_v11, %v2456_v51  ;;  %v2470_v52 = vmax.f32 %v686_v26, 0.0  ;;  %v2472_v2 = vmax.f32 %v879_v27, 0.0  ;;  %1409 = vmatprep.mubr.bf16.mxu0 %v3611_v4  ;;  %1602 = vmatprep.mubr.bf16.mxu1 %v3611_v4 }
 0x1b5   : > { %v2607_v5 = vadd.f32 %v2606_v30, %v2469_v56  ;;  %v2681_v7 = vadd.f32 %v2680_v32, %v2471_v59 }
 0x1b6   : > { %v2644_v55 = vadd.f32 %v2643_v53, %v2470_v52  ;;  %v2718_v3 = vadd.f32 %v2717_v54, %v2472_v2  ;;  %v689_v8 = vpop.f32.mrb[52].mxu0  ;;  %v882_v9 = vpop.f32.mrb[52].mxu1 }
 0x1b7   : > { %v690_v12 = vadd.f32 %v689_v8, %v3917_v62  ;;  %v883_v13 = vadd.f32 %v882_v9, %v3921_v63  ;;  %v691_v16 = vpop.f32.mrb[53].mxu0  ;;  %v884_v17 = vpop.f32.mrb[53].mxu1  ;;  %v4804_v9 = vsub.s32 6, %v3661_v6 }
 0x1b8   : > { %v692_v10 = vadd.f32 %v691_v16, %v3925_v0  ;;  %v885_v11 = vadd.f32 %v884_v17, %v3929_v1  ;;  %v693_v14 = vpop.f32.mrb[54].mxu0  ;;  %v886_v15 = vpop.f32.mrb[54].mxu1 }
 0x1b9   : > { %v2485_v24 = vmax.f32 %v690_v12, 0.0  ;;  %v2487_v25 = vmax.f32 %v883_v13, 0.0  ;;  %v694_v20 = vadd.f32 %v693_v14, %v3917_v62  ;;  %v887_v21 = vadd.f32 %v886_v15, %v3921_v63  ;;  %v695_v18 = vpop.f32.mrb[55].mxu0  ;;  %v888_v19 = vpop.f32.mrb[55].mxu1 }
 0x1ba   : > { %v2486_v22 = vmax.f32 %v692_v10, 0.0  ;;  %v2488_v23 = vmax.f32 %v885_v11, 0.0  ;;  %v696_v28 = vadd.f32 %v695_v18, %v3925_v0  ;;  %v889_v29 = vadd.f32 %v888_v19, %v3929_v1 }
 0x1bb   : > { %v2608_v33 = vadd.f32 %v2607_v5, %v2485_v24  ;;  %v2682_v49 = vadd.f32 %v2681_v7, %v2487_v25  ;;  %v2501_v50 = vmax.f32 %v694_v20, 0.0  ;;  %v2503_v51 = vmax.f32 %v887_v21, 0.0  ;;  %3486 = vmatmul.mubr.msk.bf16.gmra.mrb[160].mxu0 %vm427_vm1, %v3761_v41  ;;  %3503 = vmatmul.mubr.msk.bf16.gmra.mrb[160].mxu1 %vm427_vm1, %v3761_v41 }
 0x1bc   : > { %v2645_v26 = vadd.f32 %v2644_v55, %v2486_v22  ;;  %v2719_v27 = vadd.f32 %v2718_v3, %v2488_v23  ;;  %v2502_v30 = vmax.f32 %v696_v28, 0.0  ;;  %v2504_v32 = vmax.f32 %v889_v29, 0.0  ;;  %1419 = vmatprep.mubr.bf16.mxu0 %v3611_v4  ;;  %1612 = vmatprep.mubr.bf16.mxu1 %v3611_v4 }
 0x1bd   : > { %v2609_v56 = vadd.f32 %v2608_v33, %v2501_v50  ;;  %v2683_v59 = vadd.f32 %v2682_v49, %v2503_v51  ;;  %v261_v5 = vsub.s32 4, %v3661_v6  ;;  %v4803_v12 = vsub.s32 5, %v3661_v6 }
 0x1be   : > { %v2646_v53 = vadd.f32 %v2645_v26, %v2502_v30  ;;  %v2720_v54 = vadd.f32 %v2719_v27, %v2504_v32  ;;  %v699_v52 = vpop.f32.mrb[56].mxu0  ;;  %v892_v2 = vpop.f32.mrb[56].mxu1  ;;  %v3612_v11 = vmov 1966171168   ;;  %v4802_v15 = vsub.s32 7, %v3661_v6 }
 0x1bf   : > { %v700_v7 = vadd.f32 %v699_v52, %v3917_v62  ;;  %v893_v8 = vadd.f32 %v892_v2, %v3921_v63  ;;  %v701_v55 = vpop.f32.mrb[57].mxu0  ;;  %v894_v3 = vpop.f32.mrb[57].mxu1  ;;  %v4140_v14 = vunpack.c.l.s4 %v3612_v11 }
 0x1c0   : > { %v702_v13 = vadd.f32 %v701_v55, %v3925_v0  ;;  %v895_v16 = vadd.f32 %v894_v3, %v3929_v1  ;;  %v703_v17 = vpop.f32.mrb[58].mxu0  ;;  %v896_v10 = vpop.f32.mrb[58].mxu1  ;;  %v3584_v55 = vld [vmem:[%s4800_s2] ss:$4 sm:$0xff] }
 0x1c1   : > { %v2517_v24 = vmax.f32 %v700_v7, 0.0  ;;  %v2519_v25 = vmax.f32 %v893_v8, 0.0  ;;  %v704_v20 = vadd.f32 %v703_v17, %v3917_v62  ;;  %v897_v21 = vadd.f32 %v896_v10, %v3921_v63  ;;  %v705_v18 = vpop.f32.mrb[59].mxu0  ;;  %v898_v19 = vpop.f32.mrb[59].mxu1 }
 0x1c2   : > { %v2518_v22 = vmax.f32 %v702_v13, 0.0  ;;  %v2520_v23 = vmax.f32 %v895_v16, 0.0  ;;  %v706_v28 = vadd.f32 %v705_v18, %v3925_v0  ;;  %v899_v29 = vadd.f32 %v898_v19, %v3929_v1 }
 0x1c3   : > { %v2610_v33 = vadd.f32 %v2609_v56, %v2517_v24  ;;  %v2684_v49 = vadd.f32 %v2683_v59, %v2519_v25  ;;  %v2533_v50 = vmax.f32 %v704_v20, 0.0  ;;  %v2535_v51 = vmax.f32 %v897_v21, 0.0  ;;  %3487 = vmatmul.mubr.msk.bf16.gmra.mrb[164].mxu0 %vm427_vm1, %v3769_v42  ;;  %3504 = vmatmul.mubr.msk.bf16.gmra.mrb[164].mxu1 %vm427_vm1, %v3769_v42 }
 0x1c4   : > { %v2647_v26 = vadd.f32 %v2646_v53, %v2518_v22  ;;  %v2721_v27 = vadd.f32 %v2720_v54, %v2520_v23  ;;  %v2534_v30 = vmax.f32 %v706_v28, 0.0  ;;  %v2536_v32 = vmax.f32 %v899_v29, 0.0  ;;  %1429 = vmatprep.mubr.bf16.mxu0 %v3611_v4  ;;  %1622 = vmatprep.mubr.bf16.mxu1 %v3611_v4 }
 0x1c5   : > { %v2611_v52 = vadd.f32 %v2610_v33, %v2533_v50  ;;  %v2685_v2 = vadd.f32 %v2684_v49, %v2535_v51  ;;  %v4158_v53 = vrot.slane %v3584_v55, %v261_v5  ;;  %v4164_v17 = vrot.slane %v3584_v55, %v4804_v9 }
 0x1c6   : > { %v2648_v56 = vadd.f32 %v2647_v26, %v2534_v30  ;;  %v2722_v59 = vadd.f32 %v2721_v27, %v2536_v32  ;;  %v709_v7 = vpop.f32.mrb[60].mxu0  ;;  %v902_v8 = vpop.f32.mrb[60].mxu1  ;;  %v4168_v10 = vrot.slane %v3584_v55, %v4803_v12  ;;  %v3197_v21 = vunpack.c.0.s8 %v4140_v14 }
 0x1c7   : > { %v710_v54 = vadd.f32 %v709_v7, %v3917_v62  ;;  %v903_v3 = vadd.f32 %v902_v8, %v3921_v63  ;;  %v711_v13 = vpop.f32.mrb[61].mxu0  ;;  %v904_v16 = vpop.f32.mrb[61].mxu1  ;;  %v4175_v18 = vrot.slane %v3584_v55, %v4802_v15 }
 0x1c8   : > { %v712_v11 = vadd.f32 %v711_v13, %v3925_v0  ;;  %v905_v24 = vadd.f32 %v904_v16, %v3929_v1  ;;  %v713_v25 = vpop.f32.mrb[62].mxu0  ;;  %v906_v20 = vpop.f32.mrb[62].mxu1 }
 0x1c9   : > { %v2549_v19 = vmax.f32 %v710_v54, 0.0  ;;  %v2551_v22 = vmax.f32 %v903_v3, 0.0  ;;  %v714_v23 = vadd.f32 %v713_v25, %v3917_v62  ;;  %v907_v28 = vadd.f32 %v906_v20, %v3921_v63  ;;  %v715_v29 = vpop.f32.mrb[63].mxu0  ;;  %v908_v33 = vpop.f32.mrb[63].mxu1 }
 0x1ca   : > { %v2550_v49 = vmax.f32 %v712_v11, 0.0  ;;  %v2552_v50 = vmax.f32 %v905_v24, 0.0  ;;  %v716_v51 = vadd.f32 %v715_v29, %v3925_v0  ;;  %v909_v26 = vadd.f32 %v908_v33, %v3929_v1 }
 0x1cb   : > { %v2612_v27 = vadd.f32 %v2611_v52, %v2549_v19  ;;  %v2686_v14 = vadd.f32 %v2685_v2, %v2551_v22  ;;  %v2565_v30 = vmax.f32 %v714_v23, 0.0  ;;  %v2567_v32 = vmax.f32 %v907_v28, 0.0  ;;  %3488 = vmatmul.mubr.msk.bf16.gmra.mrb[168].mxu0 %vm427_vm1, %v3777_v43  ;;  %3505 = vmatmul.mubr.msk.bf16.gmra.mrb[168].mxu1 %vm427_vm1, %v3777_v43 }
 0x1cc   : > { %v2649_v62 = vadd.f32 %v2648_v56, %v2550_v49  ;;  %v2723_v63 = vadd.f32 %v2722_v59, %v2552_v50  ;;  %v2566_v7 = vmax.f32 %v716_v51, 0.0  ;;  %v2568_v8 = vmax.f32 %v909_v26, 0.0  ;;  %1439 = vmatprep.mubr.bf16.mxu0 %v3611_v4  ;;  %1632 = vmatprep.mubr.bf16.mxu1 %v3611_v4 }
 0x1cd   : > { %v2613_v0 = vadd.f32 %v2612_v27, %v2565_v30  ;;  %v2687_v1 = vadd.f32 %v2686_v14, %v2567_v32  ;;  %v4188_v2 = vsub.s32 %v3197_v21, %v3661_v6 }
 0x1ce   : > { %v2650_v52 = vadd.f32 %v2649_v62, %v2566_v7  ;;  %v2724_v55 = vadd.f32 %v2723_v63, %v2568_v8  ;;  %v945_v54 = vpop.f32.mrb[64].mxu0  ;;  %v1138_v3 = vpop.f32.mrb[64].mxu1 }
 0x1cf   : > { %v2614_v13 = vrot.slane %v2613_v0, 4  ;;  %v2688_v16 = vrot.slane %v2687_v1, 4  ;;  %v946_v56 = vadd.f32 %v945_v54, %v4158_v53  ;;  %v1139_v59 = vadd.f32 %v1138_v3, %v4164_v17  ;;  %v947_v11 = vpop.f32.mrb[65].mxu0  ;;  %v1140_v24 = vpop.f32.mrb[65].mxu1 }
 0x1d0   : > { %v2651_v25 = vrot.slane %v2650_v52, 4  ;;  %v2725_v20 = vrot.slane %v2724_v55, 4  ;;  %v948_v19 = vadd.f32 %v947_v11, %v4168_v10  ;;  %v1141_v22 = vadd.f32 %v1140_v24, %v4175_v18  ;;  %v949_v23 = vpop.f32.mrb[66].mxu0  ;;  %v1142_v21 = vpop.f32.mrb[66].mxu1 }
 0x1d1   : > { %v2615_v28 = vadd.f32 %v2614_v13, %v2613_v0  ;;  %v2689_v29 = vadd.f32 %v2688_v16, %v2687_v1  ;;  %v2073_v33 = vmax.f32 %v946_v56, 0.0  ;;  %v2075_v49 = vmax.f32 %v1139_v59, 0.0  ;;  %v951_v50 = vpop.f32.mrb[67].mxu0  ;;  %v1144_v51 = vpop.f32.mrb[67].mxu1 }
 0x1d2   : > { %v2652_v26 = vadd.f32 %v2651_v25, %v2650_v52  ;;  %v2726_v27 = vadd.f32 %v2725_v20, %v2724_v55  ;;  %v2074_v14 = vmax.f32 %v948_v19, 0.0  ;;  %v2076_v30 = vmax.f32 %v1141_v22, 0.0 }
 0x1d3   : > { %v2616_v32 = vrot.slane %v2615_v28, 2  ;;  %v2690_v62 = vrot.slane %v2689_v29, 2  ;;  %v950_v63 = vadd.f32 %v949_v23, %v4158_v53  ;;  %v1143_v7 = vadd.f32 %v1142_v21, %v4164_v17  ;;  %3489 = vmatmul.mubr.msk.bf16.gmra.mrb[172].mxu0 %vm427_vm1, %v3785_v44  ;;  %3506 = vmatmul.mubr.msk.bf16.gmra.mrb[172].mxu1 %vm427_vm1, %v3785_v44 }
 0x1d4   : > { %v2653_v8 = vrot.slane %v2652_v26, 2  ;;  %v2727_v0 = vrot.slane %v2726_v27, 2  ;;  %v952_v1 = vadd.f32 %v951_v50, %v4168_v10  ;;  %v1145_v52 = vadd.f32 %v1144_v51, %v4175_v18  ;;  %1449 = vmatprep.mubr.bf16.mxu0 %v3611_v4  ;;  %1642 = vmatprep.mubr.bf16.mxu1 %v3611_v4 }
 0x1d5   : > { %v2617_v55 = vadd.f32 %v2616_v32, %v2615_v28  ;;  %v2691_v54 = vadd.f32 %v2690_v62, %v2689_v29  ;;  %v2089_v3 = vmax.f32 %v950_v63, 0.0  ;;  %v2091_v13 = vmax.f32 %v1143_v7, 0.0 }
 0x1d6   : > { %v2654_v16 = vadd.f32 %v2653_v8, %v2652_v26  ;;  %v2728_v56 = vadd.f32 %v2727_v0, %v2726_v27  ;;  %v2090_v59 = vmax.f32 %v952_v1, 0.0  ;;  %v2092_v11 = vmax.f32 %v1145_v52, 0.0  ;;  %v955_v24 = vpop.f32.mrb[68].mxu0  ;;  %v1148_v25 = vpop.f32.mrb[68].mxu1 }
 0x1d7   : > { %v2618_v20 = vrot.slane %v2617_v55, 1  ;;  %v2692_v19 = vrot.slane %v2691_v54, 1  ;;  %v2731_v22 = vadd.f32 %v2089_v3, %v2073_v33  ;;  %v2805_v23 = vadd.f32 %v2091_v13, %v2075_v49  ;;  %v957_v21 = vpop.f32.mrb[69].mxu0  ;;  %v1150_v50 = vpop.f32.mrb[69].mxu1 }
 0x1d8   : > { %v2655_v51 = vrot.slane %v2654_v16, 1  ;;  %v2729_v15 = vrot.slane %v2728_v56, 1  ;;  %v2768_v12 = vadd.f32 %v2090_v59, %v2074_v14  ;;  %v2842_v9 = vadd.f32 %v2092_v11, %v2076_v30  ;;  %v959_v28 = vpop.f32.mrb[70].mxu0  ;;  %v1152_v29 = vpop.f32.mrb[70].mxu1 }
 0x1d9   : > { %v2619_v32 = vadd.f32 %v2618_v20, %v2617_v55  ;;  %v2693_v62 = vadd.f32 %v2692_v19, %v2691_v54  ;;  %v956_v26 = vadd.f32 %v955_v24, %v4158_v53  ;;  %v1149_v27 = vadd.f32 %v1148_v25, %v4164_v17  ;;  %v961_v63 = vpop.f32.mrb[71].mxu0  ;;  %v1154_v7 = vpop.f32.mrb[71].mxu1 }
 0x1da   : > { %v2656_v8 = vadd.f32 %v2655_v51, %v2654_v16  ;;  %v2730_v0 = vadd.f32 %v2729_v15, %v2728_v56  ;;  %v958_v33 = vadd.f32 %v957_v21, %v4168_v10  ;;  %v1151_v49 = vadd.f32 %v1150_v50, %v4175_v18 }
 0x1db   : > { %v2105_v1 = vmax.f32 %v956_v26, 0.0  ;;  %v2107_v52 = vmax.f32 %v1149_v27, 0.0  ;;  %v960_v14 = vadd.f32 %v959_v28, %v4158_v53  ;;  %v1153_v30 = vadd.f32 %v1152_v29, %v4164_v17  ;;  %3490 = vmatmul.mubr.msk.bf16.gmra.mrb[176].mxu0 %vm427_vm1, %v3793_v45  ;;  %3507 = vmatmul.mubr.msk.bf16.gmra.mrb[176].mxu1 %vm427_vm1, %v3793_v45 }
 0x1dc   : > { %v3191_v55 = vcombine.low %v2619_v32, %v2656_v8  ;;  %v3192_v54 = vcombine.low %v2693_v62, %v2730_v0  ;;  %v2106_v3 = vmax.f32 %v958_v33, 0.0  ;;  %v2108_v15 = vmax.f32 %v1151_v49, 0.0  ;;  %1459 = vmatprep.mubr.bf16.mxu0 %v3611_v4  ;;  %1652 = vmatprep.mubr.bf16.mxu1 %v3611_v4 }
 0x1dd   : > { %v2732_v13 = vadd.f32 %v2731_v22, %v2105_v1  ;;  %v2806_v16 = vadd.f32 %v2805_v23, %v2107_v52  ;;  %v2121_v56 = vmax.f32 %v960_v14, 0.0  ;;  %v2123_v59 = vmax.f32 %v1153_v30, 0.0 }
 0x1de   : > { %v4217_v11 = vrot.slane %v3191_v55, %v4188_v2  ;;  %v4220_v24 = vrot.slane %v3192_v54, %v4188_v2  ;;  %v2769_v25 = vadd.f32 %v2768_v12, %v2106_v3  ;;  %v2843_v20 = vadd.f32 %v2842_v9, %v2108_v15  ;;  %v965_v19 = vpop.f32.mrb[72].mxu0  ;;  %v1158_v21 = vpop.f32.mrb[72].mxu1 }
 0x1df   : > { %v2733_v50 = vadd.f32 %v2732_v13, %v2121_v56  ;;  %v2807_v51 = vadd.f32 %v2806_v16, %v2123_v59  ;;  %v962_v28 = vadd.f32 %v961_v63, %v4168_v10  ;;  %v1155_v29 = vadd.f32 %v1154_v7, %v4175_v18  ;;  %v967_v22 = vpop.f32.mrb[73].mxu0  ;;  %v1160_v23 = vpop.f32.mrb[73].mxu1 }
 0x1e0   : > { %v3223_v32 = vcombine.low %v4217_v11, %v4220_v24  ;;  %v966_v62 = vadd.f32 %v965_v19, %v4158_v53  ;;  %v1159_v26 = vadd.f32 %v1158_v21, %v4164_v17  ;;  %v968_v12 = vadd.f32 %v967_v22, %v4168_v10  ;;  %v969_v9 = vpop.f32.mrb[74].mxu0  ;;  %v1162_v27 = vpop.f32.mrb[74].mxu1 }
 0x1e1   : > { %v2122_v8 = vmax.f32 %v962_v28, 0.0  ;;  %v2124_v0 = vmax.f32 %v1155_v29, 0.0  ;;  %v1161_v33 = vadd.f32 %v1160_v23, %v4175_v18  ;;  %v970_v63 = vadd.f32 %v969_v9, %v4158_v53  ;;  %v971_v7 = vpop.f32.mrb[75].mxu0  ;;  %v1164_v49 = vpop.f32.mrb[75].mxu1 }
 0x1e2   : > { %v2137_v1 = vmax.f32 %v966_v62, 0.0  ;;  %v2139_v52 = vmax.f32 %v1159_v26, 0.0  ;;  %v2138_v14 = vmax.f32 %v968_v12, 0.0  ;;  %v1163_v16 = vadd.f32 %v1162_v27, %v4164_v17 }
 0x1e3   : > { %v2770_v30 = vadd.f32 %v2769_v25, %v2122_v8  ;;  %v2844_v55 = vadd.f32 %v2843_v20, %v2124_v0  ;;  %v2140_v54 = vmax.f32 %v1161_v33, 0.0  ;;  %v2153_v3 = vmax.f32 %v970_v63, 0.0  ;;  %3491 = vmatmul.mubr.msk.bf16.gmra.mrb[180].mxu0 %vm427_vm1, %v3801_v46  ;;  %3508 = vmatmul.mubr.msk.bf16.gmra.mrb[180].mxu1 %vm427_vm1, %v3801_v46 }
 0x1e4   : > { %v2734_v15 = vadd.f32 %v2733_v50, %v2137_v1  ;;  %v2808_v13 = vadd.f32 %v2807_v51, %v2139_v52  ;;  %v972_v56 = vadd.f32 %v971_v7, %v4168_v10  ;;  %1469 = vmatprep.mubr.bf16.mxu0 %v3611_v4  ;;  %v1165_v25 = vadd.f32 %v1164_v49, %v4175_v18 }
 0x1e5   : > { %v2771_v59 = vadd.f32 %v2770_v30, %v2138_v14  ;;  %v2845_v19 = vadd.f32 %v2844_v55, %v2140_v54  ;;  %1662 = vmatprep.mubr.bf16.mxu1 %v3611_v4  ;;  %v2155_v21 = vmax.f32 %v1163_v16, 0.0 }
 0x1e6   : > { %v2735_v20 = vadd.f32 %v2734_v15, %v2153_v3  ;;  %v2154_v28 = vmax.f32 %v972_v56, 0.0  ;;  %v975_v29 = vpop.f32.mrb[76].mxu0  ;;  %v1168_v22 = vpop.f32.mrb[76].mxu1  ;;  %v2156_v23 = vmax.f32 %v1165_v25, 0.0 }
 0x1e7   : > { %v976_v50 = vadd.f32 %v975_v29, %v4158_v53  ;;  %v1169_v51 = vadd.f32 %v1168_v22, %v4164_v17  ;;  %v977_v62 = vpop.f32.mrb[77].mxu0  ;;  %v1170_v26 = vpop.f32.mrb[77].mxu1  ;;  %v2809_v12 = vadd.f32 %v2808_v13, %v2155_v21 }
 0x1e8   : > { %v2772_v9 = vadd.f32 %v2771_v59, %v2154_v28  ;;  %v978_v27 = vadd.f32 %v977_v62, %v4168_v10  ;;  %v1171_v8 = vadd.f32 %v1170_v26, %v4175_v18  ;;  %v979_v0 = vpop.f32.mrb[78].mxu0  ;;  %v1172_v33 = vpop.f32.mrb[78].mxu1  ;;  %v2846_v63 = vadd.f32 %v2845_v19, %v2156_v23 }
 0x1e9   : > { %v2169_v7 = vmax.f32 %v976_v50, 0.0  ;;  %v2171_v49 = vmax.f32 %v1169_v51, 0.0  ;;  %v980_v1 = vadd.f32 %v979_v0, %v4158_v53  ;;  %v981_v52 = vpop.f32.mrb[79].mxu0  ;;  %v1174_v14 = vpop.f32.mrb[79].mxu1  ;;  %v1173_v54 = vadd.f32 %v1172_v33, %v4164_v17 }
 0x1ea   : > { %v2170_v30 = vmax.f32 %v978_v27, 0.0  ;;  %v2172_v55 = vmax.f32 %v1171_v8, 0.0  ;;  %v982_v3 = vadd.f32 %v981_v52, %v4168_v10  ;;  %v1175_v56 = vadd.f32 %v1174_v14, %v4175_v18 }
 0x1eb   : > { %v2736_v15 = vadd.f32 %v2735_v20, %v2169_v7  ;;  %v2810_v13 = vadd.f32 %v2809_v12, %v2171_v49  ;;  %v2185_v16 = vmax.f32 %v980_v1, 0.0  ;;  %3492 = vmatmul.mubr.msk.bf16.gmra.mrb[184].mxu0 %vm427_vm1, %v3809_v47  ;;  %3509 = vmatmul.mubr.msk.bf16.gmra.mrb[184].mxu1 %vm427_vm1, %v3809_v47  ;;  %v2187_v25 = vmax.f32 %v1173_v54, 0.0 }
 0x1ec   : > { %v2773_v59 = vadd.f32 %v2772_v9, %v2170_v30  ;;  %v2847_v19 = vadd.f32 %v2846_v63, %v2172_v55  ;;  %v2186_v21 = vmax.f32 %v982_v3, 0.0  ;;  %1479 = vmatprep.mubr.bf16.mxu0 %v3611_v4  ;;  %1672 = vmatprep.mubr.bf16.mxu1 %v3611_v4  ;;  %v2188_v20 = vmax.f32 %v1175_v56, 0.0 }
 0x1ed   : > { %v2737_v28 = vadd.f32 %v2736_v15, %v2185_v16  ;;  %v2811_v29 = vadd.f32 %v2810_v13, %v2187_v25 }
 0x1ee   : > { %v2774_v22 = vadd.f32 %v2773_v59, %v2186_v21  ;;  %v985_v23 = vpop.f32.mrb[80].mxu0  ;;  %v1178_v50 = vpop.f32.mrb[80].mxu1  ;;  %v2848_v51 = vadd.f32 %v2847_v19, %v2188_v20 }
 0x1ef   : > { %v986_v62 = vadd.f32 %v985_v23, %v4158_v53  ;;  %v1179_v26 = vadd.f32 %v1178_v50, %v4164_v17  ;;  %v987_v12 = vpop.f32.mrb[81].mxu0  ;;  %v1180_v9 = vpop.f32.mrb[81].mxu1 }
 0x1f0   : > { %v988_v27 = vadd.f32 %v987_v12, %v4168_v10  ;;  %v1181_v8 = vadd.f32 %v1180_v9, %v4175_v18  ;;  %v989_v0 = vpop.f32.mrb[82].mxu0  ;;  %v1182_v33 = vpop.f32.mrb[82].mxu1 }
 0x1f1   : > { %v2201_v63 = vmax.f32 %v986_v62, 0.0  ;;  %v2203_v7 = vmax.f32 %v1179_v26, 0.0  ;;  %v990_v49 = vadd.f32 %v989_v0, %v4158_v53  ;;  %v1183_v1 = vadd.f32 %v1182_v33, %v4164_v17  ;;  %v991_v52 = vpop.f32.mrb[83].mxu0  ;;  %v1184_v14 = vpop.f32.mrb[83].mxu1 }
 0x1f2   : > { %v2202_v30 = vmax.f32 %v988_v27, 0.0  ;;  %v2204_v55 = vmax.f32 %v1181_v8, 0.0  ;;  %v992_v54 = vadd.f32 %v991_v52, %v4168_v10  ;;  %v1185_v3 = vadd.f32 %v1184_v14, %v4175_v18 }
 0x1f3   : > { %v2738_v15 = vadd.f32 %v2737_v28, %v2201_v63  ;;  %v2812_v13 = vadd.f32 %v2811_v29, %v2203_v7  ;;  %v2217_v16 = vmax.f32 %v990_v49, 0.0  ;;  %v2219_v56 = vmax.f32 %v1183_v1, 0.0  ;;  %3493 = vmatmul.mubr.msk.bf16.gmra.mrb[188].mxu0 %vm427_vm1, %v3817_v48  ;;  %3510 = vmatmul.mubr.msk.bf16.gmra.mrb[188].mxu1 %vm427_vm1, %v3817_v48 }
 0x1f4   : > { %v2775_v59 = vadd.f32 %v2774_v22, %v2202_v30  ;;  %v2849_v19 = vadd.f32 %v2848_v51, %v2204_v55  ;;  %v2218_v25 = vmax.f32 %v992_v54, 0.0  ;;  %v2220_v21 = vmax.f32 %v1185_v3, 0.0  ;;  %1715 = vmatprep.mubr.bf16.mxu0 %v3611_v4  ;;  %1908 = vmatprep.mubr.bf16.mxu1 %v3611_v4 }
 0x1f5   : > { %v2739_v20 = vadd.f32 %v2738_v15, %v2217_v16  ;;  %v2813_v23 = vadd.f32 %v2812_v13, %v2219_v56 }
 0x1f6   : > { %v2776_v28 = vadd.f32 %v2775_v59, %v2218_v25  ;;  %v2850_v29 = vadd.f32 %v2849_v19, %v2220_v21  ;;  %v995_v50 = vpop.f32.mrb[84].mxu0  ;;  %v1188_v62 = vpop.f32.mrb[84].mxu1 }
 0x1f7   : > { %v996_v26 = vadd.f32 %v995_v50, %v4158_v53  ;;  %v1189_v12 = vadd.f32 %v1188_v62, %v4164_v17  ;;  %v997_v9 = vpop.f32.mrb[85].mxu0  ;;  %v1190_v27 = vpop.f32.mrb[85].mxu1 }
 0x1f8   : > { %v998_v22 = vadd.f32 %v997_v9, %v4168_v10  ;;  %v1191_v51 = vadd.f32 %v1190_v27, %v4175_v18  ;;  %v999_v8 = vpop.f32.mrb[86].mxu0  ;;  %v1192_v0 = vpop.f32.mrb[86].mxu1 }
 0x1f9   : > { %v2233_v33 = vmax.f32 %v996_v26, 0.0  ;;  %v2235_v63 = vmax.f32 %v1189_v12, 0.0  ;;  %v1000_v7 = vadd.f32 %v999_v8, %v4158_v53  ;;  %v1193_v49 = vadd.f32 %v1192_v0, %v4164_v17  ;;  %v1001_v1 = vpop.f32.mrb[87].mxu0  ;;  %v1194_v52 = vpop.f32.mrb[87].mxu1 }
 0x1fa   : > { %v2234_v14 = vmax.f32 %v998_v22, 0.0  ;;  %v2236_v30 = vmax.f32 %v1191_v51, 0.0  ;;  %v1002_v55 = vadd.f32 %v1001_v1, %v4168_v10  ;;  %v1195_v54 = vadd.f32 %v1194_v52, %v4175_v18 }
 0x1fb   : > { %v2740_v3 = vadd.f32 %v2739_v20, %v2233_v33  ;;  %v2814_v15 = vadd.f32 %v2813_v23, %v2235_v63  ;;  %v2249_v13 = vmax.f32 %v1000_v7, 0.0  ;;  %v2251_v16 = vmax.f32 %v1193_v49, 0.0  ;;  %3512 = vmatmul.mubr.msk.bf16.vlgmr.msra.gmra.mrb[192].mxu0 %vm427_vm1, %v3691_v31  ;;  %3529 = vmatmul.mubr.msk.bf16.vlgmr.msra.gmra.mrb[192].mxu1 %vm427_vm1, %v3691_v31 }
 0x1fc   : > { %v2777_v56 = vadd.f32 %v2776_v28, %v2234_v14  ;;  %v2851_v59 = vadd.f32 %v2850_v29, %v2236_v30  ;;  %v2250_v19 = vmax.f32 %v1002_v55, 0.0  ;;  %v2252_v25 = vmax.f32 %v1195_v54, 0.0  ;;  %1725 = vmatprep.mubr.bf16.mxu0 %v3611_v4  ;;  %1918 = vmatprep.mubr.bf16.mxu1 %v3611_v4 }
 0x1fd   : > { %v2741_v21 = vadd.f32 %v2740_v3, %v2249_v13  ;;  %v2815_v50 = vadd.f32 %v2814_v15, %v2251_v16 }
 0x1fe   : > { %v2778_v20 = vadd.f32 %v2777_v56, %v2250_v19  ;;  %v2852_v23 = vadd.f32 %v2851_v59, %v2252_v25  ;;  %v1005_v62 = vpop.f32.mrb[88].mxu0  ;;  %v1198_v26 = vpop.f32.mrb[88].mxu1 }
 0x1ff   : > { %v1006_v12 = vadd.f32 %v1005_v62, %v4158_v53  ;;  %v1199_v9 = vadd.f32 %v1198_v26, %v4164_v17  ;;  %v1007_v27 = vpop.f32.mrb[89].mxu0  ;;  %v1200_v31 = vpop.f32.mrb[89].mxu1 }
 0x200   : > { %v1008_v28 = vadd.f32 %v1007_v27, %v4168_v10  ;;  %v1201_v29 = vadd.f32 %v1200_v31, %v4175_v18  ;;  %v1009_v22 = vpop.f32.mrb[90].mxu0  ;;  %v1202_v51 = vpop.f32.mrb[90].mxu1 }
 0x201   : > { %v2265_v8 = vmax.f32 %v1006_v12, 0.0  ;;  %v2267_v0 = vmax.f32 %v1199_v9, 0.0  ;;  %v1010_v33 = vadd.f32 %v1009_v22, %v4158_v53  ;;  %v1203_v63 = vadd.f32 %v1202_v51, %v4164_v17  ;;  %v1011_v7 = vpop.f32.mrb[91].mxu0  ;;  %v1204_v49 = vpop.f32.mrb[91].mxu1 }
 0x202   : > { %v2266_v1 = vmax.f32 %v1008_v28, 0.0  ;;  %v2268_v52 = vmax.f32 %v1201_v29, 0.0  ;;  %v1012_v14 = vadd.f32 %v1011_v7, %v4168_v10  ;;  %v1205_v30 = vadd.f32 %v1204_v49, %v4175_v18 }
 0x203   : > { %v2742_v55 = vadd.f32 %v2741_v21, %v2265_v8  ;;  %v2816_v54 = vadd.f32 %v2815_v50, %v2267_v0  ;;  %v2281_v3 = vmax.f32 %v1010_v33, 0.0  ;;  %v2283_v15 = vmax.f32 %v1203_v63, 0.0  ;;  %3513 = vmatmul.mubr.msk.bf16.gmra.mrb[196].mxu0 %vm427_vm1, %v3705_v34  ;;  %3530 = vmatmul.mubr.msk.bf16.gmra.mrb[196].mxu1 %vm427_vm1, %v3705_v34 }
 0x204   : > { %v2779_v13 = vadd.f32 %v2778_v20, %v2266_v1  ;;  %v2853_v16 = vadd.f32 %v2852_v23, %v2268_v52  ;;  %v2282_v56 = vmax.f32 %v1012_v14, 0.0  ;;  %v2284_v59 = vmax.f32 %v1205_v30, 0.0  ;;  %1735 = vmatprep.mubr.bf16.mxu0 %v3611_v4  ;;  %1928 = vmatprep.mubr.bf16.mxu1 %v3611_v4 }
 0x205   : > { %v2743_v19 = vadd.f32 %v2742_v55, %v2281_v3  ;;  %v2817_v25 = vadd.f32 %v2816_v54, %v2283_v15 }
 0x206   : > { %v2780_v21 = vadd.f32 %v2779_v13, %v2282_v56  ;;  %v2854_v50 = vadd.f32 %v2853_v16, %v2284_v59  ;;  %v1015_v62 = vpop.f32.mrb[92].mxu0  ;;  %v1208_v26 = vpop.f32.mrb[92].mxu1 }
 0x207   : > { %v1016_v12 = vadd.f32 %v1015_v62, %v4158_v53  ;;  %v1209_v9 = vadd.f32 %v1208_v26, %v4164_v17  ;;  %v1017_v27 = vpop.f32.mrb[93].mxu0  ;;  %v1210_v34 = vpop.f32.mrb[93].mxu1 }
 0x208   : > { %v1018_v20 = vadd.f32 %v1017_v27, %v4168_v10  ;;  %v1211_v23 = vadd.f32 %v1210_v34, %v4175_v18  ;;  %v1019_v31 = vpop.f32.mrb[94].mxu0  ;;  %v1212_v28 = vpop.f32.mrb[94].mxu1 }
 0x209   : > { %v2297_v29 = vmax.f32 %v1016_v12, 0.0  ;;  %v2299_v22 = vmax.f32 %v1209_v9, 0.0  ;;  %v1020_v51 = vadd.f32 %v1019_v31, %v4158_v53  ;;  %v1213_v8 = vadd.f32 %v1212_v28, %v4164_v17  ;;  %v1021_v0 = vpop.f32.mrb[95].mxu0  ;;  %v1214_v33 = vpop.f32.mrb[95].mxu1 }
 0x20a   : > { %v2298_v63 = vmax.f32 %v1018_v20, 0.0  ;;  %v2300_v7 = vmax.f32 %v1211_v23, 0.0  ;;  %v1022_v49 = vadd.f32 %v1021_v0, %v4168_v10  ;;  %v1215_v1 = vadd.f32 %v1214_v33, %v4175_v18 }
 0x20b   : > { %v2744_v52 = vadd.f32 %v2743_v19, %v2297_v29  ;;  %v2818_v14 = vadd.f32 %v2817_v25, %v2299_v22  ;;  %v2313_v30 = vmax.f32 %v1020_v51, 0.0  ;;  %v2315_v55 = vmax.f32 %v1213_v8, 0.0  ;;  %3514 = vmatmul.mubr.msk.bf16.gmra.mrb[200].mxu0 %vm427_vm1, %v3713_v35  ;;  %3531 = vmatmul.mubr.msk.bf16.gmra.mrb[200].mxu1 %vm427_vm1, %v3713_v35 }
 0x20c   : > { %v2781_v54 = vadd.f32 %v2780_v21, %v2298_v63  ;;  %v2855_v3 = vadd.f32 %v2854_v50, %v2300_v7  ;;  %v2314_v15 = vmax.f32 %v1022_v49, 0.0  ;;  %v2316_v13 = vmax.f32 %v1215_v1, 0.0  ;;  %1745 = vmatprep.mubr.bf16.mxu0 %v3611_v4  ;;  %1938 = vmatprep.mubr.bf16.mxu1 %v3611_v4 }
 0x20d   : > { %v2745_v16 = vadd.f32 %v2744_v52, %v2313_v30  ;;  %v2819_v56 = vadd.f32 %v2818_v14, %v2315_v55 }
 0x20e   : > { %v2782_v59 = vadd.f32 %v2781_v54, %v2314_v15  ;;  %v2856_v19 = vadd.f32 %v2855_v3, %v2316_v13  ;;  %v1025_v25 = vpop.f32.mrb[96].mxu0  ;;  %v1218_v62 = vpop.f32.mrb[96].mxu1 }
 0x20f   : > { %v1026_v26 = vadd.f32 %v1025_v25, %v4158_v53  ;;  %v1219_v12 = vadd.f32 %v1218_v62, %v4164_v17  ;;  %v1027_v9 = vpop.f32.mrb[97].mxu0  ;;  %v1220_v35 = vpop.f32.mrb[97].mxu1 }
 0x210   : > { %v1028_v21 = vadd.f32 %v1027_v9, %v4168_v10  ;;  %v1221_v50 = vadd.f32 %v1220_v35, %v4175_v18  ;;  %v1029_v27 = vpop.f32.mrb[98].mxu0  ;;  %v1222_v34 = vpop.f32.mrb[98].mxu1 }
 0x211   : > { %v2329_v20 = vmax.f32 %v1026_v26, 0.0  ;;  %v2331_v23 = vmax.f32 %v1219_v12, 0.0  ;;  %v1030_v31 = vadd.f32 %v1029_v27, %v4158_v53  ;;  %v1223_v28 = vadd.f32 %v1222_v34, %v4164_v17  ;;  %v1031_v29 = vpop.f32.mrb[99].mxu0  ;;  %v1224_v22 = vpop.f32.mrb[99].mxu1 }
 0x212   : > { %v2330_v51 = vmax.f32 %v1028_v21, 0.0  ;;  %v2332_v8 = vmax.f32 %v1221_v50, 0.0  ;;  %v1032_v0 = vadd.f32 %v1031_v29, %v4168_v10  ;;  %v1225_v33 = vadd.f32 %v1224_v22, %v4175_v18 }
 0x213   : > { %v2746_v63 = vadd.f32 %v2745_v16, %v2329_v20  ;;  %v2820_v7 = vadd.f32 %v2819_v56, %v2331_v23  ;;  %v2345_v49 = vmax.f32 %v1030_v31, 0.0  ;;  %v2347_v1 = vmax.f32 %v1223_v28, 0.0  ;;  %3515 = vmatmul.mubr.msk.bf16.gmra.mrb[204].mxu0 %vm427_vm1, %v3721_v36  ;;  %3532 = vmatmul.mubr.msk.bf16.gmra.mrb[204].mxu1 %vm427_vm1, %v3721_v36 }
 0x214   : > { %v2783_v52 = vadd.f32 %v2782_v59, %v2330_v51  ;;  %v2857_v14 = vadd.f32 %v2856_v19, %v2332_v8  ;;  %v2346_v30 = vmax.f32 %v1032_v0, 0.0  ;;  %v2348_v55 = vmax.f32 %v1225_v33, 0.0  ;;  %1755 = vmatprep.mubr.bf16.mxu0 %v3611_v4  ;;  %1948 = vmatprep.mubr.bf16.mxu1 %v3611_v4 }
 0x215   : > { %v2747_v54 = vadd.f32 %v2746_v63, %v2345_v49  ;;  %v2821_v3 = vadd.f32 %v2820_v7, %v2347_v1 }
 0x216   : > { %v2784_v15 = vadd.f32 %v2783_v52, %v2346_v30  ;;  %v2858_v13 = vadd.f32 %v2857_v14, %v2348_v55  ;;  %v1035_v16 = vpop.f32.mrb[100].mxu0  ;;  %v1228_v56 = vpop.f32.mrb[100].mxu1 }
 0x217   : > { %v1036_v25 = vadd.f32 %v1035_v16, %v4158_v53  ;;  %v1229_v62 = vadd.f32 %v1228_v56, %v4164_v17  ;;  %v1037_v26 = vpop.f32.mrb[101].mxu0  ;;  %v1230_v36 = vpop.f32.mrb[101].mxu1 }
 0x218   : > { %v1038_v59 = vadd.f32 %v1037_v26, %v4168_v10  ;;  %v1231_v19 = vadd.f32 %v1230_v36, %v4175_v18  ;;  %v1039_v12 = vpop.f32.mrb[102].mxu0  ;;  %v1232_v9 = vpop.f32.mrb[102].mxu1 }
 0x219   : > { %v2361_v35 = vmax.f32 %v1036_v25, 0.0  ;;  %v2363_v21 = vmax.f32 %v1229_v62, 0.0  ;;  %v1040_v50 = vadd.f32 %v1039_v12, %v4158_v53  ;;  %v1233_v27 = vadd.f32 %v1232_v9, %v4164_v17  ;;  %v1041_v34 = vpop.f32.mrb[103].mxu0  ;;  %v1234_v20 = vpop.f32.mrb[103].mxu1 }
 0x21a   : > { %v2362_v23 = vmax.f32 %v1038_v59, 0.0  ;;  %v2364_v31 = vmax.f32 %v1231_v19, 0.0  ;;  %v1042_v28 = vadd.f32 %v1041_v34, %v4168_v10  ;;  %v1235_v29 = vadd.f32 %v1234_v20, %v4175_v18 }
 0x21b   : > { %v2748_v22 = vadd.f32 %v2747_v54, %v2361_v35  ;;  %v2822_v51 = vadd.f32 %v2821_v3, %v2363_v21  ;;  %v2377_v8 = vmax.f32 %v1040_v50, 0.0  ;;  %v2379_v0 = vmax.f32 %v1233_v27, 0.0  ;;  %3516 = vmatmul.mubr.msk.bf16.gmra.mrb[208].mxu0 %vm427_vm1, %v3729_v37  ;;  %3533 = vmatmul.mubr.msk.bf16.gmra.mrb[208].mxu1 %vm427_vm1, %v3729_v37 }
 0x21c   : > { %v2785_v33 = vadd.f32 %v2784_v15, %v2362_v23  ;;  %v2859_v63 = vadd.f32 %v2858_v13, %v2364_v31  ;;  %v2378_v7 = vmax.f32 %v1042_v28, 0.0  ;;  %v2380_v49 = vmax.f32 %v1235_v29, 0.0  ;;  %1765 = vmatprep.mubr.bf16.mxu0 %v3611_v4  ;;  %1958 = vmatprep.mubr.bf16.mxu1 %v3611_v4 }
 0x21d   : > { %v2749_v1 = vadd.f32 %v2748_v22, %v2377_v8  ;;  %v2823_v52 = vadd.f32 %v2822_v51, %v2379_v0 }
 0x21e   : > { %v2786_v14 = vadd.f32 %v2785_v33, %v2378_v7  ;;  %v2860_v30 = vadd.f32 %v2859_v63, %v2380_v49  ;;  %v1045_v55 = vpop.f32.mrb[104].mxu0  ;;  %v1238_v54 = vpop.f32.mrb[104].mxu1 }
 0x21f   : > { %v1046_v3 = vadd.f32 %v1045_v55, %v4158_v53  ;;  %v1239_v16 = vadd.f32 %v1238_v54, %v4164_v17  ;;  %v1047_v56 = vpop.f32.mrb[105].mxu0  ;;  %v1240_v37 = vpop.f32.mrb[105].mxu1 }
 0x220   : > { %v1048_v15 = vadd.f32 %v1047_v56, %v4168_v10  ;;  %v1241_v13 = vadd.f32 %v1240_v37, %v4175_v18  ;;  %v1049_v25 = vpop.f32.mrb[106].mxu0  ;;  %v1242_v62 = vpop.f32.mrb[106].mxu1 }
 0x221   : > { %v2393_v26 = vmax.f32 %v1046_v3, 0.0  ;;  %v2395_v36 = vmax.f32 %v1239_v16, 0.0  ;;  %v1050_v59 = vadd.f32 %v1049_v25, %v4158_v53  ;;  %v1243_v19 = vadd.f32 %v1242_v62, %v4164_v17  ;;  %v1051_v12 = vpop.f32.mrb[107].mxu0  ;;  %v1244_v9 = vpop.f32.mrb[107].mxu1 }
 0x222   : > { %v2394_v35 = vmax.f32 %v1048_v15, 0.0  ;;  %v2396_v21 = vmax.f32 %v1241_v13, 0.0  ;;  %v1052_v50 = vadd.f32 %v1051_v12, %v4168_v10  ;;  %v1245_v27 = vadd.f32 %v1244_v9, %v4175_v18 }
 0x223   : > { %v2750_v34 = vadd.f32 %v2749_v1, %v2393_v26  ;;  %v2824_v20 = vadd.f32 %v2823_v52, %v2395_v36  ;;  %v2409_v23 = vmax.f32 %v1050_v59, 0.0  ;;  %v2411_v31 = vmax.f32 %v1243_v19, 0.0  ;;  %3517 = vmatmul.mubr.msk.bf16.gmra.mrb[212].mxu0 %vm427_vm1, %v3737_v38  ;;  %3534 = vmatmul.mubr.msk.bf16.gmra.mrb[212].mxu1 %vm427_vm1, %v3737_v38 }
 0x224   : > { %v2787_v28 = vadd.f32 %v2786_v14, %v2394_v35  ;;  %v2861_v29 = vadd.f32 %v2860_v30, %v2396_v21  ;;  %v2410_v22 = vmax.f32 %v1052_v50, 0.0  ;;  %v2412_v51 = vmax.f32 %v1245_v27, 0.0  ;;  %1775 = vmatprep.mubr.bf16.mxu0 %v3611_v4  ;;  %1968 = vmatprep.mubr.bf16.mxu1 %v3611_v4 }
 0x225   : > { %v2751_v8 = vadd.f32 %v2750_v34, %v2409_v23  ;;  %v2825_v0 = vadd.f32 %v2824_v20, %v2411_v31 }
 0x226   : > { %v2788_v33 = vadd.f32 %v2787_v28, %v2410_v22  ;;  %v2862_v63 = vadd.f32 %v2861_v29, %v2412_v51  ;;  %v1055_v7 = vpop.f32.mrb[108].mxu0  ;;  %v1248_v49 = vpop.f32.mrb[108].mxu1 }
 0x227   : > { %v1056_v1 = vadd.f32 %v1055_v7, %v4158_v53  ;;  %v1249_v52 = vadd.f32 %v1248_v49, %v4164_v17  ;;  %v1057_v55 = vpop.f32.mrb[109].mxu0  ;;  %v1250_v38 = vpop.f32.mrb[109].mxu1 }
 0x228   : > { %v1058_v14 = vadd.f32 %v1057_v55, %v4168_v10  ;;  %v1251_v30 = vadd.f32 %v1250_v38, %v4175_v18  ;;  %v1059_v54 = vpop.f32.mrb[110].mxu0  ;;  %v1252_v3 = vpop.f32.mrb[110].mxu1 }
 0x229   : > { %v2425_v16 = vmax.f32 %v1056_v1, 0.0  ;;  %v2427_v56 = vmax.f32 %v1249_v52, 0.0  ;;  %v1060_v37 = vadd.f32 %v1059_v54, %v4158_v53  ;;  %v1253_v15 = vadd.f32 %v1252_v3, %v4164_v17  ;;  %v1061_v13 = vpop.f32.mrb[111].mxu0  ;;  %v1254_v25 = vpop.f32.mrb[111].mxu1 }
 0x22a   : > { %v2426_v62 = vmax.f32 %v1058_v14, 0.0  ;;  %v2428_v26 = vmax.f32 %v1251_v30, 0.0  ;;  %v1062_v36 = vadd.f32 %v1061_v13, %v4168_v10  ;;  %v1255_v59 = vadd.f32 %v1254_v25, %v4175_v18 }
 0x22b   : > { %v2752_v19 = vadd.f32 %v2751_v8, %v2425_v16  ;;  %v2826_v12 = vadd.f32 %v2825_v0, %v2427_v56  ;;  %v2441_v9 = vmax.f32 %v1060_v37, 0.0  ;;  %v2443_v35 = vmax.f32 %v1253_v15, 0.0  ;;  %3518 = vmatmul.mubr.msk.bf16.gmra.mrb[216].mxu0 %vm427_vm1, %v3745_v39  ;;  %3535 = vmatmul.mubr.msk.bf16.gmra.mrb[216].mxu1 %vm427_vm1, %v3745_v39 }
 0x22c   : > { %v2789_v21 = vadd.f32 %v2788_v33, %v2426_v62  ;;  %v2863_v50 = vadd.f32 %v2862_v63, %v2428_v26  ;;  %v2442_v27 = vmax.f32 %v1062_v36, 0.0  ;;  %v2444_v34 = vmax.f32 %v1255_v59, 0.0  ;;  %1785 = vmatprep.mubr.bf16.mxu0 %v3611_v4  ;;  %1978 = vmatprep.mubr.bf16.mxu1 %v3611_v4 }
 0x22d   : > { %v2753_v20 = vadd.f32 %v2752_v19, %v2441_v9  ;;  %v2827_v23 = vadd.f32 %v2826_v12, %v2443_v35 }
 0x22e   : > { %v2790_v31 = vadd.f32 %v2789_v21, %v2442_v27  ;;  %v2864_v28 = vadd.f32 %v2863_v50, %v2444_v34  ;;  %v1065_v29 = vpop.f32.mrb[112].mxu0  ;;  %v1258_v22 = vpop.f32.mrb[112].mxu1 }
 0x22f   : > { %v1066_v51 = vadd.f32 %v1065_v29, %v4158_v53  ;;  %v1259_v8 = vadd.f32 %v1258_v22, %v4164_v17  ;;  %v1067_v0 = vpop.f32.mrb[113].mxu0  ;;  %v1260_v39 = vpop.f32.mrb[113].mxu1 }
 0x230   : > { %v1068_v33 = vadd.f32 %v1067_v0, %v4168_v10  ;;  %v1261_v63 = vadd.f32 %v1260_v39, %v4175_v18  ;;  %v1069_v7 = vpop.f32.mrb[114].mxu0  ;;  %v1262_v49 = vpop.f32.mrb[114].mxu1 }
 0x231   : > { %v2457_v1 = vmax.f32 %v1066_v51, 0.0  ;;  %v2459_v52 = vmax.f32 %v1259_v8, 0.0  ;;  %v1070_v55 = vadd.f32 %v1069_v7, %v4158_v53  ;;  %v1263_v38 = vadd.f32 %v1262_v49, %v4164_v17  ;;  %v1071_v14 = vpop.f32.mrb[115].mxu0  ;;  %v1264_v30 = vpop.f32.mrb[115].mxu1 }
 0x232   : > { %v2458_v54 = vmax.f32 %v1068_v33, 0.0  ;;  %v2460_v3 = vmax.f32 %v1261_v63, 0.0  ;;  %v1072_v16 = vadd.f32 %v1071_v14, %v4168_v10  ;;  %v1265_v56 = vadd.f32 %v1264_v30, %v4175_v18 }
 0x233   : > { %v2754_v37 = vadd.f32 %v2753_v20, %v2457_v1  ;;  %v2828_v15 = vadd.f32 %v2827_v23, %v2459_v52  ;;  %v2473_v13 = vmax.f32 %v1070_v55, 0.0  ;;  %v2475_v25 = vmax.f32 %v1263_v38, 0.0  ;;  %3519 = vmatmul.mubr.msk.bf16.gmra.mrb[220].mxu0 %vm427_vm1, %v3753_v40  ;;  %3536 = vmatmul.mubr.msk.bf16.gmra.mrb[220].mxu1 %vm427_vm1, %v3753_v40 }
 0x234   : > { %v2791_v62 = vadd.f32 %v2790_v31, %v2458_v54  ;;  %v2865_v26 = vadd.f32 %v2864_v28, %v2460_v3  ;;  %v2474_v36 = vmax.f32 %v1072_v16, 0.0  ;;  %v2476_v59 = vmax.f32 %v1265_v56, 0.0  ;;  %1795 = vmatprep.mubr.bf16.mxu0 %v3611_v4  ;;  %1988 = vmatprep.mubr.bf16.mxu1 %v3611_v4 }
 0x235   : > { %v2755_v19 = vadd.f32 %v2754_v37, %v2473_v13  ;;  %v2829_v12 = vadd.f32 %v2828_v15, %v2475_v25 }
 0x236   : > { %v2792_v9 = vadd.f32 %v2791_v62, %v2474_v36  ;;  %v2866_v35 = vadd.f32 %v2865_v26, %v2476_v59  ;;  %v1075_v21 = vpop.f32.mrb[116].mxu0  ;;  %v1268_v50 = vpop.f32.mrb[116].mxu1 }
 0x237   : > { %v1076_v27 = vadd.f32 %v1075_v21, %v4158_v53  ;;  %v1269_v34 = vadd.f32 %v1268_v50, %v4164_v17  ;;  %v1077_v20 = vpop.f32.mrb[117].mxu0  ;;  %v1270_v40 = vpop.f32.mrb[117].mxu1 }
 0x238   : > { %v1078_v23 = vadd.f32 %v1077_v20, %v4168_v10  ;;  %v1271_v31 = vadd.f32 %v1270_v40, %v4175_v18  ;;  %v1079_v28 = vpop.f32.mrb[118].mxu0  ;;  %v1272_v29 = vpop.f32.mrb[118].mxu1 }
 0x239   : > { %v2489_v22 = vmax.f32 %v1076_v27, 0.0  ;;  %v2491_v51 = vmax.f32 %v1269_v34, 0.0  ;;  %v1080_v8 = vadd.f32 %v1079_v28, %v4158_v53  ;;  %v1273_v0 = vadd.f32 %v1272_v29, %v4164_v17  ;;  %v1081_v39 = vpop.f32.mrb[119].mxu0  ;;  %v1274_v33 = vpop.f32.mrb[119].mxu1 }
 0x23a   : > { %v2490_v63 = vmax.f32 %v1078_v23, 0.0  ;;  %v2492_v7 = vmax.f32 %v1271_v31, 0.0  ;;  %v1082_v49 = vadd.f32 %v1081_v39, %v4168_v10  ;;  %v1275_v1 = vadd.f32 %v1274_v33, %v4175_v18 }
 0x23b   : > { %v2756_v52 = vadd.f32 %v2755_v19, %v2489_v22  ;;  %v2830_v55 = vadd.f32 %v2829_v12, %v2491_v51  ;;  %v2505_v38 = vmax.f32 %v1080_v8, 0.0  ;;  %v2507_v14 = vmax.f32 %v1273_v0, 0.0  ;;  %3520 = vmatmul.mubr.msk.bf16.gmra.mrb[224].mxu0 %vm427_vm1, %v3761_v41  ;;  %3537 = vmatmul.mubr.msk.bf16.gmra.mrb[224].mxu1 %vm427_vm1, %v3761_v41 }
 0x23c   : > { %v2793_v30 = vadd.f32 %v2792_v9, %v2490_v63  ;;  %v2867_v54 = vadd.f32 %v2866_v35, %v2492_v7  ;;  %v2506_v3 = vmax.f32 %v1082_v49, 0.0  ;;  %v2508_v16 = vmax.f32 %v1275_v1, 0.0  ;;  %1805 = vmatprep.mubr.bf16.mxu0 %v3611_v4  ;;  %1998 = vmatprep.mubr.bf16.mxu1 %v3611_v4  ;;  %v3408_v49 = vld [vmem:[%s4800_s2 + $0x20] ss:$4 sm:$0xff] }
 0x23d   : > { %v2757_v56 = vadd.f32 %v2756_v52, %v2505_v38  ;;  %v2831_v37 = vadd.f32 %v2830_v55, %v2507_v14 }
 0x23e   : > { %v2794_v15 = vadd.f32 %v2793_v30, %v2506_v3  ;;  %v2868_v13 = vadd.f32 %v2867_v54, %v2508_v16  ;;  %v1085_v25 = vpop.f32.mrb[120].mxu0  ;;  %v1278_v62 = vpop.f32.mrb[120].mxu1 }
 0x23f   : > { %v1086_v26 = vadd.f32 %v1085_v25, %v4158_v53  ;;  %v1279_v36 = vadd.f32 %v1278_v62, %v4164_v17  ;;  %v1087_v59 = vpop.f32.mrb[121].mxu0  ;;  %v1280_v41 = vpop.f32.mrb[121].mxu1 }
 0x240   : > { %v1088_v19 = vadd.f32 %v1087_v59, %v4168_v10  ;;  %v1281_v12 = vadd.f32 %v1280_v41, %v4175_v18  ;;  %v1089_v9 = vpop.f32.mrb[122].mxu0  ;;  %v1282_v35 = vpop.f32.mrb[122].mxu1 }
 0x241   : > { %v2521_v21 = vmax.f32 %v1086_v26, 0.0  ;;  %v2523_v50 = vmax.f32 %v1279_v36, 0.0  ;;  %v1090_v27 = vadd.f32 %v1089_v9, %v4158_v53  ;;  %v1283_v34 = vadd.f32 %v1282_v35, %v4164_v17  ;;  %v1091_v20 = vpop.f32.mrb[123].mxu0  ;;  %v1284_v40 = vpop.f32.mrb[123].mxu1 }
 0x242   : > { %v2522_v23 = vmax.f32 %v1088_v19, 0.0  ;;  %v2524_v31 = vmax.f32 %v1281_v12, 0.0  ;;  %v1092_v28 = vadd.f32 %v1091_v20, %v4168_v10  ;;  %v1285_v29 = vadd.f32 %v1284_v40, %v4175_v18 }
 0x243   : > { %v2758_v22 = vadd.f32 %v2757_v56, %v2521_v21  ;;  %v2832_v51 = vadd.f32 %v2831_v37, %v2523_v50  ;;  %v2537_v8 = vmax.f32 %v1090_v27, 0.0  ;;  %v2539_v0 = vmax.f32 %v1283_v34, 0.0  ;;  %3521 = vmatmul.mubr.msk.bf16.gmra.mrb[228].mxu0 %vm427_vm1, %v3769_v42  ;;  %3538 = vmatmul.mubr.msk.bf16.gmra.mrb[228].mxu1 %vm427_vm1, %v3769_v42 }
 0x244   : > { %v2795_v39 = vadd.f32 %v2794_v15, %v2522_v23  ;;  %v2869_v33 = vadd.f32 %v2868_v13, %v2524_v31  ;;  %v2538_v63 = vmax.f32 %v1092_v28, 0.0  ;;  %v2540_v7 = vmax.f32 %v1285_v29, 0.0  ;;  %1815 = vmatprep.mubr.bf16.mxu0 %v3611_v4  ;;  %2008 = vmatprep.mubr.bf16.mxu1 %v3611_v4 }
 0x245   : > { %v2759_v1 = vadd.f32 %v2758_v22, %v2537_v8  ;;  %v2833_v52 = vadd.f32 %v2832_v51, %v2539_v0  ;;  %v4415_v56 = vrot.slane %v3408_v49, %v245_v57  ;;  %v4419_v37 = vrot.slane %v3408_v49, %v253_v58 }
 0x246   : > { %v2796_v55 = vadd.f32 %v2795_v39, %v2538_v63  ;;  %v2870_v38 = vadd.f32 %v2869_v33, %v2540_v7  ;;  %v1095_v14 = vpop.f32.mrb[124].mxu0  ;;  %v1288_v30 = vpop.f32.mrb[124].mxu1  ;;  %v4425_v26 = vrot.slane %v3408_v49, %v249_v60  ;;  %v4429_v36 = vrot.slane %v3408_v49, %v257_v61 }
 0x247   : > { %v1096_v42 = vadd.f32 %v1095_v14, %v4158_v53  ;;  %v1289_v54 = vadd.f32 %v1288_v30, %v4164_v17  ;;  %v1097_v3 = vpop.f32.mrb[125].mxu0  ;;  %v1290_v16 = vpop.f32.mrb[125].mxu1  ;;  %v4445_v23 = vrot.slane %v3223_v32, %v4188_v2 }
 0x248   : > { %v1098_v15 = vadd.f32 %v1097_v3, %v4168_v10  ;;  %v1291_v13 = vadd.f32 %v1290_v16, %v4175_v18  ;;  %v1099_v25 = vpop.f32.mrb[126].mxu0  ;;  %v1292_v62 = vpop.f32.mrb[126].mxu1 }
 0x249   : > { %v2553_v57 = vmax.f32 %v1096_v42, 0.0  ;;  %v2555_v59 = vmax.f32 %v1289_v54, 0.0  ;;  %v1100_v41 = vadd.f32 %v1099_v25, %v4158_v53  ;;  %v1293_v58 = vadd.f32 %v1292_v62, %v4164_v17  ;;  %v1101_v19 = vpop.f32.mrb[127].mxu0  ;;  %v1294_v12 = vpop.f32.mrb[127].mxu1 }
 0x24a   : > { %v2554_v9 = vmax.f32 %v1098_v15, 0.0  ;;  %v2556_v35 = vmax.f32 %v1291_v13, 0.0  ;;  %v1102_v21 = vadd.f32 %v1101_v19, %v4168_v10  ;;  %v1295_v50 = vadd.f32 %v1294_v12, %v4175_v18 }
 0x24b   : > { %v2760_v60 = vadd.f32 %v2759_v1, %v2553_v57  ;;  %v2834_v27 = vadd.f32 %v2833_v52, %v2555_v59  ;;  %v2569_v34 = vmax.f32 %v1100_v41, 0.0  ;;  %v2571_v20 = vmax.f32 %v1293_v58, 0.0  ;;  %3522 = vmatmul.mubr.msk.bf16.gmra.mrb[232].mxu0 %vm427_vm1, %v3777_v43  ;;  %3539 = vmatmul.mubr.msk.bf16.gmra.mrb[232].mxu1 %vm427_vm1, %v3777_v43 }
 0x24c   : > { %v2797_v61 = vadd.f32 %v2796_v55, %v2554_v9  ;;  %v2871_v53 = vadd.f32 %v2870_v38, %v2556_v35  ;;  %v2570_v17 = vmax.f32 %v1102_v21, 0.0  ;;  %v2572_v40 = vmax.f32 %v1295_v50, 0.0  ;;  %1825 = vmatprep.mubr.bf16.mxu0 %v3611_v4  ;;  %2018 = vmatprep.mubr.bf16.mxu1 %v3611_v4 }
 0x24d   : > { %v2761_v10 = vadd.f32 %v2760_v60, %v2569_v34  ;;  %v2835_v18 = vadd.f32 %v2834_v27, %v2571_v20 }
 0x24e   : > { %v2798_v31 = vadd.f32 %v2797_v61, %v2570_v17  ;;  %v2872_v28 = vadd.f32 %v2871_v53, %v2572_v40  ;;  %v1331_v29 = vpop.f32.mrb[128].mxu0  ;;  %v1524_v43 = vpop.f32.mrb[128].mxu1 }
 0x24f   : > { %v2762_v22 = vrot.slane %v2761_v10, 4  ;;  %v2836_v51 = vrot.slane %v2835_v18, 4  ;;  %v1332_v8 = vadd.f32 %v1331_v29, %v4415_v56  ;;  %v1525_v0 = vadd.f32 %v1524_v43, %v4419_v37  ;;  %v1333_v39 = vpop.f32.mrb[129].mxu0  ;;  %v1526_v33 = vpop.f32.mrb[129].mxu1 }
 0x250   : > { %v2799_v63 = vrot.slane %v2798_v31, 4  ;;  %v2873_v7 = vrot.slane %v2872_v28, 4  ;;  %v1334_v49 = vadd.f32 %v1333_v39, %v4425_v26  ;;  %v1527_v11 = vadd.f32 %v1526_v33, %v4429_v36  ;;  %v1335_v24 = vpop.f32.mrb[130].mxu0  ;;  %v1528_v32 = vpop.f32.mrb[130].mxu1 }
 0x251   : > { %v2763_v1 = vadd.f32 %v2762_v22, %v2761_v10  ;;  %v2837_v52 = vadd.f32 %v2836_v51, %v2835_v18  ;;  %v2077_v55 = vmax.f32 %v1332_v8, 0.0  ;;  %v2079_v38 = vmax.f32 %v1525_v0, 0.0  ;;  %v1337_v14 = vpop.f32.mrb[131].mxu0  ;;  %v1530_v30 = vpop.f32.mrb[131].mxu1 }
 0x252   : > { %v2800_v42 = vadd.f32 %v2799_v63, %v2798_v31  ;;  %v2874_v54 = vadd.f32 %v2873_v7, %v2872_v28  ;;  %v2078_v3 = vmax.f32 %v1334_v49, 0.0  ;;  %v2080_v16 = vmax.f32 %v1527_v11, 0.0 }
 0x253   : > { %v2764_v15 = vrot.slane %v2763_v1, 2  ;;  %v2838_v13 = vrot.slane %v2837_v52, 2  ;;  %v1336_v25 = vadd.f32 %v1335_v24, %v4415_v56  ;;  %v1529_v62 = vadd.f32 %v1528_v32, %v4419_v37  ;;  %3523 = vmatmul.mubr.msk.bf16.gmra.mrb[236].mxu0 %vm427_vm1, %v3785_v44  ;;  %3540 = vmatmul.mubr.msk.bf16.gmra.mrb[236].mxu1 %vm427_vm1, %v3785_v44 }
 0x254   : > { %v2801_v57 = vrot.slane %v2800_v42, 2  ;;  %v2875_v59 = vrot.slane %v2874_v54, 2  ;;  %v1338_v41 = vadd.f32 %v1337_v14, %v4425_v26  ;;  %v1531_v58 = vadd.f32 %v1530_v30, %v4429_v36  ;;  %1835 = vmatprep.mubr.bf16.mxu0 %v3611_v4  ;;  %2028 = vmatprep.mubr.bf16.mxu1 %v3611_v4 }
 0x255   : > { %v2765_v19 = vadd.f32 %v2764_v15, %v2763_v1  ;;  %v2839_v12 = vadd.f32 %v2838_v13, %v2837_v52  ;;  %v2093_v9 = vmax.f32 %v1336_v25, 0.0  ;;  %v2095_v35 = vmax.f32 %v1529_v62, 0.0 }
 0x256   : > { %v2802_v21 = vadd.f32 %v2801_v57, %v2800_v42  ;;  %v2876_v50 = vadd.f32 %v2875_v59, %v2874_v54  ;;  %v2094_v60 = vmax.f32 %v1338_v41, 0.0  ;;  %v2096_v27 = vmax.f32 %v1531_v58, 0.0  ;;  %v1341_v34 = vpop.f32.mrb[132].mxu0  ;;  %v1534_v44 = vpop.f32.mrb[132].mxu1 }
 0x257   : > { %v2766_v20 = vrot.slane %v2765_v19, 1  ;;  %v2840_v61 = vrot.slane %v2839_v12, 1  ;;  %v2879_v53 = vadd.f32 %v2093_v9, %v2077_v55  ;;  %v2953_v17 = vadd.f32 %v2095_v35, %v2079_v38  ;;  %v1343_v40 = vpop.f32.mrb[133].mxu0  ;;  %v1536_v10 = vpop.f32.mrb[133].mxu1 }
 0x258   : > { %v2803_v18 = vrot.slane %v2802_v21, 1  ;;  %v2877_v31 = vrot.slane %v2876_v50, 1  ;;  %v2916_v28 = vadd.f32 %v2094_v60, %v2078_v3  ;;  %v2990_v29 = vadd.f32 %v2096_v27, %v2080_v16  ;;  %v1345_v43 = vpop.f32.mrb[134].mxu0  ;;  %v1538_v22 = vpop.f32.mrb[134].mxu1 }
 0x259   : > { %v2767_v51 = vadd.f32 %v2766_v20, %v2765_v19  ;;  %v2841_v8 = vadd.f32 %v2840_v61, %v2839_v12  ;;  %v1342_v0 = vadd.f32 %v1341_v34, %v4415_v56  ;;  %v1535_v39 = vadd.f32 %v1534_v44, %v4419_v37  ;;  %v1347_v33 = vpop.f32.mrb[135].mxu0  ;;  %v1540_v63 = vpop.f32.mrb[135].mxu1 }
 0x25a   : > { %v2804_v7 = vadd.f32 %v2803_v18, %v2802_v21  ;;  %v2878_v49 = vadd.f32 %v2877_v31, %v2876_v50  ;;  %v1344_v11 = vadd.f32 %v1343_v40, %v4425_v26  ;;  %v1537_v24 = vadd.f32 %v1536_v10, %v4429_v36 }
 0x25b   : > { %v2109_v32 = vmax.f32 %v1342_v0, 0.0  ;;  %v2111_v1 = vmax.f32 %v1535_v39, 0.0  ;;  %v1346_v52 = vadd.f32 %v1345_v43, %v4415_v56  ;;  %v1539_v55 = vadd.f32 %v1538_v22, %v4419_v37  ;;  %3524 = vmatmul.mubr.msk.bf16.gmra.mrb[240].mxu0 %vm427_vm1, %v3793_v45  ;;  %3541 = vmatmul.mubr.msk.bf16.gmra.mrb[240].mxu1 %vm427_vm1, %v3793_v45  ;;  %v3545_v43 = vld [vmem:[%s4800_s2 + $0x1] ss:$4 sm:$0xff] }
 0x25c   : > { %v3193_v38 = vcombine.low %v2767_v51, %v2804_v7  ;;  %v3194_v14 = vcombine.low %v2841_v8, %v2878_v49  ;;  %v2110_v30 = vmax.f32 %v1344_v11, 0.0  ;;  %v2112_v42 = vmax.f32 %v1537_v24, 0.0  ;;  %1845 = vmatprep.mubr.bf16.mxu0 %v3611_v4  ;;  %2038 = vmatprep.mubr.bf16.mxu1 %v3611_v4  ;;  %v3547_v49 = vld [vmem:[%s4800_s2 + $0x2] ss:$4 sm:$0xff] }
 0x25d   : > { %v2880_v54 = vadd.f32 %v2879_v53, %v2109_v32  ;;  %v2954_v3 = vadd.f32 %v2953_v17, %v2111_v1  ;;  %v2125_v16 = vmax.f32 %v1346_v52, 0.0  ;;  %v2127_v15 = vmax.f32 %v1539_v55, 0.0 }
 0x25e   : > { %v3215_v13 = vrot.slane %v3193_v38, %v4188_v2  ;;  %v3222_v25 = vrot.slane %v3194_v14, %v4188_v2  ;;  %v2917_v62 = vadd.f32 %v2916_v28, %v2110_v30  ;;  %v2991_v57 = vadd.f32 %v2990_v29, %v2112_v42  ;;  %v1351_v59 = vpop.f32.mrb[136].mxu0  ;;  %v1544_v45 = vpop.f32.mrb[136].mxu1 }
 0x25f   : > { %v2881_v41 = vadd.f32 %v2880_v54, %v2125_v16  ;;  %v2955_v58 = vadd.f32 %v2954_v3, %v2127_v15  ;;  %v1348_v19 = vadd.f32 %v1347_v33, %v4425_v26  ;;  %v1541_v12 = vadd.f32 %v1540_v63, %v4429_v36  ;;  %v1353_v9 = vpop.f32.mrb[137].mxu0  ;;  %v1546_v35 = vpop.f32.mrb[137].mxu1 }
 0x260   : > { %v3224_v21 = vcombine.low %v3215_v13, %v3222_v25  ;;  %v1352_v50 = vadd.f32 %v1351_v59, %v4415_v56  ;;  %v1545_v60 = vadd.f32 %v1544_v45, %v4419_v37  ;;  %v1354_v27 = vadd.f32 %v1353_v9, %v4425_v26  ;;  %v1355_v34 = vpop.f32.mrb[138].mxu0  ;;  %v1548_v44 = vpop.f32.mrb[138].mxu1 }
 0x261   : > { %v2126_v20 = vmax.f32 %v1348_v19, 0.0  ;;  %v2128_v61 = vmax.f32 %v1541_v12, 0.0  ;;  %v1547_v53 = vadd.f32 %v1546_v35, %v4429_v36  ;;  %v1356_v17 = vadd.f32 %v1355_v34, %v4415_v56  ;;  %v1357_v40 = vpop.f32.mrb[139].mxu0  ;;  %v1550_v10 = vpop.f32.mrb[139].mxu1 }
 0x262   : > { %v3238_v18 = vrot.slane %v3224_v21, %v4188_v2  ;;  %v2141_v31 = vmax.f32 %v1352_v50, 0.0  ;;  %v2143_v28 = vmax.f32 %v1545_v60, 0.0  ;;  %v2142_v29 = vmax.f32 %v1354_v27, 0.0 }
 0x263   : > { %v2918_v22 = vadd.f32 %v2917_v62, %v2126_v20  ;;  %v2992_v51 = vadd.f32 %v2991_v57, %v2128_v61  ;;  %v2144_v8 = vmax.f32 %v1547_v53, 0.0  ;;  %v2157_v0 = vmax.f32 %v1356_v17, 0.0  ;;  %3525 = vmatmul.mubr.msk.bf16.gmra.mrb[244].mxu0 %vm427_vm1, %v3801_v46  ;;  %3542 = vmatmul.mubr.msk.bf16.gmra.mrb[244].mxu1 %vm427_vm1, %v3801_v46 }
 0x264   : > { %v3239_v39 = vcombine.low %v4445_v23, %v3238_v18  ;;  %v2882_v33 = vadd.f32 %v2881_v41, %v2141_v31  ;;  %v2956_v63 = vadd.f32 %v2955_v58, %v2143_v28  ;;  %v1549_v7 = vadd.f32 %v1548_v44, %v4419_v37  ;;  %1855 = vmatprep.mubr.bf16.mxu0 %v3611_v4 }
 0x265   : > { %v2919_v11 = vadd.f32 %v2918_v22, %v2142_v29  ;;  %v2993_v24 = vadd.f32 %v2992_v51, %v2144_v8  ;;  %v1358_v32 = vadd.f32 %v1357_v40, %v4425_v26  ;;  %v1551_v1 = vadd.f32 %v1550_v10, %v4429_v36  ;;  %2048 = vmatprep.mubr.bf16.mxu1 %v3611_v4 }
 0x266   : > { %v3304_v46 = vmul.f32 %v3545_v43, %v3239_v39  ;;  %v2883_v23 = vadd.f32 %v2882_v33, %v2157_v0  ;;  %v2159_v52 = vmax.f32 %v1549_v7, 0.0  ;;  %v1361_v55 = vpop.f32.mrb[140].mxu0  ;;  %v1554_v38 = vpop.f32.mrb[140].mxu1 }
 0x267   : > { %v2158_v14 = vmax.f32 %v1358_v32, 0.0  ;;  %v2160_v30 = vmax.f32 %v1551_v1, 0.0  ;;  %v1362_v42 = vadd.f32 %v1361_v55, %v4415_v56  ;;  %v1555_v54 = vadd.f32 %v1554_v38, %v4419_v37  ;;  %v1363_v3 = vpop.f32.mrb[141].mxu0  ;;  %v1556_v16 = vpop.f32.mrb[141].mxu1 }
 0x268   : > { %v3310_v15 = vadd.f32 %v3547_v49, %v3304_v46  ;;  %v2957_v13 = vadd.f32 %v2956_v63, %v2159_v52  ;;  %v1364_v25 = vadd.f32 %v1363_v3, %v4425_v26  ;;  %v1557_v62 = vadd.f32 %v1556_v16, %v4429_v36  ;;  %v1365_v57 = vpop.f32.mrb[142].mxu0  ;;  %v1558_v59 = vpop.f32.mrb[142].mxu1 }
 0x269   : > { %v2920_v45 = vadd.f32 %v2919_v11, %v2158_v14  ;;  %v2994_v41 = vadd.f32 %v2993_v24, %v2160_v30  ;;  %v2173_v58 = vmax.f32 %v1362_v42, 0.0  ;;  %v2175_v19 = vmax.f32 %v1555_v54, 0.0  ;;  %v1367_v12 = vpop.f32.mrb[143].mxu0  ;;  %v1560_v9 = vpop.f32.mrb[143].mxu1 }
 0x26a   : > { %3312 = vst [vmem:[%s4503_s17] sm:$0xff] %v3310_v15  ;;  %v2174_v35 = vmax.f32 %v1364_v25, 0.0  ;;  %v2176_v21 = vmax.f32 %v1557_v62, 0.0  ;;  %v1366_v50 = vadd.f32 %v1365_v57, %v4415_v56  ;;  %v1559_v60 = vadd.f32 %v1558_v59, %v4419_v37 }
 0x26b   : > { %v2884_v27 = vadd.f32 %v2883_v23, %v2173_v58  ;;  %v2958_v34 = vadd.f32 %v2957_v13, %v2175_v19  ;;  %v1368_v44 = vadd.f32 %v1367_v12, %v4425_v26  ;;  %v1561_v20 = vadd.f32 %v1560_v9, %v4429_v36  ;;  %3526 = vmatmul.mubr.msk.bf16.gmra.mrb[248].mxu0 %vm427_vm1, %v3809_v47 }
 0x26c   : > { %v2921_v61 = vadd.f32 %v2920_v45, %v2174_v35  ;;  %v2995_v53 = vadd.f32 %v2994_v41, %v2176_v21  ;;  %v2189_v17 = vmax.f32 %v1366_v50, 0.0  ;;  %v2191_v40 = vmax.f32 %v1559_v60, 0.0  ;;  %3543 = vmatmul.mubr.msk.bf16.gmra.mrb[248].mxu1 %vm427_vm1, %v3809_v47  ;;  %1865 = vmatprep.mubr.bf16.mxu0 %v3611_v4 }
 0x26d   : > { %v2190_v10 = vmax.f32 %v1368_v44, 0.0  ;;  %v2192_v18 = vmax.f32 %v1561_v20, 0.0  ;;  %2058 = vmatprep.mubr.bf16.mxu1 %v3611_v4 }
 0x26e   : > { %v2885_v31 = vadd.f32 %v2884_v27, %v2189_v17  ;;  %v2959_v28 = vadd.f32 %v2958_v34, %v2191_v40  ;;  %v1371_v29 = vpop.f32.mrb[144].mxu0  ;;  %v1564_v43 = vpop.f32.mrb[144].mxu1 }
 0x26f   : > { %v2922_v22 = vadd.f32 %v2921_v61, %v2190_v10  ;;  %v2996_v51 = vadd.f32 %v2995_v53, %v2192_v18  ;;  %v1372_v8 = vadd.f32 %v1371_v29, %v4415_v56  ;;  %v1565_v0 = vadd.f32 %v1564_v43, %v4419_v37  ;;  %v1373_v39 = vpop.f32.mrb[145].mxu0  ;;  %v1566_v33 = vpop.f32.mrb[145].mxu1 }
 0x270   : > { %v1374_v47 = vadd.f32 %v1373_v39, %v4425_v26  ;;  %v1567_v63 = vadd.f32 %v1566_v33, %v4429_v36  ;;  %v1375_v7 = vpop.f32.mrb[146].mxu0  ;;  %v1568_v49 = vpop.f32.mrb[146].mxu1 }
 0x271   : > { %v2205_v11 = vmax.f32 %v1372_v8, 0.0  ;;  %v2207_v4 = vmax.f32 %v1565_v0, 0.0  ;;  %v1376_v24 = vadd.f32 %v1375_v7, %v4415_v56  ;;  %v1569_v32 = vadd.f32 %v1568_v49, %v4419_v37  ;;  %v1377_v1 = vpop.f32.mrb[147].mxu0  ;;  %v1570_v46 = vpop.f32.mrb[147].mxu1 }
 0x272   : > { %v2206_v23 = vmax.f32 %v1374_v47, 0.0  ;;  %v2208_v52 = vmax.f32 %v1567_v63, 0.0  ;;  %v1378_v55 = vadd.f32 %v1377_v1, %v4425_v26  ;;  %v1571_v38 = vadd.f32 %v1570_v46, %v4429_v36 }
 0x273   : > { %v2886_v14 = vadd.f32 %v2885_v31, %v2205_v11  ;;  %v2960_v30 = vadd.f32 %v2959_v28, %v2207_v4  ;;  %v2221_v42 = vmax.f32 %v1376_v24, 0.0  ;;  %v2223_v54 = vmax.f32 %v1569_v32, 0.0  ;;  %3527 = vmatmul.mubr.msk.bf16.gmra.mrb[252].mxu0 %vm427_vm1, %v3817_v48 }
 0x274   : > { %v2923_v3 = vadd.f32 %v2922_v22, %v2206_v23  ;;  %v2997_v16 = vadd.f32 %v2996_v51, %v2208_v52  ;;  %v2222_v15 = vmax.f32 %v1378_v55, 0.0  ;;  %v2224_v13 = vmax.f32 %v1571_v38, 0.0  ;;  %3544 = vmatmul.mubr.msk.bf16.gmra.mrb[252].mxu1 %vm427_vm1, %v3817_v48 }
 0x275   : > { %v2887_v25 = vadd.f32 %v2886_v14, %v2221_v42  ;;  %v2961_v62 = vadd.f32 %v2960_v30, %v2223_v54 }
 0x276   : > { %v2924_v57 = vadd.f32 %v2923_v3, %v2222_v15  ;;  %v2998_v59 = vadd.f32 %v2997_v16, %v2224_v13  ;;  %v1381_v45 = vpop.f32.mrb[148].mxu0  ;;  %v1574_v41 = vpop.f32.mrb[148].mxu1 }
 0x277   : > { %v1382_v58 = vadd.f32 %v1381_v45, %v4415_v56  ;;  %v1575_v19 = vadd.f32 %v1574_v41, %v4419_v37  ;;  %v1383_v12 = vpop.f32.mrb[149].mxu0  ;;  %v1576_v9 = vpop.f32.mrb[149].mxu1 }
 0x278   : > { %v1384_v35 = vadd.f32 %v1383_v12, %v4425_v26  ;;  %v1577_v21 = vadd.f32 %v1576_v9, %v4429_v36  ;;  %v1385_v50 = vpop.f32.mrb[150].mxu0  ;;  %v1578_v60 = vpop.f32.mrb[150].mxu1 }
 0x279   : > { %v2237_v27 = vmax.f32 %v1382_v58, 0.0  ;;  %v2239_v48 = vmax.f32 %v1575_v19, 0.0  ;;  %v1386_v34 = vadd.f32 %v1385_v50, %v4415_v56  ;;  %v1579_v44 = vadd.f32 %v1578_v60, %v4419_v37  ;;  %v1387_v20 = vpop.f32.mrb[151].mxu0  ;;  %v1580_v61 = vpop.f32.mrb[151].mxu1 }
 0x27a   : > { %v2238_v53 = vmax.f32 %v1384_v35, 0.0  ;;  %v2240_v17 = vmax.f32 %v1577_v21, 0.0  ;;  %v1388_v40 = vadd.f32 %v1387_v20, %v4425_v26  ;;  %v1581_v10 = vadd.f32 %v1580_v61, %v4429_v36 }
 0x27b   : > { %v2888_v18 = vadd.f32 %v2887_v25, %v2237_v27  ;;  %v2962_v31 = vadd.f32 %v2961_v62, %v2239_v48  ;;  %v2253_v28 = vmax.f32 %v1386_v34, 0.0  ;;  %v2255_v29 = vmax.f32 %v1579_v44, 0.0 }
 0x27c   : > { %v2925_v43 = vadd.f32 %v2924_v57, %v2238_v53  ;;  %v2999_v22 = vadd.f32 %v2998_v59, %v2240_v17  ;;  %v2254_v51 = vmax.f32 %v1388_v40, 0.0  ;;  %v2256_v8 = vmax.f32 %v1581_v10, 0.0 }
 0x27d   : > { %v2889_v0 = vadd.f32 %v2888_v18, %v2253_v28  ;;  %v2963_v39 = vadd.f32 %v2962_v31, %v2255_v29 }
 0x27e   : > { %v2926_v33 = vadd.f32 %v2925_v43, %v2254_v51  ;;  %v3000_v47 = vadd.f32 %v2999_v22, %v2256_v8  ;;  %v1391_v63 = vpop.f32.mrb[152].mxu0  ;;  %v1584_v7 = vpop.f32.mrb[152].mxu1 }
 0x27f   : > { %v1392_v49 = vadd.f32 %v1391_v63, %v4415_v56  ;;  %v1585_v11 = vadd.f32 %v1584_v7, %v4419_v37  ;;  %v1393_v4 = vpop.f32.mrb[153].mxu0  ;;  %v1586_v24 = vpop.f32.mrb[153].mxu1 }
 0x280   : > { %v1394_v32 = vadd.f32 %v1393_v4, %v4425_v26  ;;  %v1587_v1 = vadd.f32 %v1586_v24, %v4429_v36  ;;  %v1395_v46 = vpop.f32.mrb[154].mxu0  ;;  %v1588_v23 = vpop.f32.mrb[154].mxu1 }
 0x281   : > { %v2269_v52 = vmax.f32 %v1392_v49, 0.0  ;;  %v2271_v55 = vmax.f32 %v1585_v11, 0.0  ;;  %v1396_v38 = vadd.f32 %v1395_v46, %v4415_v56  ;;  %v1589_v14 = vadd.f32 %v1588_v23, %v4419_v37  ;;  %v1397_v30 = vpop.f32.mrb[155].mxu0  ;;  %v1590_v42 = vpop.f32.mrb[155].mxu1 }
 0x282   : > { %v2270_v54 = vmax.f32 %v1394_v32, 0.0  ;;  %v2272_v3 = vmax.f32 %v1587_v1, 0.0  ;;  %v1398_v16 = vadd.f32 %v1397_v30, %v4425_v26  ;;  %v1591_v15 = vadd.f32 %v1590_v42, %v4429_v36 }
 0x283   : > { %v2890_v13 = vadd.f32 %v2889_v0, %v2269_v52  ;;  %v2964_v25 = vadd.f32 %v2963_v39, %v2271_v55  ;;  %v2285_v62 = vmax.f32 %v1396_v38, 0.0  ;;  %v2287_v57 = vmax.f32 %v1589_v14, 0.0 }
 0x284   : > { %v2927_v59 = vadd.f32 %v2926_v33, %v2270_v54  ;;  %v3001_v45 = vadd.f32 %v3000_v47, %v2272_v3  ;;  %v2286_v41 = vmax.f32 %v1398_v16, 0.0  ;;  %v2288_v58 = vmax.f32 %v1591_v15, 0.0 }
 0x285   : > { %v2891_v19 = vadd.f32 %v2890_v13, %v2285_v62  ;;  %v2965_v12 = vadd.f32 %v2964_v25, %v2287_v57 }
 0x286   : > { %v2928_v9 = vadd.f32 %v2927_v59, %v2286_v41  ;;  %v3002_v35 = vadd.f32 %v3001_v45, %v2288_v58  ;;  %v1401_v21 = vpop.f32.mrb[156].mxu0  ;;  %v1594_v50 = vpop.f32.mrb[156].mxu1 }
 0x287   : > { %v1402_v60 = vadd.f32 %v1401_v21, %v4415_v56  ;;  %v1595_v27 = vadd.f32 %v1594_v50, %v4419_v37  ;;  %v1403_v48 = vpop.f32.mrb[157].mxu0  ;;  %v1596_v34 = vpop.f32.mrb[157].mxu1 }
 0x288   : > { %v1404_v44 = vadd.f32 %v1403_v48, %v4425_v26  ;;  %v1597_v20 = vadd.f32 %v1596_v34, %v4429_v36  ;;  %v1405_v61 = vpop.f32.mrb[158].mxu0  ;;  %v1598_v53 = vpop.f32.mrb[158].mxu1 }
 0x289   : > { %v2301_v17 = vmax.f32 %v1402_v60, 0.0  ;;  %v2303_v40 = vmax.f32 %v1595_v27, 0.0  ;;  %v1406_v10 = vadd.f32 %v1405_v61, %v4415_v56  ;;  %v1599_v18 = vadd.f32 %v1598_v53, %v4419_v37  ;;  %v1407_v31 = vpop.f32.mrb[159].mxu0  ;;  %v1600_v28 = vpop.f32.mrb[159].mxu1 }
 0x28a   : > { %v2302_v29 = vmax.f32 %v1404_v44, 0.0  ;;  %v2304_v43 = vmax.f32 %v1597_v20, 0.0  ;;  %v1408_v22 = vadd.f32 %v1407_v31, %v4425_v26  ;;  %v1601_v51 = vadd.f32 %v1600_v28, %v4429_v36 }
 0x28b   : > { %v2892_v8 = vadd.f32 %v2891_v19, %v2301_v17  ;;  %v2966_v0 = vadd.f32 %v2965_v12, %v2303_v40  ;;  %v2317_v39 = vmax.f32 %v1406_v10, 0.0  ;;  %v2319_v33 = vmax.f32 %v1599_v18, 0.0 }
 0x28c   : > { %v2929_v47 = vadd.f32 %v2928_v9, %v2302_v29  ;;  %v3003_v63 = vadd.f32 %v3002_v35, %v2304_v43  ;;  %v2318_v7 = vmax.f32 %v1408_v22, 0.0  ;;  %v2320_v49 = vmax.f32 %v1601_v51, 0.0 }
 0x28d   : > { %v2893_v11 = vadd.f32 %v2892_v8, %v2317_v39  ;;  %v2967_v4 = vadd.f32 %v2966_v0, %v2319_v33 }
 0x28e   : > { %v2930_v24 = vadd.f32 %v2929_v47, %v2318_v7  ;;  %v3004_v32 = vadd.f32 %v3003_v63, %v2320_v49  ;;  %v1411_v1 = vpop.f32.mrb[160].mxu0  ;;  %v1604_v46 = vpop.f32.mrb[160].mxu1 }
 0x28f   : > { %v1412_v23 = vadd.f32 %v1411_v1, %v4415_v56  ;;  %v1605_v52 = vadd.f32 %v1604_v46, %v4419_v37  ;;  %v1413_v55 = vpop.f32.mrb[161].mxu0  ;;  %v1606_v38 = vpop.f32.mrb[161].mxu1 }
 0x290   : > { %v1414_v14 = vadd.f32 %v1413_v55, %v4425_v26  ;;  %v1607_v30 = vadd.f32 %v1606_v38, %v4429_v36  ;;  %v1415_v42 = vpop.f32.mrb[162].mxu0  ;;  %v1608_v54 = vpop.f32.mrb[162].mxu1 }
 0x291   : > { %v2333_v3 = vmax.f32 %v1412_v23, 0.0  ;;  %v2335_v16 = vmax.f32 %v1605_v52, 0.0  ;;  %v1416_v15 = vadd.f32 %v1415_v42, %v4415_v56  ;;  %v1609_v13 = vadd.f32 %v1608_v54, %v4419_v37  ;;  %v1417_v25 = vpop.f32.mrb[163].mxu0  ;;  %v1610_v62 = vpop.f32.mrb[163].mxu1 }
 0x292   : > { %v2334_v57 = vmax.f32 %v1414_v14, 0.0  ;;  %v2336_v59 = vmax.f32 %v1607_v30, 0.0  ;;  %v1418_v45 = vadd.f32 %v1417_v25, %v4425_v26  ;;  %v1611_v41 = vadd.f32 %v1610_v62, %v4429_v36 }
 0x293   : > { %v2894_v58 = vadd.f32 %v2893_v11, %v2333_v3  ;;  %v2968_v19 = vadd.f32 %v2967_v4, %v2335_v16  ;;  %v2349_v12 = vmax.f32 %v1416_v15, 0.0  ;;  %v2351_v9 = vmax.f32 %v1609_v13, 0.0 }
 0x294   : > { %v2931_v35 = vadd.f32 %v2930_v24, %v2334_v57  ;;  %v3005_v21 = vadd.f32 %v3004_v32, %v2336_v59  ;;  %v2350_v50 = vmax.f32 %v1418_v45, 0.0  ;;  %v2352_v60 = vmax.f32 %v1611_v41, 0.0 }
 0x295   : > { %v2895_v27 = vadd.f32 %v2894_v58, %v2349_v12  ;;  %v2969_v48 = vadd.f32 %v2968_v19, %v2351_v9 }
 0x296   : > { %v2932_v34 = vadd.f32 %v2931_v35, %v2350_v50  ;;  %v3006_v44 = vadd.f32 %v3005_v21, %v2352_v60  ;;  %v1421_v20 = vpop.f32.mrb[164].mxu0  ;;  %v1614_v61 = vpop.f32.mrb[164].mxu1 }
 0x297   : > { %v1422_v53 = vadd.f32 %v1421_v20, %v4415_v56  ;;  %v1615_v17 = vadd.f32 %v1614_v61, %v4419_v37  ;;  %v1423_v40 = vpop.f32.mrb[165].mxu0  ;;  %v1616_v10 = vpop.f32.mrb[165].mxu1 }
 0x298   : > { %v1424_v18 = vadd.f32 %v1423_v40, %v4425_v26  ;;  %v1617_v31 = vadd.f32 %v1616_v10, %v4429_v36  ;;  %v1425_v28 = vpop.f32.mrb[166].mxu0  ;;  %v1618_v29 = vpop.f32.mrb[166].mxu1 }
 0x299   : > { %v2365_v43 = vmax.f32 %v1422_v53, 0.0  ;;  %v2367_v22 = vmax.f32 %v1615_v17, 0.0  ;;  %v1426_v51 = vadd.f32 %v1425_v28, %v4415_v56  ;;  %v1619_v8 = vadd.f32 %v1618_v29, %v4419_v37  ;;  %v1427_v0 = vpop.f32.mrb[167].mxu0  ;;  %v1620_v39 = vpop.f32.mrb[167].mxu1 }
 0x29a   : > { %v2366_v33 = vmax.f32 %v1424_v18, 0.0  ;;  %v2368_v47 = vmax.f32 %v1617_v31, 0.0  ;;  %v1428_v63 = vadd.f32 %v1427_v0, %v4425_v26  ;;  %v1621_v7 = vadd.f32 %v1620_v39, %v4429_v36 }
 0x29b   : > { %v2896_v49 = vadd.f32 %v2895_v27, %v2365_v43  ;;  %v2970_v11 = vadd.f32 %v2969_v48, %v2367_v22  ;;  %v2381_v4 = vmax.f32 %v1426_v51, 0.0  ;;  %v2383_v24 = vmax.f32 %v1619_v8, 0.0 }
 0x29c   : > { %v2933_v32 = vadd.f32 %v2932_v34, %v2366_v33  ;;  %v3007_v1 = vadd.f32 %v3006_v44, %v2368_v47  ;;  %v2382_v46 = vmax.f32 %v1428_v63, 0.0  ;;  %v2384_v23 = vmax.f32 %v1621_v7, 0.0 }
 0x29d   : > { %v2897_v52 = vadd.f32 %v2896_v49, %v2381_v4  ;;  %v2971_v55 = vadd.f32 %v2970_v11, %v2383_v24 }
 0x29e   : > { %v2934_v38 = vadd.f32 %v2933_v32, %v2382_v46  ;;  %v3008_v14 = vadd.f32 %v3007_v1, %v2384_v23  ;;  %v1431_v30 = vpop.f32.mrb[168].mxu0  ;;  %v1624_v42 = vpop.f32.mrb[168].mxu1 }
 0x29f   : > { %v1432_v54 = vadd.f32 %v1431_v30, %v4415_v56  ;;  %v1625_v3 = vadd.f32 %v1624_v42, %v4419_v37  ;;  %v1433_v16 = vpop.f32.mrb[169].mxu0  ;;  %v1626_v15 = vpop.f32.mrb[169].mxu1 }
 0x2a0   : > { %v1434_v13 = vadd.f32 %v1433_v16, %v4425_v26  ;;  %v1627_v25 = vadd.f32 %v1626_v15, %v4429_v36  ;;  %v1435_v62 = vpop.f32.mrb[170].mxu0  ;;  %v1628_v57 = vpop.f32.mrb[170].mxu1 }
 0x2a1   : > { %v2397_v59 = vmax.f32 %v1432_v54, 0.0  ;;  %v2399_v45 = vmax.f32 %v1625_v3, 0.0  ;;  %v1436_v41 = vadd.f32 %v1435_v62, %v4415_v56  ;;  %v1629_v58 = vadd.f32 %v1628_v57, %v4419_v37  ;;  %v1437_v19 = vpop.f32.mrb[171].mxu0  ;;  %v1630_v12 = vpop.f32.mrb[171].mxu1 }
 0x2a2   : > { %v2398_v9 = vmax.f32 %v1434_v13, 0.0  ;;  %v2400_v35 = vmax.f32 %v1627_v25, 0.0  ;;  %v1438_v21 = vadd.f32 %v1437_v19, %v4425_v26  ;;  %v1631_v50 = vadd.f32 %v1630_v12, %v4429_v36 }
 0x2a3   : > { %v2898_v60 = vadd.f32 %v2897_v52, %v2397_v59  ;;  %v2972_v27 = vadd.f32 %v2971_v55, %v2399_v45  ;;  %v2413_v48 = vmax.f32 %v1436_v41, 0.0  ;;  %v2415_v34 = vmax.f32 %v1629_v58, 0.0 }
 0x2a4   : > { %v2935_v44 = vadd.f32 %v2934_v38, %v2398_v9  ;;  %v3009_v20 = vadd.f32 %v3008_v14, %v2400_v35  ;;  %v2414_v61 = vmax.f32 %v1438_v21, 0.0  ;;  %v2416_v53 = vmax.f32 %v1631_v50, 0.0 }
 0x2a5   : > { %v2899_v17 = vadd.f32 %v2898_v60, %v2413_v48  ;;  %v2973_v40 = vadd.f32 %v2972_v27, %v2415_v34 }
 0x2a6   : > { %v2936_v10 = vadd.f32 %v2935_v44, %v2414_v61  ;;  %v3010_v18 = vadd.f32 %v3009_v20, %v2416_v53  ;;  %v1441_v31 = vpop.f32.mrb[172].mxu0  ;;  %v1634_v28 = vpop.f32.mrb[172].mxu1 }
 0x2a7   : > { %v1442_v29 = vadd.f32 %v1441_v31, %v4415_v56  ;;  %v1635_v43 = vadd.f32 %v1634_v28, %v4419_v37  ;;  %v1443_v22 = vpop.f32.mrb[173].mxu0  ;;  %v1636_v51 = vpop.f32.mrb[173].mxu1 }
 0x2a8   : > { %v1444_v8 = vadd.f32 %v1443_v22, %v4425_v26  ;;  %v1637_v0 = vadd.f32 %v1636_v51, %v4429_v36  ;;  %v1445_v39 = vpop.f32.mrb[174].mxu0  ;;  %v1638_v33 = vpop.f32.mrb[174].mxu1 }
 0x2a9   : > { %v2429_v47 = vmax.f32 %v1442_v29, 0.0  ;;  %v2431_v63 = vmax.f32 %v1635_v43, 0.0  ;;  %v1446_v7 = vadd.f32 %v1445_v39, %v4415_v56  ;;  %v1639_v49 = vadd.f32 %v1638_v33, %v4419_v37  ;;  %v1447_v11 = vpop.f32.mrb[175].mxu0  ;;  %v1640_v4 = vpop.f32.mrb[175].mxu1 }
 0x2aa   : > { %v2430_v24 = vmax.f32 %v1444_v8, 0.0  ;;  %v2432_v32 = vmax.f32 %v1637_v0, 0.0  ;;  %v1448_v1 = vadd.f32 %v1447_v11, %v4425_v26  ;;  %v1641_v46 = vadd.f32 %v1640_v4, %v4429_v36 }
 0x2ab   : > { %v2900_v23 = vadd.f32 %v2899_v17, %v2429_v47  ;;  %v2974_v52 = vadd.f32 %v2973_v40, %v2431_v63  ;;  %v2445_v55 = vmax.f32 %v1446_v7, 0.0  ;;  %v2447_v38 = vmax.f32 %v1639_v49, 0.0 }
 0x2ac   : > { %v2937_v14 = vadd.f32 %v2936_v10, %v2430_v24  ;;  %v3011_v30 = vadd.f32 %v3010_v18, %v2432_v32  ;;  %v2446_v42 = vmax.f32 %v1448_v1, 0.0  ;;  %v2448_v54 = vmax.f32 %v1641_v46, 0.0 }
 0x2ad   : > { %v2901_v3 = vadd.f32 %v2900_v23, %v2445_v55  ;;  %v2975_v16 = vadd.f32 %v2974_v52, %v2447_v38 }
 0x2ae   : > { %v2938_v15 = vadd.f32 %v2937_v14, %v2446_v42  ;;  %v3012_v13 = vadd.f32 %v3011_v30, %v2448_v54  ;;  %v1451_v25 = vpop.f32.mrb[176].mxu0  ;;  %v1644_v62 = vpop.f32.mrb[176].mxu1 }
 0x2af   : > { %v1452_v57 = vadd.f32 %v1451_v25, %v4415_v56  ;;  %v1645_v59 = vadd.f32 %v1644_v62, %v4419_v37  ;;  %v1453_v45 = vpop.f32.mrb[177].mxu0  ;;  %v1646_v41 = vpop.f32.mrb[177].mxu1 }
 0x2b0   : > { %v1454_v58 = vadd.f32 %v1453_v45, %v4425_v26  ;;  %v1647_v19 = vadd.f32 %v1646_v41, %v4429_v36  ;;  %v1455_v12 = vpop.f32.mrb[178].mxu0  ;;  %v1648_v9 = vpop.f32.mrb[178].mxu1 }
 0x2b1   : > { %v2461_v35 = vmax.f32 %v1452_v57, 0.0  ;;  %v2463_v21 = vmax.f32 %v1645_v59, 0.0  ;;  %v1456_v50 = vadd.f32 %v1455_v12, %v4415_v56  ;;  %v1649_v60 = vadd.f32 %v1648_v9, %v4419_v37  ;;  %v1457_v27 = vpop.f32.mrb[179].mxu0  ;;  %v1650_v48 = vpop.f32.mrb[179].mxu1 }
 0x2b2   : > { %v2462_v34 = vmax.f32 %v1454_v58, 0.0  ;;  %v2464_v44 = vmax.f32 %v1647_v19, 0.0  ;;  %v1458_v20 = vadd.f32 %v1457_v27, %v4425_v26  ;;  %v1651_v61 = vadd.f32 %v1650_v48, %v4429_v36 }
 0x2b3   : > { %v2902_v53 = vadd.f32 %v2901_v3, %v2461_v35  ;;  %v2976_v17 = vadd.f32 %v2975_v16, %v2463_v21  ;;  %v2477_v40 = vmax.f32 %v1456_v50, 0.0  ;;  %v2479_v10 = vmax.f32 %v1649_v60, 0.0 }
 0x2b4   : > { %v2939_v18 = vadd.f32 %v2938_v15, %v2462_v34  ;;  %v3013_v31 = vadd.f32 %v3012_v13, %v2464_v44  ;;  %v2478_v28 = vmax.f32 %v1458_v20, 0.0  ;;  %v2480_v29 = vmax.f32 %v1651_v61, 0.0 }
 0x2b5   : > { %v2903_v43 = vadd.f32 %v2902_v53, %v2477_v40  ;;  %v2977_v22 = vadd.f32 %v2976_v17, %v2479_v10 }
 0x2b6   : > { %v2940_v51 = vadd.f32 %v2939_v18, %v2478_v28  ;;  %v3014_v8 = vadd.f32 %v3013_v31, %v2480_v29  ;;  %v1461_v0 = vpop.f32.mrb[180].mxu0  ;;  %v1654_v39 = vpop.f32.mrb[180].mxu1 }
 0x2b7   : > { %v1462_v33 = vadd.f32 %v1461_v0, %v4415_v56  ;;  %v1655_v47 = vadd.f32 %v1654_v39, %v4419_v37  ;;  %v1463_v63 = vpop.f32.mrb[181].mxu0  ;;  %v1656_v7 = vpop.f32.mrb[181].mxu1 }
 0x2b8   : > { %v1464_v49 = vadd.f32 %v1463_v63, %v4425_v26  ;;  %v1657_v11 = vadd.f32 %v1656_v7, %v4429_v36  ;;  %v1465_v4 = vpop.f32.mrb[182].mxu0  ;;  %v1658_v24 = vpop.f32.mrb[182].mxu1 }
 0x2b9   : > { %v2493_v32 = vmax.f32 %v1462_v33, 0.0  ;;  %v2495_v1 = vmax.f32 %v1655_v47, 0.0  ;;  %v1466_v46 = vadd.f32 %v1465_v4, %v4415_v56  ;;  %v1659_v23 = vadd.f32 %v1658_v24, %v4419_v37  ;;  %v1467_v52 = vpop.f32.mrb[183].mxu0  ;;  %v1660_v55 = vpop.f32.mrb[183].mxu1 }
 0x2ba   : > { %v2494_v38 = vmax.f32 %v1464_v49, 0.0  ;;  %v2496_v14 = vmax.f32 %v1657_v11, 0.0  ;;  %v1468_v30 = vadd.f32 %v1467_v52, %v4425_v26  ;;  %v1661_v42 = vadd.f32 %v1660_v55, %v4429_v36 }
 0x2bb   : > { %v2904_v54 = vadd.f32 %v2903_v43, %v2493_v32  ;;  %v2978_v3 = vadd.f32 %v2977_v22, %v2495_v1  ;;  %v2509_v16 = vmax.f32 %v1466_v46, 0.0  ;;  %v2511_v15 = vmax.f32 %v1659_v23, 0.0  ;;  %v3585_v23 = vld [vmem:[%s4800_s2 + $0x20] ss:$4 sm:$0xff] }
 0x2bc   : > { %v2941_v13 = vadd.f32 %v2940_v51, %v2494_v38  ;;  %v3015_v25 = vadd.f32 %v3014_v8, %v2496_v14  ;;  %v2510_v62 = vmax.f32 %v1468_v30, 0.0  ;;  %v2512_v57 = vmax.f32 %v1661_v42, 0.0 }
 0x2bd   : > { %v2905_v59 = vadd.f32 %v2904_v54, %v2509_v16  ;;  %v2979_v45 = vadd.f32 %v2978_v3, %v2511_v15  ;;  %v4619_v52 = vrot.slane %v3585_v23, %v261_v5  ;;  %v4805_v55 = vsub.s32 6, %v3661_v6 }
 0x2be   : > { %v2942_v41 = vadd.f32 %v2941_v13, %v2510_v62  ;;  %v3016_v58 = vadd.f32 %v3015_v25, %v2512_v57  ;;  %v1471_v19 = vpop.f32.mrb[184].mxu0  ;;  %v1664_v12 = vpop.f32.mrb[184].mxu1  ;;  %v4806_v3 = vsub.s32 5, %v3661_v6  ;;  %v4807_v15 = vsub.s32 7, %v3661_v6 }
 0x2bf   : > { %v1472_v9 = vadd.f32 %v1471_v19, %v4415_v56  ;;  %v1665_v35 = vadd.f32 %v1664_v12, %v4419_v37  ;;  %v1473_v21 = vpop.f32.mrb[185].mxu0  ;;  %v1666_v50 = vpop.f32.mrb[185].mxu1  ;;  %v4623_v38 = vrot.slane %v3585_v23, %v4805_v55 }
 0x2c0   : > { %v1474_v60 = vadd.f32 %v1473_v21, %v4425_v26  ;;  %v1667_v27 = vadd.f32 %v1666_v50, %v4429_v36  ;;  %v1475_v48 = vpop.f32.mrb[186].mxu0  ;;  %v1668_v34 = vpop.f32.mrb[186].mxu1  ;;  %v4629_v16 = vrot.slane %v3585_v23, %v4806_v3  ;;  %v4633_v13 = vrot.slane %v3585_v23, %v4807_v15 }
 0x2c1   : > { %v2525_v44 = vmax.f32 %v1472_v9, 0.0  ;;  %v2527_v20 = vmax.f32 %v1665_v35, 0.0  ;;  %v1476_v61 = vadd.f32 %v1475_v48, %v4415_v56  ;;  %v1669_v53 = vadd.f32 %v1668_v34, %v4419_v37  ;;  %v1477_v17 = vpop.f32.mrb[187].mxu0  ;;  %v1670_v40 = vpop.f32.mrb[187].mxu1 }
 0x2c2   : > { %v2526_v10 = vmax.f32 %v1474_v60, 0.0  ;;  %v2528_v18 = vmax.f32 %v1667_v27, 0.0  ;;  %v1478_v31 = vadd.f32 %v1477_v17, %v4425_v26  ;;  %v1671_v28 = vadd.f32 %v1670_v40, %v4429_v36 }
 0x2c3   : > { %v2906_v29 = vadd.f32 %v2905_v59, %v2525_v44  ;;  %v2980_v43 = vadd.f32 %v2979_v45, %v2527_v20  ;;  %v2541_v22 = vmax.f32 %v1476_v61, 0.0  ;;  %v2543_v51 = vmax.f32 %v1669_v53, 0.0 }
 0x2c4   : > { %v2943_v8 = vadd.f32 %v2942_v41, %v2526_v10  ;;  %v3017_v0 = vadd.f32 %v3016_v58, %v2528_v18  ;;  %v2542_v39 = vmax.f32 %v1478_v31, 0.0  ;;  %v2544_v33 = vmax.f32 %v1671_v28, 0.0 }
 0x2c5   : > { %v2907_v47 = vadd.f32 %v2906_v29, %v2541_v22  ;;  %v2981_v63 = vadd.f32 %v2980_v43, %v2543_v51 }
 0x2c6   : > { %v2944_v7 = vadd.f32 %v2943_v8, %v2542_v39  ;;  %v3018_v49 = vadd.f32 %v3017_v0, %v2544_v33  ;;  %v1481_v11 = vpop.f32.mrb[188].mxu0  ;;  %v1674_v4 = vpop.f32.mrb[188].mxu1 }
 0x2c7   : > { %v1482_v24 = vadd.f32 %v1481_v11, %v4415_v56  ;;  %v1675_v32 = vadd.f32 %v1674_v4, %v4419_v37  ;;  %v1483_v1 = vpop.f32.mrb[189].mxu0  ;;  %v1676_v46 = vpop.f32.mrb[189].mxu1 }
 0x2c8   : > { %v1484_v14 = vadd.f32 %v1483_v1, %v4425_v26  ;;  %v1677_v30 = vadd.f32 %v1676_v46, %v4429_v36  ;;  %v1485_v42 = vpop.f32.mrb[190].mxu0  ;;  %v1678_v54 = vpop.f32.mrb[190].mxu1 }
 0x2c9   : > { %v2557_v5 = vmax.f32 %v1482_v24, 0.0  ;;  %v2559_v25 = vmax.f32 %v1675_v32, 0.0  ;;  %v1486_v62 = vadd.f32 %v1485_v42, %v4415_v56  ;;  %v1679_v57 = vadd.f32 %v1678_v54, %v4419_v37  ;;  %v1487_v59 = vpop.f32.mrb[191].mxu0  ;;  %v1680_v45 = vpop.f32.mrb[191].mxu1 }
 0x2ca   : > { %v2558_v41 = vmax.f32 %v1484_v14, 0.0  ;;  %v2560_v58 = vmax.f32 %v1677_v30, 0.0  ;;  %v1488_v19 = vadd.f32 %v1487_v59, %v4425_v26  ;;  %v1681_v12 = vadd.f32 %v1680_v45, %v4429_v36 }
 0x2cb   : > { %v2908_v9 = vadd.f32 %v2907_v47, %v2557_v5  ;;  %v2982_v35 = vadd.f32 %v2981_v63, %v2559_v25  ;;  %v2573_v21 = vmax.f32 %v1486_v62, 0.0  ;;  %v2575_v6 = vmax.f32 %v1679_v57, 0.0 }
 0x2cc   : > { %v2945_v50 = vadd.f32 %v2944_v7, %v2558_v41  ;;  %v3019_v60 = vadd.f32 %v3018_v49, %v2560_v58  ;;  %v2574_v27 = vmax.f32 %v1488_v19, 0.0  ;;  %v2576_v48 = vmax.f32 %v1681_v12, 0.0 }
 0x2cd   : > { %v2909_v34 = vadd.f32 %v2908_v9, %v2573_v21  ;;  %v2983_v56 = vadd.f32 %v2982_v35, %v2575_v6 }
 0x2ce   : > { %v2946_v44 = vadd.f32 %v2945_v50, %v2574_v27  ;;  %v3020_v37 = vadd.f32 %v3019_v60, %v2576_v48  ;;  %v1717_v20 = vpop.f32.mrb[192].mxu0  ;;  %v1910_v61 = vpop.f32.mrb[192].mxu1 }
 0x2cf   : > { %v2910_v53 = vrot.slane %v2909_v34, 4  ;;  %v2984_v17 = vrot.slane %v2983_v56, 4  ;;  %v1718_v26 = vadd.f32 %v1717_v20, %v4619_v52  ;;  %v1911_v36 = vadd.f32 %v1910_v61, %v4623_v38  ;;  %v1719_v40 = vpop.f32.mrb[193].mxu0  ;;  %v1912_v10 = vpop.f32.mrb[193].mxu1 }
 0x2d0   : > { %v2947_v18 = vrot.slane %v2946_v44, 4  ;;  %v3021_v31 = vrot.slane %v3020_v37, 4  ;;  %v1720_v28 = vadd.f32 %v1719_v40, %v4629_v16  ;;  %v1913_v29 = vadd.f32 %v1912_v10, %v4633_v13  ;;  %v1721_v43 = vpop.f32.mrb[194].mxu0  ;;  %v1914_v22 = vpop.f32.mrb[194].mxu1 }
 0x2d1   : > { %v2911_v51 = vadd.f32 %v2910_v53, %v2909_v34  ;;  %v2985_v8 = vadd.f32 %v2984_v17, %v2983_v56  ;;  %v2081_v0 = vmax.f32 %v1718_v26, 0.0  ;;  %v2083_v39 = vmax.f32 %v1911_v36, 0.0  ;;  %v1723_v33 = vpop.f32.mrb[195].mxu0  ;;  %v1916_v47 = vpop.f32.mrb[195].mxu1 }
 0x2d2   : > { %v2948_v63 = vadd.f32 %v2947_v18, %v2946_v44  ;;  %v3022_v7 = vadd.f32 %v3021_v31, %v3020_v37  ;;  %v2082_v49 = vmax.f32 %v1720_v28, 0.0  ;;  %v2084_v11 = vmax.f32 %v1913_v29, 0.0 }
 0x2d3   : > { %v2912_v4 = vrot.slane %v2911_v51, 2  ;;  %v2986_v24 = vrot.slane %v2985_v8, 2  ;;  %v1722_v32 = vadd.f32 %v1721_v43, %v4619_v52  ;;  %v1915_v1 = vadd.f32 %v1914_v22, %v4623_v38 }
 0x2d4   : > { %v2949_v46 = vrot.slane %v2948_v63, 2  ;;  %v3023_v23 = vrot.slane %v3022_v7, 2  ;;  %v1724_v55 = vadd.f32 %v1723_v33, %v4629_v16  ;;  %v1917_v14 = vadd.f32 %v1916_v47, %v4633_v13 }
 0x2d5   : > { %v2913_v30 = vadd.f32 %v2912_v4, %v2911_v51  ;;  %v2987_v42 = vadd.f32 %v2986_v24, %v2985_v8  ;;  %v2097_v54 = vmax.f32 %v1722_v32, 0.0  ;;  %v2099_v3 = vmax.f32 %v1915_v1, 0.0 }
 0x2d6   : > { %v2950_v15 = vadd.f32 %v2949_v46, %v2948_v63  ;;  %v3024_v5 = vadd.f32 %v3023_v23, %v3022_v7  ;;  %v2098_v25 = vmax.f32 %v1724_v55, 0.0  ;;  %v2100_v62 = vmax.f32 %v1917_v14, 0.0  ;;  %v1727_v57 = vpop.f32.mrb[196].mxu0  ;;  %v1920_v59 = vpop.f32.mrb[196].mxu1 }
 0x2d7   : > { %v2914_v45 = vrot.slane %v2913_v30, 1  ;;  %v2988_v41 = vrot.slane %v2987_v42, 1  ;;  %v3027_v58 = vadd.f32 %v2097_v54, %v2081_v0  ;;  %v3101_v19 = vadd.f32 %v2099_v3, %v2083_v39  ;;  %v1729_v12 = vpop.f32.mrb[197].mxu0  ;;  %v1922_v9 = vpop.f32.mrb[197].mxu1 }
 0x2d8   : > { %v2951_v35 = vrot.slane %v2950_v15, 1  ;;  %v3025_v21 = vrot.slane %v3024_v5, 1  ;;  %v3064_v6 = vadd.f32 %v2098_v25, %v2082_v49  ;;  %v3138_v50 = vadd.f32 %v2100_v62, %v2084_v11  ;;  %v1731_v60 = vpop.f32.mrb[198].mxu0  ;;  %v1924_v27 = vpop.f32.mrb[198].mxu1 }
 0x2d9   : > { %v2915_v48 = vadd.f32 %v2914_v45, %v2913_v30  ;;  %v2989_v34 = vadd.f32 %v2988_v41, %v2987_v42  ;;  %v1728_v56 = vadd.f32 %v1727_v57, %v4619_v52  ;;  %v1921_v44 = vadd.f32 %v1920_v59, %v4623_v38  ;;  %v1733_v37 = vpop.f32.mrb[199].mxu0  ;;  %v1926_v20 = vpop.f32.mrb[199].mxu1 }
 0x2da   : > { %v2952_v61 = vadd.f32 %v2951_v35, %v2950_v15  ;;  %v3026_v53 = vadd.f32 %v3025_v21, %v3024_v5  ;;  %v1730_v17 = vadd.f32 %v1729_v12, %v4629_v16  ;;  %v1923_v26 = vadd.f32 %v1922_v9, %v4633_v13 }
 0x2db   : > { %v2113_v36 = vmax.f32 %v1728_v56, 0.0  ;;  %v2115_v40 = vmax.f32 %v1921_v44, 0.0  ;;  %v1732_v10 = vadd.f32 %v1731_v60, %v4619_v52  ;;  %v1925_v18 = vadd.f32 %v1924_v27, %v4623_v38 }
 0x2dc   : > { %v3240_v31 = vcombine.low %v2915_v48, %v2952_v61  ;;  %v3241_v28 = vcombine.low %v2989_v34, %v3026_v53  ;;  %v2114_v29 = vmax.f32 %v1730_v17, 0.0  ;;  %v2116_v43 = vmax.f32 %v1923_v26, 0.0 }
 0x2dd   : > { %v3028_v22 = vadd.f32 %v3027_v58, %v2113_v36  ;;  %v3102_v51 = vadd.f32 %v3101_v19, %v2115_v40  ;;  %v2129_v8 = vmax.f32 %v1732_v10, 0.0  ;;  %v2131_v0 = vmax.f32 %v1925_v18, 0.0 }
 0x2de   : > { %v4654_v39 = vrot.slane %v3240_v31, %v4188_v2  ;;  %v4657_v33 = vrot.slane %v3241_v28, %v4188_v2  ;;  %v3065_v47 = vadd.f32 %v3064_v6, %v2114_v29  ;;  %v3139_v63 = vadd.f32 %v3138_v50, %v2116_v43  ;;  %v1737_v7 = vpop.f32.mrb[200].mxu0  ;;  %v1930_v49 = vpop.f32.mrb[200].mxu1 }
 0x2df   : > { %v3029_v11 = vadd.f32 %v3028_v22, %v2129_v8  ;;  %v3103_v4 = vadd.f32 %v3102_v51, %v2131_v0  ;;  %v1734_v24 = vadd.f32 %v1733_v37, %v4629_v16  ;;  %v1927_v32 = vadd.f32 %v1926_v20, %v4633_v13  ;;  %v1739_v1 = vpop.f32.mrb[201].mxu0  ;;  %v1932_v46 = vpop.f32.mrb[201].mxu1 }
 0x2e0   : > { %v3272_v23 = vcombine.low %v4654_v39, %v4657_v33  ;;  %v1738_v55 = vadd.f32 %v1737_v7, %v4619_v52  ;;  %v1931_v14 = vadd.f32 %v1930_v49, %v4623_v38  ;;  %v1740_v30 = vadd.f32 %v1739_v1, %v4629_v16  ;;  %v1741_v42 = vpop.f32.mrb[202].mxu0  ;;  %v1934_v54 = vpop.f32.mrb[202].mxu1 }
 0x2e1   : > { %v2130_v3 = vmax.f32 %v1734_v24, 0.0  ;;  %v2132_v15 = vmax.f32 %v1927_v32, 0.0  ;;  %v1933_v5 = vadd.f32 %v1932_v46, %v4633_v13  ;;  %v1742_v25 = vadd.f32 %v1741_v42, %v4619_v52  ;;  %v1743_v62 = vpop.f32.mrb[203].mxu0  ;;  %v1936_v57 = vpop.f32.mrb[203].mxu1 }
 0x2e2   : > { %v2145_v59 = vmax.f32 %v1738_v55, 0.0  ;;  %v2147_v45 = vmax.f32 %v1931_v14, 0.0  ;;  %v2146_v41 = vmax.f32 %v1740_v30, 0.0  ;;  %v1935_v6 = vadd.f32 %v1934_v54, %v4623_v38 }
 0x2e3   : > { %v3066_v58 = vadd.f32 %v3065_v47, %v2130_v3  ;;  %v3140_v19 = vadd.f32 %v3139_v63, %v2132_v15  ;;  %v2148_v12 = vmax.f32 %v1933_v5, 0.0  ;;  %v2161_v9 = vmax.f32 %v1742_v25, 0.0 }
 0x2e4   : > { %v3030_v35 = vadd.f32 %v3029_v11, %v2145_v59  ;;  %v3104_v21 = vadd.f32 %v3103_v4, %v2147_v45  ;;  %v1744_v50 = vadd.f32 %v1743_v62, %v4629_v16  ;;  %v1937_v48 = vadd.f32 %v1936_v57, %v4633_v13 }
 0x2e5   : > { %v3067_v60 = vadd.f32 %v3066_v58, %v2146_v41  ;;  %v3141_v27 = vadd.f32 %v3140_v19, %v2148_v12  ;;  %v2163_v56 = vmax.f32 %v1935_v6, 0.0 }
 0x2e6   : > { %v3031_v34 = vadd.f32 %v3030_v35, %v2161_v9  ;;  %v2162_v44 = vmax.f32 %v1744_v50, 0.0  ;;  %v1747_v37 = vpop.f32.mrb[204].mxu0  ;;  %v1940_v20 = vpop.f32.mrb[204].mxu1  ;;  %v2164_v61 = vmax.f32 %v1937_v48, 0.0 }
 0x2e7   : > { %v1748_v53 = vadd.f32 %v1747_v37, %v4619_v52  ;;  %v1941_v17 = vadd.f32 %v1940_v20, %v4623_v38  ;;  %v1749_v26 = vpop.f32.mrb[205].mxu0  ;;  %v1942_v36 = vpop.f32.mrb[205].mxu1  ;;  %v3105_v40 = vadd.f32 %v3104_v21, %v2163_v56 }
 0x2e8   : > { %v3068_v10 = vadd.f32 %v3067_v60, %v2162_v44  ;;  %v1750_v18 = vadd.f32 %v1749_v26, %v4629_v16  ;;  %v1943_v31 = vadd.f32 %v1942_v36, %v4633_v13  ;;  %v1751_v28 = vpop.f32.mrb[206].mxu0  ;;  %v1944_v29 = vpop.f32.mrb[206].mxu1  ;;  %v3142_v43 = vadd.f32 %v3141_v27, %v2164_v61 }
 0x2e9   : > { %v2177_v22 = vmax.f32 %v1748_v53, 0.0  ;;  %v2179_v51 = vmax.f32 %v1941_v17, 0.0  ;;  %v1752_v8 = vadd.f32 %v1751_v28, %v4619_v52  ;;  %v1753_v0 = vpop.f32.mrb[207].mxu0  ;;  %v1946_v47 = vpop.f32.mrb[207].mxu1  ;;  %v1945_v49 = vadd.f32 %v1944_v29, %v4623_v38 }
 0x2ea   : > { %v2178_v63 = vmax.f32 %v1750_v18, 0.0  ;;  %v2180_v7 = vmax.f32 %v1943_v31, 0.0  ;;  %v1754_v11 = vadd.f32 %v1753_v0, %v4629_v16  ;;  %v1947_v1 = vadd.f32 %v1946_v47, %v4633_v13 }
 0x2eb   : > { %v3032_v4 = vadd.f32 %v3031_v34, %v2177_v22  ;;  %v3106_v24 = vadd.f32 %v3105_v40, %v2179_v51  ;;  %v2193_v32 = vmax.f32 %v1752_v8, 0.0  ;;  %v2195_v14 = vmax.f32 %v1945_v49, 0.0 }
 0x2ec   : > { %v3069_v46 = vadd.f32 %v3068_v10, %v2178_v63  ;;  %v3143_v55 = vadd.f32 %v3142_v43, %v2180_v7  ;;  %v2194_v30 = vmax.f32 %v1754_v11, 0.0  ;;  %v2196_v54 = vmax.f32 %v1947_v1, 0.0 }
 0x2ed   : > { %v3033_v42 = vadd.f32 %v3032_v4, %v2193_v32  ;;  %v3107_v3 = vadd.f32 %v3106_v24, %v2195_v14 }
 0x2ee   : > { %v3070_v15 = vadd.f32 %v3069_v46, %v2194_v30  ;;  %v1757_v5 = vpop.f32.mrb[208].mxu0  ;;  %v1950_v25 = vpop.f32.mrb[208].mxu1  ;;  %v3144_v62 = vadd.f32 %v3143_v55, %v2196_v54 }
 0x2ef   : > { %v1758_v57 = vadd.f32 %v1757_v5, %v4619_v52  ;;  %v1951_v59 = vadd.f32 %v1950_v25, %v4623_v38  ;;  %v1759_v45 = vpop.f32.mrb[209].mxu0  ;;  %v1952_v41 = vpop.f32.mrb[209].mxu1 }
 0x2f0   : > { %v1760_v58 = vadd.f32 %v1759_v45, %v4629_v16  ;;  %v1953_v19 = vadd.f32 %v1952_v41, %v4633_v13  ;;  %v1761_v12 = vpop.f32.mrb[210].mxu0  ;;  %v1954_v9 = vpop.f32.mrb[210].mxu1 }
 0x2f1   : > { %v2209_v35 = vmax.f32 %v1758_v57, 0.0  ;;  %v2211_v21 = vmax.f32 %v1951_v59, 0.0  ;;  %v1762_v6 = vadd.f32 %v1761_v12, %v4619_v52  ;;  %v1955_v50 = vadd.f32 %v1954_v9, %v4623_v38  ;;  %v1763_v60 = vpop.f32.mrb[211].mxu0  ;;  %v1956_v27 = vpop.f32.mrb[211].mxu1 }
 0x2f2   : > { %v2210_v48 = vmax.f32 %v1760_v58, 0.0  ;;  %v2212_v34 = vmax.f32 %v1953_v19, 0.0  ;;  %v1764_v56 = vadd.f32 %v1763_v60, %v4629_v16  ;;  %v1957_v44 = vadd.f32 %v1956_v27, %v4633_v13 }
 0x2f3   : > { %v3034_v37 = vadd.f32 %v3033_v42, %v2209_v35  ;;  %v3108_v20 = vadd.f32 %v3107_v3, %v2211_v21  ;;  %v2225_v61 = vmax.f32 %v1762_v6, 0.0  ;;  %v2227_v53 = vmax.f32 %v1955_v50, 0.0 }
 0x2f4   : > { %v3071_v17 = vadd.f32 %v3070_v15, %v2210_v48  ;;  %v3145_v26 = vadd.f32 %v3144_v62, %v2212_v34  ;;  %v2226_v36 = vmax.f32 %v1764_v56, 0.0  ;;  %v2228_v40 = vmax.f32 %v1957_v44, 0.0 }
 0x2f5   : > { %v3035_v10 = vadd.f32 %v3034_v37, %v2225_v61  ;;  %v3109_v18 = vadd.f32 %v3108_v20, %v2227_v53 }
 0x2f6   : > { %v3072_v31 = vadd.f32 %v3071_v17, %v2226_v36  ;;  %v3146_v28 = vadd.f32 %v3145_v26, %v2228_v40  ;;  %v1767_v29 = vpop.f32.mrb[212].mxu0  ;;  %v1960_v43 = vpop.f32.mrb[212].mxu1 }
 0x2f7   : > { %v1768_v22 = vadd.f32 %v1767_v29, %v4619_v52  ;;  %v1961_v51 = vadd.f32 %v1960_v43, %v4623_v38  ;;  %v1769_v8 = vpop.f32.mrb[213].mxu0  ;;  %v1962_v0 = vpop.f32.mrb[213].mxu1 }
 0x2f8   : > { %v1770_v47 = vadd.f32 %v1769_v8, %v4629_v16  ;;  %v1963_v63 = vadd.f32 %v1962_v0, %v4633_v13  ;;  %v1771_v7 = vpop.f32.mrb[214].mxu0  ;;  %v1964_v49 = vpop.f32.mrb[214].mxu1 }
 0x2f9   : > { %v2241_v11 = vmax.f32 %v1768_v22, 0.0  ;;  %v2243_v4 = vmax.f32 %v1961_v51, 0.0  ;;  %v1772_v24 = vadd.f32 %v1771_v7, %v4619_v52  ;;  %v1965_v32 = vadd.f32 %v1964_v49, %v4623_v38  ;;  %v1773_v1 = vpop.f32.mrb[215].mxu0  ;;  %v1966_v46 = vpop.f32.mrb[215].mxu1 }
 0x2fa   : > { %v2242_v55 = vmax.f32 %v1770_v47, 0.0  ;;  %v2244_v14 = vmax.f32 %v1963_v63, 0.0  ;;  %v1774_v30 = vadd.f32 %v1773_v1, %v4629_v16  ;;  %v1967_v42 = vadd.f32 %v1966_v46, %v4633_v13 }
 0x2fb   : > { %v3036_v54 = vadd.f32 %v3035_v10, %v2241_v11  ;;  %v3110_v3 = vadd.f32 %v3109_v18, %v2243_v4  ;;  %v2257_v15 = vmax.f32 %v1772_v24, 0.0  ;;  %v2259_v5 = vmax.f32 %v1965_v32, 0.0 }
 0x2fc   : > { %v3073_v25 = vadd.f32 %v3072_v31, %v2242_v55  ;;  %v3147_v62 = vadd.f32 %v3146_v28, %v2244_v14  ;;  %v2258_v57 = vmax.f32 %v1774_v30, 0.0  ;;  %v2260_v59 = vmax.f32 %v1967_v42, 0.0 }
 0x2fd   : > { %v3037_v45 = vadd.f32 %v3036_v54, %v2257_v15  ;;  %v3111_v41 = vadd.f32 %v3110_v3, %v2259_v5 }
 0x2fe   : > { %v3074_v58 = vadd.f32 %v3073_v25, %v2258_v57  ;;  %v3148_v19 = vadd.f32 %v3147_v62, %v2260_v59  ;;  %v1777_v12 = vpop.f32.mrb[216].mxu0  ;;  %v1970_v9 = vpop.f32.mrb[216].mxu1 }
 0x2ff   : > { %v1778_v35 = vadd.f32 %v1777_v12, %v4619_v52  ;;  %v1971_v21 = vadd.f32 %v1970_v9, %v4623_v38  ;;  %v1779_v6 = vpop.f32.mrb[217].mxu0  ;;  %v1972_v50 = vpop.f32.mrb[217].mxu1 }
 0x300   : > { %v1780_v60 = vadd.f32 %v1779_v6, %v4629_v16  ;;  %v1973_v27 = vadd.f32 %v1972_v50, %v4633_v13  ;;  %v1781_v48 = vpop.f32.mrb[218].mxu0  ;;  %v1974_v34 = vpop.f32.mrb[218].mxu1 }
 0x301   : > { %v2273_v56 = vmax.f32 %v1778_v35, 0.0  ;;  %v2275_v44 = vmax.f32 %v1971_v21, 0.0  ;;  %v1782_v37 = vadd.f32 %v1781_v48, %v4619_v52  ;;  %v1975_v20 = vadd.f32 %v1974_v34, %v4623_v38  ;;  %v1783_v61 = vpop.f32.mrb[219].mxu0  ;;  %v1976_v53 = vpop.f32.mrb[219].mxu1 }
 0x302   : > { %v2274_v17 = vmax.f32 %v1780_v60, 0.0  ;;  %v2276_v26 = vmax.f32 %v1973_v27, 0.0  ;;  %v1784_v36 = vadd.f32 %v1783_v61, %v4629_v16  ;;  %v1977_v40 = vadd.f32 %v1976_v53, %v4633_v13 }
 0x303   : > { %v3038_v10 = vadd.f32 %v3037_v45, %v2273_v56  ;;  %v3112_v18 = vadd.f32 %v3111_v41, %v2275_v44  ;;  %v2289_v31 = vmax.f32 %v1782_v37, 0.0  ;;  %v2291_v28 = vmax.f32 %v1975_v20, 0.0 }
 0x304   : > { %v3075_v29 = vadd.f32 %v3074_v58, %v2274_v17  ;;  %v3149_v43 = vadd.f32 %v3148_v19, %v2276_v26  ;;  %v2290_v22 = vmax.f32 %v1784_v36, 0.0  ;;  %v2292_v51 = vmax.f32 %v1977_v40, 0.0 }
 0x305   : > { %v3039_v8 = vadd.f32 %v3038_v10, %v2289_v31  ;;  %v3113_v0 = vadd.f32 %v3112_v18, %v2291_v28 }
 0x306   : > { %v3076_v47 = vadd.f32 %v3075_v29, %v2290_v22  ;;  %v3150_v63 = vadd.f32 %v3149_v43, %v2292_v51  ;;  %v1787_v7 = vpop.f32.mrb[220].mxu0  ;;  %v1980_v49 = vpop.f32.mrb[220].mxu1 }
 0x307   : > { %v1788_v11 = vadd.f32 %v1787_v7, %v4619_v52  ;;  %v1981_v4 = vadd.f32 %v1980_v49, %v4623_v38  ;;  %v1789_v24 = vpop.f32.mrb[221].mxu0  ;;  %v1982_v32 = vpop.f32.mrb[221].mxu1 }
 0x308   : > { %v1790_v1 = vadd.f32 %v1789_v24, %v4629_v16  ;;  %v1983_v46 = vadd.f32 %v1982_v32, %v4633_v13  ;;  %v1791_v55 = vpop.f32.mrb[222].mxu0  ;;  %v1984_v14 = vpop.f32.mrb[222].mxu1 }
 0x309   : > { %v2305_v30 = vmax.f32 %v1788_v11, 0.0  ;;  %v2307_v42 = vmax.f32 %v1981_v4, 0.0  ;;  %v1792_v54 = vadd.f32 %v1791_v55, %v4619_v52  ;;  %v1985_v3 = vadd.f32 %v1984_v14, %v4623_v38  ;;  %v1793_v15 = vpop.f32.mrb[223].mxu0  ;;  %v1986_v5 = vpop.f32.mrb[223].mxu1 }
 0x30a   : > { %v2306_v25 = vmax.f32 %v1790_v1, 0.0  ;;  %v2308_v62 = vmax.f32 %v1983_v46, 0.0  ;;  %v1794_v57 = vadd.f32 %v1793_v15, %v4629_v16  ;;  %v1987_v59 = vadd.f32 %v1986_v5, %v4633_v13 }
 0x30b   : > { %v3040_v45 = vadd.f32 %v3039_v8, %v2305_v30  ;;  %v3114_v41 = vadd.f32 %v3113_v0, %v2307_v42  ;;  %v2321_v58 = vmax.f32 %v1792_v54, 0.0  ;;  %v2323_v19 = vmax.f32 %v1985_v3, 0.0 }
 0x30c   : > { %v3077_v12 = vadd.f32 %v3076_v47, %v2306_v25  ;;  %v3151_v9 = vadd.f32 %v3150_v63, %v2308_v62  ;;  %v2322_v35 = vmax.f32 %v1794_v57, 0.0  ;;  %v2324_v21 = vmax.f32 %v1987_v59, 0.0 }
 0x30d   : > { %v3041_v6 = vadd.f32 %v3040_v45, %v2321_v58  ;;  %v3115_v50 = vadd.f32 %v3114_v41, %v2323_v19 }
 0x30e   : > { %v3078_v60 = vadd.f32 %v3077_v12, %v2322_v35  ;;  %v3152_v27 = vadd.f32 %v3151_v9, %v2324_v21  ;;  %v1797_v48 = vpop.f32.mrb[224].mxu0  ;;  %v1990_v34 = vpop.f32.mrb[224].mxu1 }
 0x30f   : > { %v1798_v56 = vadd.f32 %v1797_v48, %v4619_v52  ;;  %v1991_v44 = vadd.f32 %v1990_v34, %v4623_v38  ;;  %v1799_v37 = vpop.f32.mrb[225].mxu0  ;;  %v1992_v20 = vpop.f32.mrb[225].mxu1 }
 0x310   : > { %v1800_v61 = vadd.f32 %v1799_v37, %v4629_v16  ;;  %v1993_v53 = vadd.f32 %v1992_v20, %v4633_v13  ;;  %v1801_v17 = vpop.f32.mrb[226].mxu0  ;;  %v1994_v26 = vpop.f32.mrb[226].mxu1 }
 0x311   : > { %v2337_v36 = vmax.f32 %v1798_v56, 0.0  ;;  %v2339_v40 = vmax.f32 %v1991_v44, 0.0  ;;  %v1802_v10 = vadd.f32 %v1801_v17, %v4619_v52  ;;  %v1995_v18 = vadd.f32 %v1994_v26, %v4623_v38  ;;  %v1803_v31 = vpop.f32.mrb[227].mxu0  ;;  %v1996_v28 = vpop.f32.mrb[227].mxu1 }
 0x312   : > { %v2338_v29 = vmax.f32 %v1800_v61, 0.0  ;;  %v2340_v43 = vmax.f32 %v1993_v53, 0.0  ;;  %v1804_v22 = vadd.f32 %v1803_v31, %v4629_v16  ;;  %v1997_v51 = vadd.f32 %v1996_v28, %v4633_v13 }
 0x313   : > { %v3042_v8 = vadd.f32 %v3041_v6, %v2337_v36  ;;  %v3116_v0 = vadd.f32 %v3115_v50, %v2339_v40  ;;  %v2353_v47 = vmax.f32 %v1802_v10, 0.0  ;;  %v2355_v63 = vmax.f32 %v1995_v18, 0.0 }
 0x314   : > { %v3079_v7 = vadd.f32 %v3078_v60, %v2338_v29  ;;  %v3153_v49 = vadd.f32 %v3152_v27, %v2340_v43  ;;  %v2354_v11 = vmax.f32 %v1804_v22, 0.0  ;;  %v2356_v4 = vmax.f32 %v1997_v51, 0.0 }
 0x315   : > { %v3043_v24 = vadd.f32 %v3042_v8, %v2353_v47  ;;  %v3117_v32 = vadd.f32 %v3116_v0, %v2355_v63 }
 0x316   : > { %v3080_v1 = vadd.f32 %v3079_v7, %v2354_v11  ;;  %v3154_v46 = vadd.f32 %v3153_v49, %v2356_v4  ;;  %v1807_v55 = vpop.f32.mrb[228].mxu0  ;;  %v2000_v14 = vpop.f32.mrb[228].mxu1 }
 0x317   : > { %v1808_v30 = vadd.f32 %v1807_v55, %v4619_v52  ;;  %v2001_v42 = vadd.f32 %v2000_v14, %v4623_v38  ;;  %v1809_v54 = vpop.f32.mrb[229].mxu0  ;;  %v2002_v3 = vpop.f32.mrb[229].mxu1 }
 0x318   : > { %v1810_v15 = vadd.f32 %v1809_v54, %v4629_v16  ;;  %v2003_v5 = vadd.f32 %v2002_v3, %v4633_v13  ;;  %v1811_v25 = vpop.f32.mrb[230].mxu0  ;;  %v2004_v62 = vpop.f32.mrb[230].mxu1 }
 0x319   : > { %v2369_v57 = vmax.f32 %v1808_v30, 0.0  ;;  %v2371_v59 = vmax.f32 %v2001_v42, 0.0  ;;  %v1812_v45 = vadd.f32 %v1811_v25, %v4619_v52  ;;  %v2005_v41 = vadd.f32 %v2004_v62, %v4623_v38  ;;  %v1813_v58 = vpop.f32.mrb[231].mxu0  ;;  %v2006_v19 = vpop.f32.mrb[231].mxu1 }
 0x31a   : > { %v2370_v12 = vmax.f32 %v1810_v15, 0.0  ;;  %v2372_v9 = vmax.f32 %v2003_v5, 0.0  ;;  %v1814_v35 = vadd.f32 %v1813_v58, %v4629_v16  ;;  %v2007_v21 = vadd.f32 %v2006_v19, %v4633_v13 }
 0x31b   : > { %v3044_v6 = vadd.f32 %v3043_v24, %v2369_v57  ;;  %v3118_v50 = vadd.f32 %v3117_v32, %v2371_v59  ;;  %v2385_v60 = vmax.f32 %v1812_v45, 0.0  ;;  %v2387_v27 = vmax.f32 %v2005_v41, 0.0 }
 0x31c   : > { %v3081_v48 = vadd.f32 %v3080_v1, %v2370_v12  ;;  %v3155_v34 = vadd.f32 %v3154_v46, %v2372_v9  ;;  %v2386_v56 = vmax.f32 %v1814_v35, 0.0  ;;  %v2388_v44 = vmax.f32 %v2007_v21, 0.0 }
 0x31d   : > { %v3045_v37 = vadd.f32 %v3044_v6, %v2385_v60  ;;  %v3119_v20 = vadd.f32 %v3118_v50, %v2387_v27 }
 0x31e   : > { %v3082_v61 = vadd.f32 %v3081_v48, %v2386_v56  ;;  %v3156_v53 = vadd.f32 %v3155_v34, %v2388_v44  ;;  %v1817_v17 = vpop.f32.mrb[232].mxu0  ;;  %v2010_v26 = vpop.f32.mrb[232].mxu1 }
 0x31f   : > { %v1818_v36 = vadd.f32 %v1817_v17, %v4619_v52  ;;  %v2011_v40 = vadd.f32 %v2010_v26, %v4623_v38  ;;  %v1819_v10 = vpop.f32.mrb[233].mxu0  ;;  %v2012_v18 = vpop.f32.mrb[233].mxu1 }
 0x320   : > { %v1820_v31 = vadd.f32 %v1819_v10, %v4629_v16  ;;  %v2013_v28 = vadd.f32 %v2012_v18, %v4633_v13  ;;  %v1821_v29 = vpop.f32.mrb[234].mxu0  ;;  %v2014_v43 = vpop.f32.mrb[234].mxu1 }
 0x321   : > { %v2401_v22 = vmax.f32 %v1818_v36, 0.0  ;;  %v2403_v51 = vmax.f32 %v2011_v40, 0.0  ;;  %v1822_v8 = vadd.f32 %v1821_v29, %v4619_v52  ;;  %v2015_v0 = vadd.f32 %v2014_v43, %v4623_v38  ;;  %v1823_v47 = vpop.f32.mrb[235].mxu0  ;;  %v2016_v63 = vpop.f32.mrb[235].mxu1 }
 0x322   : > { %v2402_v7 = vmax.f32 %v1820_v31, 0.0  ;;  %v2404_v49 = vmax.f32 %v2013_v28, 0.0  ;;  %v1824_v11 = vadd.f32 %v1823_v47, %v4629_v16  ;;  %v2017_v4 = vadd.f32 %v2016_v63, %v4633_v13 }
 0x323   : > { %v3046_v24 = vadd.f32 %v3045_v37, %v2401_v22  ;;  %v3120_v32 = vadd.f32 %v3119_v20, %v2403_v51  ;;  %v2417_v1 = vmax.f32 %v1822_v8, 0.0  ;;  %v2419_v46 = vmax.f32 %v2015_v0, 0.0 }
 0x324   : > { %v3083_v55 = vadd.f32 %v3082_v61, %v2402_v7  ;;  %v3157_v14 = vadd.f32 %v3156_v53, %v2404_v49  ;;  %v2418_v30 = vmax.f32 %v1824_v11, 0.0  ;;  %v2420_v42 = vmax.f32 %v2017_v4, 0.0 }
 0x325   : > { %v3047_v54 = vadd.f32 %v3046_v24, %v2417_v1  ;;  %v3121_v3 = vadd.f32 %v3120_v32, %v2419_v46 }
 0x326   : > { %v3084_v15 = vadd.f32 %v3083_v55, %v2418_v30  ;;  %v3158_v5 = vadd.f32 %v3157_v14, %v2420_v42  ;;  %v1827_v25 = vpop.f32.mrb[236].mxu0  ;;  %v2020_v62 = vpop.f32.mrb[236].mxu1 }
 0x327   : > { %v1828_v57 = vadd.f32 %v1827_v25, %v4619_v52  ;;  %v2021_v59 = vadd.f32 %v2020_v62, %v4623_v38  ;;  %v1829_v45 = vpop.f32.mrb[237].mxu0  ;;  %v2022_v41 = vpop.f32.mrb[237].mxu1 }
 0x328   : > { %v1830_v58 = vadd.f32 %v1829_v45, %v4629_v16  ;;  %v2023_v19 = vadd.f32 %v2022_v41, %v4633_v13  ;;  %v1831_v12 = vpop.f32.mrb[238].mxu0  ;;  %v2024_v9 = vpop.f32.mrb[238].mxu1 }
 0x329   : > { %v2433_v35 = vmax.f32 %v1828_v57, 0.0  ;;  %v2435_v21 = vmax.f32 %v2021_v59, 0.0  ;;  %v1832_v6 = vadd.f32 %v1831_v12, %v4619_v52  ;;  %v2025_v50 = vadd.f32 %v2024_v9, %v4623_v38  ;;  %v1833_v60 = vpop.f32.mrb[239].mxu0  ;;  %v2026_v27 = vpop.f32.mrb[239].mxu1 }
 0x32a   : > { %v2434_v48 = vmax.f32 %v1830_v58, 0.0  ;;  %v2436_v34 = vmax.f32 %v2023_v19, 0.0  ;;  %v1834_v56 = vadd.f32 %v1833_v60, %v4629_v16  ;;  %v2027_v44 = vadd.f32 %v2026_v27, %v4633_v13 }
 0x32b   : > { %v3048_v37 = vadd.f32 %v3047_v54, %v2433_v35  ;;  %v3122_v20 = vadd.f32 %v3121_v3, %v2435_v21  ;;  %v2449_v61 = vmax.f32 %v1832_v6, 0.0  ;;  %v2451_v53 = vmax.f32 %v2025_v50, 0.0 }
 0x32c   : > { %v3085_v17 = vadd.f32 %v3084_v15, %v2434_v48  ;;  %v3159_v26 = vadd.f32 %v3158_v5, %v2436_v34  ;;  %v2450_v36 = vmax.f32 %v1834_v56, 0.0  ;;  %v2452_v40 = vmax.f32 %v2027_v44, 0.0 }
 0x32d   : > { %v3049_v10 = vadd.f32 %v3048_v37, %v2449_v61  ;;  %v3123_v18 = vadd.f32 %v3122_v20, %v2451_v53 }
 0x32e   : > { %v3086_v31 = vadd.f32 %v3085_v17, %v2450_v36  ;;  %v3160_v28 = vadd.f32 %v3159_v26, %v2452_v40  ;;  %v1837_v29 = vpop.f32.mrb[240].mxu0  ;;  %v2030_v43 = vpop.f32.mrb[240].mxu1 }
 0x32f   : > { %v1838_v22 = vadd.f32 %v1837_v29, %v4619_v52  ;;  %v2031_v51 = vadd.f32 %v2030_v43, %v4623_v38  ;;  %v1839_v8 = vpop.f32.mrb[241].mxu0  ;;  %v2032_v0 = vpop.f32.mrb[241].mxu1 }
 0x330   : > { %v1840_v47 = vadd.f32 %v1839_v8, %v4629_v16  ;;  %v2033_v63 = vadd.f32 %v2032_v0, %v4633_v13  ;;  %v1841_v7 = vpop.f32.mrb[242].mxu0  ;;  %v2034_v49 = vpop.f32.mrb[242].mxu1 }
 0x331   : > { %v2465_v11 = vmax.f32 %v1838_v22, 0.0  ;;  %v2467_v4 = vmax.f32 %v2031_v51, 0.0  ;;  %v1842_v24 = vadd.f32 %v1841_v7, %v4619_v52  ;;  %v2035_v32 = vadd.f32 %v2034_v49, %v4623_v38  ;;  %v1843_v1 = vpop.f32.mrb[243].mxu0  ;;  %v2036_v46 = vpop.f32.mrb[243].mxu1 }
 0x332   : > { %v2466_v55 = vmax.f32 %v1840_v47, 0.0  ;;  %v2468_v14 = vmax.f32 %v2033_v63, 0.0  ;;  %v1844_v30 = vadd.f32 %v1843_v1, %v4629_v16  ;;  %v2037_v42 = vadd.f32 %v2036_v46, %v4633_v13 }
 0x333   : > { %v3050_v54 = vadd.f32 %v3049_v10, %v2465_v11  ;;  %v3124_v3 = vadd.f32 %v3123_v18, %v2467_v4  ;;  %v2481_v15 = vmax.f32 %v1842_v24, 0.0  ;;  %v2483_v5 = vmax.f32 %v2035_v32, 0.0 }
 0x334   : > { %v3087_v25 = vadd.f32 %v3086_v31, %v2466_v55  ;;  %v3161_v62 = vadd.f32 %v3160_v28, %v2468_v14  ;;  %v2482_v57 = vmax.f32 %v1844_v30, 0.0  ;;  %v2484_v59 = vmax.f32 %v2037_v42, 0.0 }
 0x335   : > { %v3051_v45 = vadd.f32 %v3050_v54, %v2481_v15  ;;  %v3125_v41 = vadd.f32 %v3124_v3, %v2483_v5 }
 0x336   : > { %v3088_v58 = vadd.f32 %v3087_v25, %v2482_v57  ;;  %v3162_v19 = vadd.f32 %v3161_v62, %v2484_v59  ;;  %v1847_v12 = vpop.f32.mrb[244].mxu0  ;;  %v2040_v9 = vpop.f32.mrb[244].mxu1 }
 0x337   : > { %v1848_v35 = vadd.f32 %v1847_v12, %v4619_v52  ;;  %v2041_v21 = vadd.f32 %v2040_v9, %v4623_v38  ;;  %v1849_v6 = vpop.f32.mrb[245].mxu0  ;;  %v2042_v50 = vpop.f32.mrb[245].mxu1 }
 0x338   : > { %v1850_v60 = vadd.f32 %v1849_v6, %v4629_v16  ;;  %v2043_v27 = vadd.f32 %v2042_v50, %v4633_v13  ;;  %v1851_v48 = vpop.f32.mrb[246].mxu0  ;;  %v2044_v34 = vpop.f32.mrb[246].mxu1 }
 0x339   : > { %v2497_v56 = vmax.f32 %v1848_v35, 0.0  ;;  %v2499_v44 = vmax.f32 %v2041_v21, 0.0  ;;  %v1852_v37 = vadd.f32 %v1851_v48, %v4619_v52  ;;  %v2045_v20 = vadd.f32 %v2044_v34, %v4623_v38  ;;  %v1853_v61 = vpop.f32.mrb[247].mxu0  ;;  %v2046_v53 = vpop.f32.mrb[247].mxu1 }
 0x33a   : > { %v2498_v17 = vmax.f32 %v1850_v60, 0.0  ;;  %v2500_v26 = vmax.f32 %v2043_v27, 0.0  ;;  %v1854_v36 = vadd.f32 %v1853_v61, %v4629_v16  ;;  %v2047_v40 = vadd.f32 %v2046_v53, %v4633_v13 }
 0x33b   : > { %v3052_v10 = vadd.f32 %v3051_v45, %v2497_v56  ;;  %v3126_v18 = vadd.f32 %v3125_v41, %v2499_v44  ;;  %v2513_v31 = vmax.f32 %v1852_v37, 0.0  ;;  %v2515_v28 = vmax.f32 %v2045_v20, 0.0 }
 0x33c   : > { %v3089_v29 = vadd.f32 %v3088_v58, %v2498_v17  ;;  %v3163_v43 = vadd.f32 %v3162_v19, %v2500_v26  ;;  %v2514_v22 = vmax.f32 %v1854_v36, 0.0  ;;  %v2516_v51 = vmax.f32 %v2047_v40, 0.0 }
 0x33d   : > { %v3053_v8 = vadd.f32 %v3052_v10, %v2513_v31  ;;  %v3127_v0 = vadd.f32 %v3126_v18, %v2515_v28 }
 0x33e   : > { %v3090_v47 = vadd.f32 %v3089_v29, %v2514_v22  ;;  %v3164_v63 = vadd.f32 %v3163_v43, %v2516_v51  ;;  %v1857_v7 = vpop.f32.mrb[248].mxu0 }
 0x33f   : > { %v1858_v49 = vadd.f32 %v1857_v7, %v4619_v52  ;;  %v2050_v11 = vpop.f32.mrb[248].mxu1  ;;  %v1859_v4 = vpop.f32.mrb[249].mxu0 }
 0x340   : > { %v2051_v24 = vadd.f32 %v2050_v11, %v4623_v38  ;;  %v1860_v32 = vadd.f32 %v1859_v4, %v4629_v16  ;;  %v2052_v1 = vpop.f32.mrb[249].mxu1  ;;  %v1861_v46 = vpop.f32.mrb[250].mxu0 }
 0x341   : > { %v2529_v55 = vmax.f32 %v1858_v49, 0.0  ;;  %v2053_v14 = vadd.f32 %v2052_v1, %v4633_v13  ;;  %v1862_v30 = vadd.f32 %v1861_v46, %v4619_v52  ;;  %v2054_v42 = vpop.f32.mrb[250].mxu1  ;;  %v1863_v54 = vpop.f32.mrb[251].mxu0 }
 0x342   : > { %v2531_v3 = vmax.f32 %v2051_v24, 0.0  ;;  %v2530_v15 = vmax.f32 %v1860_v32, 0.0  ;;  %v2055_v5 = vadd.f32 %v2054_v42, %v4623_v38  ;;  %v1864_v25 = vadd.f32 %v1863_v54, %v4629_v16  ;;  %v2056_v62 = vpop.f32.mrb[251].mxu1 }
 0x343   : > { %v3054_v57 = vadd.f32 %v3053_v8, %v2529_v55  ;;  %v2532_v59 = vmax.f32 %v2053_v14, 0.0  ;;  %v2545_v45 = vmax.f32 %v1862_v30, 0.0  ;;  %v2057_v41 = vadd.f32 %v2056_v62, %v4633_v13 }
 0x344   : > { %v3128_v58 = vadd.f32 %v3127_v0, %v2531_v3  ;;  %v3091_v19 = vadd.f32 %v3090_v47, %v2530_v15  ;;  %v2547_v12 = vmax.f32 %v2055_v5, 0.0  ;;  %v2546_v9 = vmax.f32 %v1864_v25, 0.0 }
 0x345   : > { %v3165_v35 = vadd.f32 %v3164_v63, %v2532_v59  ;;  %v3055_v21 = vadd.f32 %v3054_v57, %v2545_v45  ;;  %v2548_v6 = vmax.f32 %v2057_v41, 0.0 }
 0x346   : > { %v3129_v50 = vadd.f32 %v3128_v58, %v2547_v12  ;;  %v3092_v60 = vadd.f32 %v3091_v19, %v2546_v9  ;;  %v1867_v27 = vpop.f32.mrb[252].mxu0 }
 0x347   : > { %v3166_v48 = vadd.f32 %v3165_v35, %v2548_v6  ;;  %v1868_v34 = vadd.f32 %v1867_v27, %v4619_v52  ;;  %v2060_v56 = vpop.f32.mrb[252].mxu1  ;;  %v1869_v44 = vpop.f32.mrb[253].mxu0 }
 0x348   : > { %v2061_v37 = vadd.f32 %v2060_v56, %v4623_v38  ;;  %v1870_v20 = vadd.f32 %v1869_v44, %v4629_v16  ;;  %v2062_v61 = vpop.f32.mrb[253].mxu1  ;;  %v1871_v53 = vpop.f32.mrb[254].mxu0  ;;  %v3546_v44 = vld [vmem:[%s4800_s2 + $0x21] ss:$4 sm:$0xff] }
 0x349   : > { %v2561_v17 = vmax.f32 %v1868_v34, 0.0  ;;  %v2063_v26 = vadd.f32 %v2062_v61, %v4633_v13  ;;  %v1872_v36 = vadd.f32 %v1871_v53, %v4619_v52  ;;  %v2064_v40 = vpop.f32.mrb[254].mxu1  ;;  %v1873_v10 = vpop.f32.mrb[255].mxu0  ;;  %v3280_v34 = vrot.slane %v3272_v23, %v4188_v2 }
 0x34a   : > { %v2563_v18 = vmax.f32 %v2061_v37, 0.0  ;;  %v2562_v31 = vmax.f32 %v1870_v20, 0.0  ;;  %v2065_v28 = vadd.f32 %v2064_v40, %v4623_v38  ;;  %v1874_v29 = vadd.f32 %v1873_v10, %v4629_v16  ;;  %v2066_v43 = vpop.f32.mrb[255].mxu1  ;;  %v3548_v20 = vld [vmem:[%s4800_s2 + $0x22] ss:$4 sm:$0xff] }
 0x34b   : > { %v3056_v22 = vadd.f32 %v3055_v21, %v2561_v17  ;;  %v2564_v51 = vmax.f32 %v2063_v26, 0.0  ;;  %v2577_v8 = vmax.f32 %v1872_v36, 0.0  ;;  %v2067_v0 = vadd.f32 %v2066_v43, %v4633_v13 }
 0x34c   : > { %v3130_v47 = vadd.f32 %v3129_v50, %v2563_v18  ;;  %v3093_v63 = vadd.f32 %v3092_v60, %v2562_v31  ;;  %v2579_v7 = vmax.f32 %v2065_v28, 0.0  ;;  %v2578_v49 = vmax.f32 %v1874_v29, 0.0 }
 0x34d   : > { %v3167_v11 = vadd.f32 %v3166_v48, %v2564_v51  ;;  %v3057_v52 = vadd.f32 %v3056_v22, %v2577_v8  ;;  %v2580_v4 = vmax.f32 %v2067_v0, 0.0 }
 0x34e   : > { %v3131_v24 = vadd.f32 %v3130_v47, %v2579_v7  ;;  %v3094_v32 = vadd.f32 %v3093_v63, %v2578_v49 }
 0x34f   : > { %v3058_v1 = vrot.slane %v3057_v52, 4  ;;  %v3168_v46 = vadd.f32 %v3167_v11, %v2580_v4 }
 0x350   : > { %v3132_v38 = vrot.slane %v3131_v24, 4  ;;  %v3095_v55 = vrot.slane %v3094_v32, 4 }
 0x351   : > { %v3059_v16 = vadd.f32 %v3058_v1, %v3057_v52  ;;  %v3169_v14 = vrot.slane %v3168_v46, 4 }
 0x352   : > { %v3133_v30 = vadd.f32 %v3132_v38, %v3131_v24  ;;  %v3096_v42 = vadd.f32 %v3095_v55, %v3094_v32 }
 0x353   : > { %v3060_v54 = vrot.slane %v3059_v16, 2  ;;  %v3170_v3 = vadd.f32 %v3169_v14, %v3168_v46 }
 0x354   : > { %v3134_v13 = vrot.slane %v3133_v30, 2  ;;  %v3097_v15 = vrot.slane %v3096_v42, 2 }
 0x355   : > { %v3061_v5 = vadd.f32 %v3060_v54, %v3059_v16  ;;  %v3171_v25 = vrot.slane %v3170_v3, 2 }
 0x356   : > { %v3135_v62 = vadd.f32 %v3134_v13, %v3133_v30  ;;  %v3098_v57 = vadd.f32 %v3097_v15, %v3096_v42 }
 0x357   : > { %v3062_v59 = vrot.slane %v3061_v5, 1  ;;  %v3172_v45 = vadd.f32 %v3171_v25, %v3170_v3 }
 0x358   : > { %v3136_v41 = vrot.slane %v3135_v62, 1  ;;  %v3099_v58 = vrot.slane %v3098_v57, 1 }
 0x359   : > { %v3063_v19 = vadd.f32 %v3062_v59, %v3061_v5  ;;  %v3173_v12 = vrot.slane %v3172_v45, 1 }
 0x35a   : > { %v3137_v9 = vadd.f32 %v3136_v41, %v3135_v62  ;;  %v3100_v35 = vadd.f32 %v3099_v58, %v3098_v57 }
 0x35b   : > { %v3174_v21 = vadd.f32 %v3173_v12, %v3172_v45 }
 0x35c   : > { %v3242_v6 = vcombine.low %v3063_v19, %v3100_v35 }
 0x35d   : > { %v3243_v50 = vcombine.low %v3137_v9, %v3174_v21 }
 0x35e   : > { %v3264_v60 = vrot.slane %v3242_v6, %v4188_v2 }
 0x35f   : > { %v3271_v27 = vrot.slane %v3243_v50, %v4188_v2 }
 0x361   : > { %v3273_v48 = vcombine.low %v3264_v60, %v3271_v27 }
 0x363   : > { %v3287_v56 = vrot.slane %v3273_v48, %v4188_v2 }
 0x365   : > { %v3288_v37 = vcombine.low %v3280_v34, %v3287_v56 }
 0x367   : > { %v3305_v61 = vmul.f32 %v3546_v44, %v3288_v37 }
 0x369   : > { %v3311_v53 = vadd.f32 %v3548_v20, %v3305_v61 }
 0x36b   : > { %3313 = vst [vmem:[%s4503_s17 + $0x8] sm:$0xff] %v3311_v53 }
 0x36c PF: > { %s13_s14 = sadd.s32 1, %s3608_s14   ;;  %s4808_s12 = smov %s3604_s13 }
 0x36d   : > { %p10_p5 = scmp.ge.s32.totalorder %s13_s14, 4   ;;  %s4809_s13 = smov %s4811_s15 }
 0x36f   :  { %12 = sbr.rel (!%p10_p5) target bundleno = 2 (0x2), region = 75 }

</bundles_post_ra>
